<compile_context>
chip_gen: v6e
topology: v6e:2x2x1
jax: 0.10.0
libtpu: 0.0.40
codegen_flags: <defaults>
</compile_context>

<pallas_src>
import numpy as np
import jax
import jax.numpy as jnp
from jax import lax
from jax.experimental import pallas as pl
from jax.experimental.pallas import tpu as pltpu

EPS = 1e-5


# ----------------------------------------------------------------------------
# In-kernel helpers (operate on lane-dense (bb, H, W*C) blocks).
# ----------------------------------------------------------------------------
def _sigmoid(v):
    # Exact sigmoid: exp runs on the EUP; the divide is cheap and keeps the
    # kernel bit-close to the reference (approx reciprocal previously caused a
    # ~5e-3 systematic error on the activation path).
    return 1.0 / (1.0 + jnp.exp(-v))


def _silu(v):
    return v * _sigmoid(v)


def _group_norm(x3, proj_ref, gamma_ref, beta_ref):
    """GroupNorm on a (bb, H, W*C) lane-dense block.

    proj_ref : (W*C, W*C) group-averaging projector (mem @ mem.T / count),
               precomputed host-side -> 2 tiny matmuls per GN instead of 4.
    Stats are exact two-pass (centered) f32.
    """
    s1 = jnp.sum(x3, axis=1)                                                # (bb, WC)
    mean = jnp.dot(s1, proj_ref[...], preferred_element_type=jnp.float32)   # (bb, WC)
    xc = x3 - mean[:, None, :]
    s2 = jnp.sum(xc * xc, axis=1)                                           # (bb, WC)
    var = jnp.dot(s2, proj_ref[...], preferred_element_type=jnp.float32)    # (bb, WC)
    inv = lax.rsqrt(var + EPS)
    return xc * inv[:, None, :] * gamma_ref[...] + beta_ref[...]


def _conv3x3_banded(act3, band_ref, bias_ref):
    """3x3 SAME conv as 3 banded matmuls on the batch-stacked (bb*H, W*C) slab.

    band_ref : (3, W*Cin, W*Cout) per-kernel-row banded weight; the horizontal
               zero-pad is folded into the band, so only the vertical halo is
               handled here -- via per-image row-shifted copies with a zero
               halo row (no vpad VMEM scratch, no per-step halo zeroing).
    """
    bb, H, WC = act3.shape
    WCout = band_ref.shape[2]
    M = bb * H
    wdt = band_ref.dtype
    zrow = jnp.zeros((bb, 1, WC), jnp.float32)
    up = jnp.concatenate([zrow, act3[:, :H - 1, :]], axis=1)    # row r <- row r-1
    dn = jnp.concatenate([act3[:, 1:, :], zrow], axis=1)        # row r <- row r+1
    out = jnp.dot(up.reshape(M, WC).astype(wdt), band_ref[0],
                  preferred_element_type=jnp.float32)
    out = out + jnp.dot(act3.reshape(M, WC).astype(wdt), band_ref[1],
                        preferred_element_type=jnp.float32)
    out = out + jnp.dot(dn.reshape(M, WC).astype(wdt), band_ref[2],
                        preferred_element_type=jnp.float32)
    return (out + bias_ref[...]).reshape(bb, H, WCout)


# ----------------------------------------------------------------------------
# Fused ResnetBlock kernel: one grid step == `bb` stacked batch elements.
# ----------------------------------------------------------------------------
def resnet_block_kernel(
        # per-grid-step activations
        x_ref, scale_ref, shift_ref,
        # block1: GroupNorm + SiLU + Conv3x3 (dim -> dim_out)
        g1_ref, b1_ref, p1_ref, band1_ref, cb1_ref,
        # block2: GroupNorm + time scale/shift + SiLU + Conv3x3 (dim_out -> dim_out)
        g2_ref, b2_ref, p2_ref, band2_ref, cb2_ref,
        # GlobalContext gate (memc/memct already folded into w1/w2/bg2)
        wk_ref, rmat_ref, w1_ref, bg1_ref, w2_ref, bg2_ref,
        # residual 1x1 conv
        wr_ref, br_ref,
        # output
        out_ref):
    bb, H, WCin = x_ref.shape
    WCout = out_ref.shape[2]
    M = bb * H

    x3 = x_ref[...].astype(jnp.float32)                                    # (bb, H, WCin)

    # ---- block1 ----
    xn1 = _group_norm(x3, p1_ref, g1_ref, b1_ref)
    h1 = _conv3x3_banded(_silu(xn1), band1_ref, cb1_ref)                   # (bb, H, WCout)

    # ---- block2 (time-emb scale/shift applied here only) ----
    xn2 = _group_norm(h1, p2_ref, g2_ref, b2_ref)
    xn2 = xn2 * (1.0 + scale_ref[...]) + shift_ref[...]
    h2 = _conv3x3_banded(_silu(xn2), band2_ref, cb2_ref)                   # (bb, H, WCout)

    # ---- GlobalContext squeeze-excite gate (per image) ----
    # (to_k bias omitted: a constant added to every logit cancels in softmax)
    ctx = jnp.dot(h2.reshape(M, WCout), wk_ref[...],
                  preferred_element_type=jnp.float32).reshape(bb, H, -1)   # (bb, H, W)
    m = jnp.max(jnp.max(ctx, axis=2, keepdims=True), axis=1, keepdims=True)
    p = jnp.exp(ctx - m)
    denom = jnp.sum(jnp.sum(p, axis=2, keepdims=True), axis=1, keepdims=True)
    attn = (p * (1.0 / denom)).reshape(M, -1)                              # (M, W)
    attn_rep = jnp.dot(attn, rmat_ref[...],
                       preferred_element_type=jnp.float32).reshape(bb, H, WCout)
    lane_pool = jnp.sum(attn_rep * h2, axis=1)                             # (bb, WCout)
    y = _silu(jnp.dot(lane_pool, w1_ref[...],
                      preferred_element_type=jnp.float32) + bg1_ref[...])  # (bb, hidden)
    gate = _sigmoid(jnp.dot(y, w2_ref[...],
                            preferred_element_type=jnp.float32) + bg2_ref[...])  # (bb, WCout)

    # ---- residual 1x1 conv + combine ----
    res = jnp.dot(x3.reshape(M, WCin).astype(wr_ref.dtype), wr_ref[...],
                  preferred_element_type=jnp.float32) + br_ref[...]        # (M, WCout)
    out = h2 * gate[:, None, :] + res.reshape(bb, H, WCout)
    out_ref[...] = out.astype(out_ref.dtype)


# ----------------------------------------------------------------------------
# Host-side, one-time layout plumbing (banded weights, projectors, folds).
# ----------------------------------------------------------------------------
_WEIGHT_KEYS = ("g1t", "b1t", "p1", "band1", "cb1t",
                "g2t", "b2t", "p2", "band2", "cb2t",
                "wkband", "rmat", "w1f", "bg1", "w2f", "bg2f",
                "wrband", "brt")


def prepare_params(raw, H, W, groups, weight_dtype=jnp.float32):
    """weight_dtype applies only to the three big banded conv weights (the
    dominant HBM/VMEM traffic); GN projectors / stats / small mats stay f32.
    NOTE: the banded-weight trick scales as (W*C)^2 -- fine here, but a
    channel-major (H*W, C) conv path is needed once C >= 128 (review item)."""
    conv1 = np.asarray(raw["conv1_w"], np.float32)        # (3, 3, Cin, Cout) HWIO
    conv2 = np.asarray(raw["conv2_w"], np.float32)
    cin, cout = conv1.shape[2], conv1.shape[3]

    def band3x3(wc):
        ci, co = wc.shape[2], wc.shape[3]
        b = np.zeros((3, W * ci, W * co), np.float32)
        for kh in range(3):
            for w in range(W):
                for kw in range(3):
                    wi = w + kw - 1                       # source column (SAME pad)
                    if 0 <= wi < W:
                        b[kh, wi * ci:(wi + 1) * ci, w * co:(w + 1) * co] = wc[kh, kw]
        return jnp.asarray(b, weight_dtype)

    def band1x1(wm):                                      # (Ci, Co) -> block-diagonal
        ci, co = wm.shape
        b = np.zeros((W * ci, W * co), np.float32)
        for w in range(W):
            b[w * ci:(w + 1) * ci, w * co:(w + 1) * co] = wm
        return jnp.asarray(b, weight_dtype)

    def tile_w(v):                                        # (1, C) -> (1, W*C)
        return jnp.tile(jnp.asarray(v, jnp.float32).reshape(1, -1), (1, W))

    def gn_projector(c):                                  # (W*C, W*C) mem @ mem.T / count
        cpg = c // groups
        grp = np.tile(np.repeat(np.arange(groups), cpg), W)
        proj = (grp[:, None] == grp[None, :]).astype(np.float32)
        return jnp.asarray(proj / float(H * W * cpg))

    wk = np.asarray(raw["wk"], np.float32)                # (Cout, 1)
    wkband = np.zeros((W * cout, W), np.float32)
    rmat = np.zeros((W, W * cout), np.float32)
    for w in range(W):
        wkband[w * cout:(w + 1) * cout, w] = wk[:, 0]
        rmat[w, w * cout:(w + 1) * cout] = 1.0

    # GCA folds: memc into w1, memct into w2 / bias (sigmoid commutes with the
    # 0/1 replication) -- two fewer serial M=1 matmuls in the gate tail.
    w1 = np.asarray(raw["w1"], np.float32)
    w2 = np.asarray(raw["w2"], np.float32)
    bg2 = np.asarray(raw["b2"], np.float32).reshape(1, -1)

    return dict(
        g1t=tile_w(raw["gn1_w"]), b1t=tile_w(raw["gn1_b"]),
        p1=gn_projector(cin), band1=band3x3(conv1), cb1t=tile_w(raw["conv1_b"]),
        g2t=tile_w(raw["gn2_w"]), b2t=tile_w(raw["gn2_b"]),
        p2=gn_projector(cout), band2=band3x3(conv2), cb2t=tile_w(raw["conv2_b"]),
        wkband=jnp.asarray(wkband), rmat=jnp.asarray(rmat),
        w1f=jnp.asarray(np.tile(w1, (W, 1))),             # (W*Cout, hidden)
        bg1=jnp.asarray(raw["b1"], jnp.float32),
        w2f=jnp.asarray(np.tile(w2, (1, W))),             # (hidden, W*Cout)
        bg2f=jnp.asarray(np.tile(bg2, (1, W))),
        wrband=band1x1(np.asarray(raw["wr"], np.float32)), brt=tile_w(raw["br"]),
        time_w=jnp.asarray(raw["time_w"], jnp.float32),
        time_b=jnp.asarray(raw["time_b"], jnp.float32),
    )


def _const_spec(a):
    """Full-array constant-index weight block, single-buffered: constant
    operands don't need double-buffering, so this halves the weight VMEM."""
    zeros = (0,) * a.ndim
    try:
        return pl.BlockSpec(a.shape, lambda b: zeros, pipeline_mode=pl.Buffered(1))
    except (TypeError, AttributeError):                   # older jax: no pipeline_mode
        return pl.BlockSpec(a.shape, lambda b: zeros)


# ----------------------------------------------------------------------------
# Public forward: NHWC / lane-dense in and out (no HBM transpose passes).
# cond / cross_attn path (cond_dim is None config) is not exercised.
# ----------------------------------------------------------------------------
def resnet_block_forward(prep, x_hwc, time_emb, *, bb=None):
    B, H, W, Cin = x_hwc.shape
    WCout = prep["brt"].shape[1]
    cout = WCout // W
    WCin = W * Cin
    if bb is None:
        bb = B              # tiny-batch default; target bb*H >= 128 (v5e) / 256 (v6e,v7x)
    assert B % bb == 0, (B, bb)

    # time_mlp (SiLU + Linear) is ~4 KFLOP: leave it to plain XLA.
    te = jax.nn.silu(time_emb) @ prep["time_w"] + prep["time_b"]           # (B, 2*Cout)
    scale_t = jnp.tile(te[:, :cout], (1, W)).reshape(B, 1, WCout)
    shift_t = jnp.tile(te[:, cout:], (1, W)).reshape(B, 1, WCout)

    x2d = x_hwc.reshape(B, H, WCin)                                        # free reshape

    weights = [prep[k] for k in _WEIGHT_KEYS]

    out2d = pl.pallas_call(
        resnet_block_kernel,
        out_shape=jax.ShapeDtypeStruct((B, H, WCout), x_hwc.dtype),
        grid=(B // bb,),
        in_specs=[
            pl.BlockSpec((bb, H, WCin), lambda b: (b, 0, 0)),
            pl.BlockSpec((bb, 1, WCout), lambda b: (b, 0, 0)),
            pl.BlockSpec((bb, 1, WCout), lambda b: (b, 0, 0)),
        ] + [_const_spec(a) for a in weights],
        out_specs=pl.BlockSpec((bb, H, WCout), lambda b: (b, 0, 0)),
        compiler_params=pltpu.CompilerParams(
            dimension_semantics=("parallel",),            # v7x: grid steps -> 2 TCs
            vmem_limit_bytes=64 * 1024 * 1024),
    )(x2d, scale_t, shift_t, *weights)

    return out2d.reshape(B, H, W, cout)


# ----------------------------------------------------------------------------
# Pure-JAX reference (mirrors the PyTorch forward, NCHW) for validation.
# ----------------------------------------------------------------------------
def ref_forward(params, x_nchw, t, groups):
    te = jax.nn.silu(t) @ params["time_w"] + params["time_b"]
    D = params["conv2_w"].shape[-1]
    scale = te[:, :D][:, :, None, None]
    shift = te[:, D:][:, :, None, None]

    def gn(x, w, b):
        B, C, H, W = x.shape
        xg = x.reshape(B, groups, C // groups, H, W)
        mean = xg.mean(axis=(2, 3, 4), keepdims=True)
        var = xg.var(axis=(2, 3, 4), keepdims=True)
        xn = ((xg - mean) / jnp.sqrt(var + EPS)).reshape(B, C, H, W)
        return xn * w.reshape(1, C, 1, 1) + b.reshape(1, C, 1, 1)

    def block(x, gw, gb, cw, cb, ss=None):
        xn = gn(x, gw, gb)
        if ss is not None:
            xn = xn * (ss[0] + 1) + ss[1]
        a = jax.nn.silu(xn)
        y = lax.conv_general_dilated(a, cw, (1, 1), "SAME",
                                     dimension_numbers=("NCHW", "HWIO", "NCHW"))
        return y + cb.reshape(1, -1, 1, 1)

    h = block(x_nchw, params["gn1_w"], params["gn1_b"], params["conv1_w"], params["conv1_b"])
    h = block(h, params["gn2_w"], params["gn2_b"], params["conv2_w"], params["conv2_b"],
              (scale, shift))

    B, C, H, W = h.shape
    ctx = jnp.einsum("bchw,co->bohw", h, params["wk"]) + params["bk"].reshape(1, 1, 1, 1)
    a = jax.nn.softmax(ctx.reshape(B, H * W), axis=-1)
    pooled = jnp.einsum("bn,bcn->bc", a, h.reshape(B, C, H * W))
    y1 = jax.nn.silu(pooled @ params["w1"] + params["b1"])
    gate = jax.nn.sigmoid(y1 @ params["w2"] + params["b2"])
    h = h * gate[:, :, None, None]

    res = jnp.einsum("bchw,co->bohw", x_nchw, params["wr"]) + params["br"].reshape(1, -1, 1, 1)
    return h + res


if __name__ == "__main__":
    B, H, W = 2, 16, 16
    dim, dim_out, groups, tdim = 8, 16, 8, 32
    hidden = max(3, dim_out // 2)

    key = jax.random.PRNGKey(0)
    ks = jax.random.split(key, 20)

    def rnd(k, shape, s=0.1):
        return (s * jax.random.normal(k, shape)).astype(jnp.float32)

    raw = dict(
        time_w=rnd(ks[0], (tdim, 2 * dim_out)),
        time_b=rnd(ks[1], (1, 2 * dim_out)),
        gn1_w=(1.0 + rnd(ks[2], (1, dim))),
        gn1_b=rnd(ks[3], (1, dim)),
        conv1_w=rnd(ks[4], (3, 3, dim, dim_out)),        # HWIO
        conv1_b=rnd(ks[5], (1, dim_out)),
        gn2_w=(1.0 + rnd(ks[6], (1, dim_out))),
        gn2_b=rnd(ks[7], (1, dim_out)),
        conv2_w=rnd(ks[8], (3, 3, dim_out, dim_out)),    # HWIO
        conv2_b=rnd(ks[9], (1, dim_out)),
        wk=rnd(ks[10], (dim_out, 1)),
        bk=rnd(ks[11], (1, 1)),
        w1=rnd(ks[12], (dim_out, hidden)),
        b1=rnd(ks[13], (1, hidden)),
        w2=rnd(ks[14], (hidden, dim_out)),
        b2=rnd(ks[15], (1, dim_out)),
        wr=rnd(ks[16], (dim, dim_out)),
        br=rnd(ks[17], (1, dim_out)),
    )

    # Inputs are NHWC (lane-dense) -- no transpose around the kernel.
    x_hwc = jax.random.normal(ks[18], (B, H, W, dim), jnp.float32)
    time_emb = jax.random.normal(ks[19], (B, tdim), jnp.float32)

    # Reference in NCHW (PyTorch semantics); transpose only in the harness.
    x_nchw = jnp.transpose(x_hwc, (0, 3, 1, 2))
    ref = ref_forward(raw, x_nchw, time_emb, groups)

    # ---- f32 run: validated tightly against the reference ----
    prep32 = prepare_params(raw, H, W, groups, weight_dtype=jnp.float32)
    out_hwc = jax.block_until_ready(resnet_block_forward(prep32, x_hwc, time_emb))
    assert out_hwc.shape == (B, H, W, dim_out)
    err32 = float(jnp.max(jnp.abs(jnp.transpose(out_hwc, (0, 3, 1, 2)) - ref)))
    assert err32 < 2e-3, err32

    # ---- bf16 banded-weight run (halves weight DMA/VMEM, bf16 MXU rate);
    #      accumulation stays f32, loose sanity bound vs the f32 reference. ----
    prep16 = prepare_params(raw, H, W, groups, weight_dtype=jnp.bfloat16)
    out16 = jax.block_until_ready(resnet_block_forward(prep16, x_hwc, time_emb))
    err16 = float(jnp.max(jnp.abs(jnp.transpose(out16, (0, 3, 1, 2)) - ref)))
    assert err16 < 5e-2, err16

    # TODO(synk): cross_attn path (cond_dim is not None) is not implemented.
    print("KERNEL_OK")
</pallas_src>

<mosaic_0001>
module attributes {stable_mosaic.version = 11 : i64} {
  func.func @resnet_block_kernel(%arg0: i32, %arg1: memref<2x16x128xf32, #tpu.memory_space<vmem>>, %arg2: memref<2x1x256xf32, #tpu.memory_space<vmem>>, %arg3: memref<2x1x256xf32, #tpu.memory_space<vmem>>, %arg4: memref<1x128xf32, #tpu.memory_space<vmem>>, %arg5: memref<1x128xf32, #tpu.memory_space<vmem>>, %arg6: memref<128x128xf32, #tpu.memory_space<vmem>>, %arg7: memref<3x128x256xf32, #tpu.memory_space<vmem>>, %arg8: memref<1x256xf32, #tpu.memory_space<vmem>>, %arg9: memref<1x256xf32, #tpu.memory_space<vmem>>, %arg10: memref<1x256xf32, #tpu.memory_space<vmem>>, %arg11: memref<256x256xf32, #tpu.memory_space<vmem>>, %arg12: memref<3x256x256xf32, #tpu.memory_space<vmem>>, %arg13: memref<1x256xf32, #tpu.memory_space<vmem>>, %arg14: memref<256x16xf32, #tpu.memory_space<vmem>>, %arg15: memref<16x256xf32, #tpu.memory_space<vmem>>, %arg16: memref<256x8xf32, #tpu.memory_space<vmem>>, %arg17: memref<1x8xf32, #tpu.memory_space<vmem>>, %arg18: memref<8x256xf32, #tpu.memory_space<vmem>>, %arg19: memref<1x256xf32, #tpu.memory_space<vmem>>, %arg20: memref<128x256xf32, #tpu.memory_space<vmem>>, %arg21: memref<1x256xf32, #tpu.memory_space<vmem>>, %arg22: memref<2x16x256xf32, #tpu.memory_space<vmem>>) attributes {dimension_semantics = [#tpu.dimension_semantics<parallel>], iteration_bounds = array<i64: 1>, scalar_prefetch = 0 : i64, scratch_operands = 0 : i64, tpu.core_type = #tpu.core_type<tc>, window_params = [{transform_indices = @transform_0, window_bounds = array<i64: 2, 16, 128>}, {transform_indices = @transform_1, window_bounds = array<i64: 2, 1, 256>}, {transform_indices = @transform_2, window_bounds = array<i64: 2, 1, 256>}, {pipeline_mode = #tpu.pipeline_mode<synchronous>, transform_indices = @transform_3, window_bounds = array<i64: 1, 128>}, {pipeline_mode = #tpu.pipeline_mode<synchronous>, transform_indices = @transform_4, window_bounds = array<i64: 1, 128>}, {pipeline_mode = #tpu.pipeline_mode<synchronous>, transform_indices = @transform_5, window_bounds = array<i64: 128, 128>}, {pipeline_mode = #tpu.pipeline_mode<synchronous>, transform_indices = @transform_6, window_bounds = array<i64: 3, 128, 256>}, {pipeline_mode = #tpu.pipeline_mode<synchronous>, transform_indices = @transform_7, window_bounds = array<i64: 1, 256>}, {pipeline_mode = #tpu.pipeline_mode<synchronous>, transform_indices = @transform_8, window_bounds = array<i64: 1, 256>}, {pipeline_mode = #tpu.pipeline_mode<synchronous>, transform_indices = @transform_9, window_bounds = array<i64: 1, 256>}, {pipeline_mode = #tpu.pipeline_mode<synchronous>, transform_indices = @transform_10, window_bounds = array<i64: 256, 256>}, {pipeline_mode = #tpu.pipeline_mode<synchronous>, transform_indices = @transform_11, window_bounds = array<i64: 3, 256, 256>}, {pipeline_mode = #tpu.pipeline_mode<synchronous>, transform_indices = @transform_12, window_bounds = array<i64: 1, 256>}, {pipeline_mode = #tpu.pipeline_mode<synchronous>, transform_indices = @transform_13, window_bounds = array<i64: 256, 16>}, {pipeline_mode = #tpu.pipeline_mode<synchronous>, transform_indices = @transform_14, window_bounds = array<i64: 16, 256>}, {pipeline_mode = #tpu.pipeline_mode<synchronous>, transform_indices = @transform_15, window_bounds = array<i64: 256, 8>}, {pipeline_mode = #tpu.pipeline_mode<synchronous>, transform_indices = @transform_16, window_bounds = array<i64: 1, 8>}, {pipeline_mode = #tpu.pipeline_mode<synchronous>, transform_indices = @transform_17, window_bounds = array<i64: 8, 256>}, {pipeline_mode = #tpu.pipeline_mode<synchronous>, transform_indices = @transform_18, window_bounds = array<i64: 1, 256>}, {pipeline_mode = #tpu.pipeline_mode<synchronous>, transform_indices = @transform_19, window_bounds = array<i64: 128, 256>}, {pipeline_mode = #tpu.pipeline_mode<synchronous>, transform_indices = @transform_20, window_bounds = array<i64: 1, 256>}, {transform_indices = @transform_21, window_bounds = array<i64: 2, 16, 256>}]} {
    %c0 = arith.constant 0 : index
    %c0_0 = arith.constant 0 : index
    %c0_1 = arith.constant 0 : index
    %0 = vector.load %arg1[%c0, %c0_0, %c0_1] : memref<2x16x128xf32, #tpu.memory_space<vmem>>, vector<2x16x128xf32>
    %cst = arith.constant dense<0.000000e+00> : vector<2x128xf32>
    %1 = vector.multi_reduction <add>, %0, %cst [1] : vector<2x16x128xf32> to vector<2x128xf32>
    %c0_2 = arith.constant 0 : index
    %c0_3 = arith.constant 0 : index
    %2 = vector.load %arg6[%c0_2, %c0_3] : memref<128x128xf32, #tpu.memory_space<vmem>>, vector<128x128xf32>
    %cst_4 = arith.constant dense<0.000000e+00> : vector<2x128xf32>
    %3 = tpu.matmul %1, %2, %cst_4 {dimension_numbers = #tpu.dot_dimension_numbers<[1], [0], [0], [1], [0, 0, 1, 1], [], []>} : vector<2x128xf32>, vector<128x128xf32>, vector<2x128xf32> -> vector<2x128xf32>
    %4 = vector.shape_cast %3 : vector<2x128xf32> to vector<2x1x128xf32>
    %5 = vector.broadcast %4 : vector<2x1x128xf32> to vector<2x16x128xf32>
    %6 = arith.subf %0, %5 : vector<2x16x128xf32>
    %7 = arith.mulf %6, %6 : vector<2x16x128xf32>
    %cst_5 = arith.constant dense<0.000000e+00> : vector<2x128xf32>
    %8 = vector.multi_reduction <add>, %7, %cst_5 [1] : vector<2x16x128xf32> to vector<2x128xf32>
    %c0_6 = arith.constant 0 : index
    %c0_7 = arith.constant 0 : index
    %9 = vector.load %arg6[%c0_6, %c0_7] : memref<128x128xf32, #tpu.memory_space<vmem>>, vector<128x128xf32>
    %cst_8 = arith.constant dense<0.000000e+00> : vector<2x128xf32>
    %10 = tpu.matmul %8, %9, %cst_8 {dimension_numbers = #tpu.dot_dimension_numbers<[1], [0], [0], [1], [0, 0, 1, 1], [], []>} : vector<2x128xf32>, vector<128x128xf32>, vector<2x128xf32> -> vector<2x128xf32>
    %cst_9 = arith.constant 9.99999974E-6 : f32
    %11 = vector.broadcast %cst_9 : f32 to vector<2x128xf32>
    %12 = arith.addf %10, %11 : vector<2x128xf32>
    %13 = math.rsqrt %12 : vector<2x128xf32>
    %14 = vector.shape_cast %13 : vector<2x128xf32> to vector<2x1x128xf32>
    %15 = vector.broadcast %14 : vector<2x1x128xf32> to vector<2x16x128xf32>
    %16 = arith.mulf %6, %15 : vector<2x16x128xf32>
    %c0_10 = arith.constant 0 : index
    %c0_11 = arith.constant 0 : index
    %17 = vector.load %arg4[%c0_10, %c0_11] : memref<1x128xf32, #tpu.memory_space<vmem>>, vector<1x128xf32>
    %18 = vector.shape_cast %17 : vector<1x128xf32> to vector<1x1x128xf32>
    %19 = vector.broadcast %18 : vector<1x1x128xf32> to vector<2x16x128xf32>
    %20 = arith.mulf %16, %19 : vector<2x16x128xf32>
    %c0_12 = arith.constant 0 : index
    %c0_13 = arith.constant 0 : index
    %21 = vector.load %arg5[%c0_12, %c0_13] : memref<1x128xf32, #tpu.memory_space<vmem>>, vector<1x128xf32>
    %22 = vector.shape_cast %21 : vector<1x128xf32> to vector<1x1x128xf32>
    %23 = vector.broadcast %22 : vector<1x1x128xf32> to vector<2x16x128xf32>
    %24 = arith.addf %20, %23 : vector<2x16x128xf32>
    %cst_14 = arith.constant 0.000000e+00 : f32
    %25 = vector.broadcast %cst_14 : f32 to vector<2x16x128xf32>
    %26 = arith.subf %25, %24 : vector<2x16x128xf32>
    %27 = math.exp %26 : vector<2x16x128xf32>
    %cst_15 = arith.constant 1.000000e+00 : f32
    %28 = vector.broadcast %cst_15 : f32 to vector<2x16x128xf32>
    %29 = arith.addf %28, %27 : vector<2x16x128xf32>
    %cst_16 = arith.constant 1.000000e+00 : f32
    %30 = vector.broadcast %cst_16 : f32 to vector<2x16x128xf32>
    %31 = arith.divf %30, %29 : vector<2x16x128xf32>
    %32 = arith.mulf %24, %31 : vector<2x16x128xf32>
    %cst_17 = arith.constant 0.000000e+00 : f32
    %33 = vector.broadcast %cst_17 : f32 to vector<2x1x128xf32>
    %34 = vector.extract_strided_slice %32 {offsets = [0, 0, 0], sizes = [2, 15, 128], strides = [1, 1, 1]} : vector<2x16x128xf32> to vector<2x15x128xf32>
    %35 = tpu.concatenate %33, %34 in 1 : vector<2x1x128xf32>, vector<2x15x128xf32> -> vector<2x16x128xf32>
    %36 = vector.extract_strided_slice %32 {offsets = [0, 1, 0], sizes = [2, 15, 128], strides = [1, 1, 1]} : vector<2x16x128xf32> to vector<2x15x128xf32>
    %37 = tpu.concatenate %36, %33 in 1 : vector<2x15x128xf32>, vector<2x1x128xf32> -> vector<2x16x128xf32>
    %38 = vector.shape_cast %35 : vector<2x16x128xf32> to vector<32x128xf32>
    %c0_18 = arith.constant 0 : index
    %c0_19 = arith.constant 0 : index
    %c0_20 = arith.constant 0 : index
    %39 = vector.load %arg7[%c0_18, %c0_19, %c0_20] : memref<3x128x256xf32, #tpu.memory_space<vmem>>, vector<1x128x256xf32>
    %40 = vector.shape_cast %39 : vector<1x128x256xf32> to vector<128x256xf32>
    %cst_21 = arith.constant dense<0.000000e+00> : vector<32x256xf32>
    %41 = tpu.matmul %38, %40, %cst_21 {dimension_numbers = #tpu.dot_dimension_numbers<[1], [0], [0], [1], [0, 0, 1, 1], [], []>} : vector<32x128xf32>, vector<128x256xf32>, vector<32x256xf32> -> vector<32x256xf32>
    %42 = vector.shape_cast %32 : vector<2x16x128xf32> to vector<32x128xf32>
    %c1 = arith.constant 1 : index
    %c0_22 = arith.constant 0 : index
    %c0_23 = arith.constant 0 : index
    %43 = vector.load %arg7[%c1, %c0_22, %c0_23] : memref<3x128x256xf32, #tpu.memory_space<vmem>>, vector<1x128x256xf32>
    %44 = vector.shape_cast %43 : vector<1x128x256xf32> to vector<128x256xf32>
    %cst_24 = arith.constant dense<0.000000e+00> : vector<32x256xf32>
    %45 = tpu.matmul %42, %44, %cst_24 {dimension_numbers = #tpu.dot_dimension_numbers<[1], [0], [0], [1], [0, 0, 1, 1], [], []>} : vector<32x128xf32>, vector<128x256xf32>, vector<32x256xf32> -> vector<32x256xf32>
    %46 = arith.addf %41, %45 : vector<32x256xf32>
    %47 = vector.shape_cast %37 : vector<2x16x128xf32> to vector<32x128xf32>
    %c2 = arith.constant 2 : index
    %c0_25 = arith.constant 0 : index
    %c0_26 = arith.constant 0 : index
    %48 = vector.load %arg7[%c2, %c0_25, %c0_26] : memref<3x128x256xf32, #tpu.memory_space<vmem>>, vector<1x128x256xf32>
    %49 = vector.shape_cast %48 : vector<1x128x256xf32> to vector<128x256xf32>
    %cst_27 = arith.constant dense<0.000000e+00> : vector<32x256xf32>
    %50 = tpu.matmul %47, %49, %cst_27 {dimension_numbers = #tpu.dot_dimension_numbers<[1], [0], [0], [1], [0, 0, 1, 1], [], []>} : vector<32x128xf32>, vector<128x256xf32>, vector<32x256xf32> -> vector<32x256xf32>
    %51 = arith.addf %46, %50 : vector<32x256xf32>
    %c0_28 = arith.constant 0 : index
    %c0_29 = arith.constant 0 : index
    %52 = vector.load %arg8[%c0_28, %c0_29] : memref<1x256xf32, #tpu.memory_space<vmem>>, vector<1x256xf32>
    %53 = vector.broadcast %52 : vector<1x256xf32> to vector<32x256xf32>
    %54 = arith.addf %51, %53 : vector<32x256xf32>
    %55 = vector.shape_cast %54 : vector<32x256xf32> to vector<2x16x256xf32>
    %cst_30 = arith.constant dense<0.000000e+00> : vector<2x256xf32>
    %56 = vector.multi_reduction <add>, %55, %cst_30 [1] : vector<2x16x256xf32> to vector<2x256xf32>
    %c0_31 = arith.constant 0 : index
    %c0_32 = arith.constant 0 : index
    %57 = vector.load %arg11[%c0_31, %c0_32] : memref<256x256xf32, #tpu.memory_space<vmem>>, vector<256x256xf32>
    %cst_33 = arith.constant dense<0.000000e+00> : vector<2x256xf32>
    %58 = tpu.matmul %56, %57, %cst_33 {dimension_numbers = #tpu.dot_dimension_numbers<[1], [0], [0], [1], [0, 0, 1, 1], [], []>} : vector<2x256xf32>, vector<256x256xf32>, vector<2x256xf32> -> vector<2x256xf32>
    %59 = vector.shape_cast %58 : vector<2x256xf32> to vector<2x1x256xf32>
    %60 = vector.broadcast %59 : vector<2x1x256xf32> to vector<2x16x256xf32>
    %61 = arith.subf %55, %60 : vector<2x16x256xf32>
    %62 = arith.mulf %61, %61 : vector<2x16x256xf32>
    %cst_34 = arith.constant dense<0.000000e+00> : vector<2x256xf32>
    %63 = vector.multi_reduction <add>, %62, %cst_34 [1] : vector<2x16x256xf32> to vector<2x256xf32>
    %c0_35 = arith.constant 0 : index
    %c0_36 = arith.constant 0 : index
    %64 = vector.load %arg11[%c0_35, %c0_36] : memref<256x256xf32, #tpu.memory_space<vmem>>, vector<256x256xf32>
    %cst_37 = arith.constant dense<0.000000e+00> : vector<2x256xf32>
    %65 = tpu.matmul %63, %64, %cst_37 {dimension_numbers = #tpu.dot_dimension_numbers<[1], [0], [0], [1], [0, 0, 1, 1], [], []>} : vector<2x256xf32>, vector<256x256xf32>, vector<2x256xf32> -> vector<2x256xf32>
    %cst_38 = arith.constant 9.99999974E-6 : f32
    %66 = vector.broadcast %cst_38 : f32 to vector<2x256xf32>
    %67 = arith.addf %65, %66 : vector<2x256xf32>
    %68 = math.rsqrt %67 : vector<2x256xf32>
    %69 = vector.shape_cast %68 : vector<2x256xf32> to vector<2x1x256xf32>
    %70 = vector.broadcast %69 : vector<2x1x256xf32> to vector<2x16x256xf32>
    %71 = arith.mulf %61, %70 : vector<2x16x256xf32>
    %c0_39 = arith.constant 0 : index
    %c0_40 = arith.constant 0 : index
    %72 = vector.load %arg9[%c0_39, %c0_40] : memref<1x256xf32, #tpu.memory_space<vmem>>, vector<1x256xf32>
    %73 = vector.shape_cast %72 : vector<1x256xf32> to vector<1x1x256xf32>
    %74 = vector.broadcast %73 : vector<1x1x256xf32> to vector<2x16x256xf32>
    %75 = arith.mulf %71, %74 : vector<2x16x256xf32>
    %c0_41 = arith.constant 0 : index
    %c0_42 = arith.constant 0 : index
    %76 = vector.load %arg10[%c0_41, %c0_42] : memref<1x256xf32, #tpu.memory_space<vmem>>, vector<1x256xf32>
    %77 = vector.shape_cast %76 : vector<1x256xf32> to vector<1x1x256xf32>
    %78 = vector.broadcast %77 : vector<1x1x256xf32> to vector<2x16x256xf32>
    %79 = arith.addf %75, %78 : vector<2x16x256xf32>
    %c0_43 = arith.constant 0 : index
    %c0_44 = arith.constant 0 : index
    %c0_45 = arith.constant 0 : index
    %80 = vector.load %arg2[%c0_43, %c0_44, %c0_45] : memref<2x1x256xf32, #tpu.memory_space<vmem>>, vector<2x1x256xf32>
    %cst_46 = arith.constant 1.000000e+00 : f32
    %81 = vector.broadcast %cst_46 : f32 to vector<2x1x256xf32>
    %82 = arith.addf %81, %80 : vector<2x1x256xf32>
    %83 = vector.broadcast %82 : vector<2x1x256xf32> to vector<2x16x256xf32>
    %84 = arith.mulf %79, %83 : vector<2x16x256xf32>
    %c0_47 = arith.constant 0 : index
    %c0_48 = arith.constant 0 : index
    %c0_49 = arith.constant 0 : index
    %85 = vector.load %arg3[%c0_47, %c0_48, %c0_49] : memref<2x1x256xf32, #tpu.memory_space<vmem>>, vector<2x1x256xf32>
    %86 = vector.broadcast %85 : vector<2x1x256xf32> to vector<2x16x256xf32>
    %87 = arith.addf %84, %86 : vector<2x16x256xf32>
    %cst_50 = arith.constant 0.000000e+00 : f32
    %88 = vector.broadcast %cst_50 : f32 to vector<2x16x256xf32>
    %89 = arith.subf %88, %87 : vector<2x16x256xf32>
    %90 = math.exp %89 : vector<2x16x256xf32>
    %cst_51 = arith.constant 1.000000e+00 : f32
    %91 = vector.broadcast %cst_51 : f32 to vector<2x16x256xf32>
    %92 = arith.addf %91, %90 : vector<2x16x256xf32>
    %cst_52 = arith.constant 1.000000e+00 : f32
    %93 = vector.broadcast %cst_52 : f32 to vector<2x16x256xf32>
    %94 = arith.divf %93, %92 : vector<2x16x256xf32>
    %95 = arith.mulf %87, %94 : vector<2x16x256xf32>
    %cst_53 = arith.constant 0.000000e+00 : f32
    %96 = vector.broadcast %cst_53 : f32 to vector<2x1x256xf32>
    %97 = vector.extract_strided_slice %95 {offsets = [0, 0, 0], sizes = [2, 15, 256], strides = [1, 1, 1]} : vector<2x16x256xf32> to vector<2x15x256xf32>
    %98 = tpu.concatenate %96, %97 in 1 : vector<2x1x256xf32>, vector<2x15x256xf32> -> vector<2x16x256xf32>
    %99 = vector.extract_strided_slice %95 {offsets = [0, 1, 0], sizes = [2, 15, 256], strides = [1, 1, 1]} : vector<2x16x256xf32> to vector<2x15x256xf32>
    %100 = tpu.concatenate %99, %96 in 1 : vector<2x15x256xf32>, vector<2x1x256xf32> -> vector<2x16x256xf32>
    %101 = vector.shape_cast %98 : vector<2x16x256xf32> to vector<32x256xf32>
    %c0_54 = arith.constant 0 : index
    %c0_55 = arith.constant 0 : index
    %c0_56 = arith.constant 0 : index
    %102 = vector.load %arg12[%c0_54, %c0_55, %c0_56] : memref<3x256x256xf32, #tpu.memory_space<vmem>>, vector<1x256x256xf32>
    %103 = vector.shape_cast %102 : vector<1x256x256xf32> to vector<256x256xf32>
    %cst_57 = arith.constant dense<0.000000e+00> : vector<32x256xf32>
    %104 = tpu.matmul %101, %103, %cst_57 {dimension_numbers = #tpu.dot_dimension_numbers<[1], [0], [0], [1], [0, 0, 1, 1], [], []>} : vector<32x256xf32>, vector<256x256xf32>, vector<32x256xf32> -> vector<32x256xf32>
    %105 = vector.shape_cast %95 : vector<2x16x256xf32> to vector<32x256xf32>
    %c1_58 = arith.constant 1 : index
    %c0_59 = arith.constant 0 : index
    %c0_60 = arith.constant 0 : index
    %106 = vector.load %arg12[%c1_58, %c0_59, %c0_60] : memref<3x256x256xf32, #tpu.memory_space<vmem>>, vector<1x256x256xf32>
    %107 = vector.shape_cast %106 : vector<1x256x256xf32> to vector<256x256xf32>
    %cst_61 = arith.constant dense<0.000000e+00> : vector<32x256xf32>
    %108 = tpu.matmul %105, %107, %cst_61 {dimension_numbers = #tpu.dot_dimension_numbers<[1], [0], [0], [1], [0, 0, 1, 1], [], []>} : vector<32x256xf32>, vector<256x256xf32>, vector<32x256xf32> -> vector<32x256xf32>
    %109 = arith.addf %104, %108 : vector<32x256xf32>
    %110 = vector.shape_cast %100 : vector<2x16x256xf32> to vector<32x256xf32>
    %c2_62 = arith.constant 2 : index
    %c0_63 = arith.constant 0 : index
    %c0_64 = arith.constant 0 : index
    %111 = vector.load %arg12[%c2_62, %c0_63, %c0_64] : memref<3x256x256xf32, #tpu.memory_space<vmem>>, vector<1x256x256xf32>
    %112 = vector.shape_cast %111 : vector<1x256x256xf32> to vector<256x256xf32>
    %cst_65 = arith.constant dense<0.000000e+00> : vector<32x256xf32>
    %113 = tpu.matmul %110, %112, %cst_65 {dimension_numbers = #tpu.dot_dimension_numbers<[1], [0], [0], [1], [0, 0, 1, 1], [], []>} : vector<32x256xf32>, vector<256x256xf32>, vector<32x256xf32> -> vector<32x256xf32>
    %114 = arith.addf %109, %113 : vector<32x256xf32>
    %c0_66 = arith.constant 0 : index
    %c0_67 = arith.constant 0 : index
    %115 = vector.load %arg13[%c0_66, %c0_67] : memref<1x256xf32, #tpu.memory_space<vmem>>, vector<1x256xf32>
    %116 = vector.broadcast %115 : vector<1x256xf32> to vector<32x256xf32>
    %117 = arith.addf %114, %116 : vector<32x256xf32>
    %118 = vector.shape_cast %117 : vector<32x256xf32> to vector<2x16x256xf32>
    %119 = vector.shape_cast %118 : vector<2x16x256xf32> to vector<32x256xf32>
    %c0_68 = arith.constant 0 : index
    %c0_69 = arith.constant 0 : index
    %120 = vector.load %arg14[%c0_68, %c0_69] : memref<256x16xf32, #tpu.memory_space<vmem>>, vector<256x16xf32>
    %cst_70 = arith.constant dense<0.000000e+00> : vector<32x16xf32>
    %121 = tpu.matmul %119, %120, %cst_70 {dimension_numbers = #tpu.dot_dimension_numbers<[1], [0], [0], [1], [0, 0, 1, 1], [], []>} : vector<32x256xf32>, vector<256x16xf32>, vector<32x16xf32> -> vector<32x16xf32>
    %122 = vector.shape_cast %121 : vector<32x16xf32> to vector<2x16x16xf32>
    %cst_71 = arith.constant dense<0xFF800000> : vector<2x16xf32>
    %123 = vector.multi_reduction <maximumf>, %122, %cst_71 [2] : vector<2x16x16xf32> to vector<2x16xf32>
    %124 = vector.shape_cast %123 : vector<2x16xf32> to vector<2x16x1xf32>
    %cst_72 = arith.constant dense<0xFF800000> : vector<2x1xf32>
    %125 = vector.multi_reduction <maximumf>, %124, %cst_72 [1] : vector<2x16x1xf32> to vector<2x1xf32>
    %126 = vector.shape_cast %125 : vector<2x1xf32> to vector<2x1x1xf32>
    %127 = vector.broadcast %126 : vector<2x1x1xf32> to vector<2x16x16xf32>
    %128 = arith.subf %122, %127 : vector<2x16x16xf32>
    %129 = math.exp %128 : vector<2x16x16xf32>
    %cst_73 = arith.constant dense<0.000000e+00> : vector<2x16xf32>
    %130 = vector.multi_reduction <add>, %129, %cst_73 [2] : vector<2x16x16xf32> to vector<2x16xf32>
    %131 = vector.shape_cast %130 : vector<2x16xf32> to vector<2x16x1xf32>
    %cst_74 = arith.constant dense<0.000000e+00> : vector<2x1xf32>
    %132 = vector.multi_reduction <add>, %131, %cst_74 [1] : vector<2x16x1xf32> to vector<2x1xf32>
    %133 = vector.shape_cast %132 : vector<2x1xf32> to vector<2x1x1xf32>
    %cst_75 = arith.constant 1.000000e+00 : f32
    %134 = vector.broadcast %cst_75 : f32 to vector<2x1x1xf32>
    %135 = arith.divf %134, %133 : vector<2x1x1xf32>
    %136 = vector.broadcast %135 : vector<2x1x1xf32> to vector<2x16x16xf32>
    %137 = arith.mulf %129, %136 : vector<2x16x16xf32>
    %138 = vector.shape_cast %137 : vector<2x16x16xf32> to vector<32x16xf32>
    %c0_76 = arith.constant 0 : index
    %c0_77 = arith.constant 0 : index
    %139 = vector.load %arg15[%c0_76, %c0_77] : memref<16x256xf32, #tpu.memory_space<vmem>>, vector<16x256xf32>
    %cst_78 = arith.constant dense<0.000000e+00> : vector<32x256xf32>
    %140 = tpu.matmul %138, %139, %cst_78 {dimension_numbers = #tpu.dot_dimension_numbers<[1], [0], [0], [1], [0, 0, 1, 1], [], []>} : vector<32x16xf32>, vector<16x256xf32>, vector<32x256xf32> -> vector<32x256xf32>
    %141 = vector.shape_cast %140 : vector<32x256xf32> to vector<2x16x256xf32>
    %142 = arith.mulf %141, %118 : vector<2x16x256xf32>
    %cst_79 = arith.constant dense<0.000000e+00> : vector<2x256xf32>
    %143 = vector.multi_reduction <add>, %142, %cst_79 [1] : vector<2x16x256xf32> to vector<2x256xf32>
    %c0_80 = arith.constant 0 : index
    %c0_81 = arith.constant 0 : index
    %144 = vector.load %arg16[%c0_80, %c0_81] : memref<256x8xf32, #tpu.memory_space<vmem>>, vector<256x8xf32>
    %cst_82 = arith.constant dense<0.000000e+00> : vector<2x8xf32>
    %145 = tpu.matmul %143, %144, %cst_82 {dimension_numbers = #tpu.dot_dimension_numbers<[1], [0], [0], [1], [0, 0, 1, 1], [], []>} : vector<2x256xf32>, vector<256x8xf32>, vector<2x8xf32> -> vector<2x8xf32>
    %c0_83 = arith.constant 0 : index
    %c0_84 = arith.constant 0 : index
    %146 = vector.load %arg17[%c0_83, %c0_84] : memref<1x8xf32, #tpu.memory_space<vmem>>, vector<1x8xf32>
    %147 = vector.broadcast %146 : vector<1x8xf32> to vector<2x8xf32>
    %148 = arith.addf %145, %147 : vector<2x8xf32>
    %cst_85 = arith.constant 0.000000e+00 : f32
    %149 = vector.broadcast %cst_85 : f32 to vector<2x8xf32>
    %150 = arith.subf %149, %148 : vector<2x8xf32>
    %151 = math.exp %150 : vector<2x8xf32>
    %cst_86 = arith.constant 1.000000e+00 : f32
    %152 = vector.broadcast %cst_86 : f32 to vector<2x8xf32>
    %153 = arith.addf %152, %151 : vector<2x8xf32>
    %cst_87 = arith.constant 1.000000e+00 : f32
    %154 = vector.broadcast %cst_87 : f32 to vector<2x8xf32>
    %155 = arith.divf %154, %153 : vector<2x8xf32>
    %156 = arith.mulf %148, %155 : vector<2x8xf32>
    %c0_88 = arith.constant 0 : index
    %c0_89 = arith.constant 0 : index
    %157 = vector.load %arg18[%c0_88, %c0_89] : memref<8x256xf32, #tpu.memory_space<vmem>>, vector<8x256xf32>
    %cst_90 = arith.constant dense<0.000000e+00> : vector<2x256xf32>
    %158 = tpu.matmul %156, %157, %cst_90 {dimension_numbers = #tpu.dot_dimension_numbers<[1], [0], [0], [1], [0, 0, 1, 1], [], []>} : vector<2x8xf32>, vector<8x256xf32>, vector<2x256xf32> -> vector<2x256xf32>
    %c0_91 = arith.constant 0 : index
    %c0_92 = arith.constant 0 : index
    %159 = vector.load %arg19[%c0_91, %c0_92] : memref<1x256xf32, #tpu.memory_space<vmem>>, vector<1x256xf32>
    %160 = vector.broadcast %159 : vector<1x256xf32> to vector<2x256xf32>
    %161 = arith.addf %158, %160 : vector<2x256xf32>
    %cst_93 = arith.constant 0.000000e+00 : f32
    %162 = vector.broadcast %cst_93 : f32 to vector<2x256xf32>
    %163 = arith.subf %162, %161 : vector<2x256xf32>
    %164 = math.exp %163 : vector<2x256xf32>
    %cst_94 = arith.constant 1.000000e+00 : f32
    %165 = vector.broadcast %cst_94 : f32 to vector<2x256xf32>
    %166 = arith.addf %165, %164 : vector<2x256xf32>
    %cst_95 = arith.constant 1.000000e+00 : f32
    %167 = vector.broadcast %cst_95 : f32 to vector<2x256xf32>
    %168 = arith.divf %167, %166 : vector<2x256xf32>
    %169 = vector.shape_cast %0 : vector<2x16x128xf32> to vector<32x128xf32>
    %c0_96 = arith.constant 0 : index
    %c0_97 = arith.constant 0 : index
    %170 = vector.load %arg20[%c0_96, %c0_97] : memref<128x256xf32, #tpu.memory_space<vmem>>, vector<128x256xf32>
    %cst_98 = arith.constant dense<0.000000e+00> : vector<32x256xf32>
    %171 = tpu.matmul %169, %170, %cst_98 {dimension_numbers = #tpu.dot_dimension_numbers<[1], [0], [0], [1], [0, 0, 1, 1], [], []>} : vector<32x128xf32>, vector<128x256xf32>, vector<32x256xf32> -> vector<32x256xf32>
    %c0_99 = arith.constant 0 : index
    %c0_100 = arith.constant 0 : index
    %172 = vector.load %arg21[%c0_99, %c0_100] : memref<1x256xf32, #tpu.memory_space<vmem>>, vector<1x256xf32>
    %173 = vector.broadcast %172 : vector<1x256xf32> to vector<32x256xf32>
    %174 = arith.addf %171, %173 : vector<32x256xf32>
    %175 = vector.shape_cast %168 : vector<2x256xf32> to vector<2x1x256xf32>
    %176 = vector.broadcast %175 : vector<2x1x256xf32> to vector<2x16x256xf32>
    %177 = arith.mulf %118, %176 : vector<2x16x256xf32>
    %178 = vector.shape_cast %174 : vector<32x256xf32> to vector<2x16x256xf32>
    %179 = arith.addf %177, %178 : vector<2x16x256xf32>
    %c0_101 = arith.constant 0 : index
    %c0_102 = arith.constant 0 : index
    %c0_103 = arith.constant 0 : index
    %180 = vector.load %arg22[%c0_101, %c0_102, %c0_103] : memref<2x16x256xf32, #tpu.memory_space<vmem>>, vector<2x16x256xf32>
    tpu.vector_store %arg22[%c0_101, %c0_102, %c0_103], %179 {strides = array<i32>} : memref<2x16x256xf32, #tpu.memory_space<vmem>>, vector<2x16x256xf32>,
    return
  }
  func.func @transform_0(%arg0: i32) -> (i32, i32, i32) {
    %c0_i32 = arith.constant 0 : i32
    %c0_i32_0 = arith.constant 0 : i32
    %c0_i32_1 = arith.constant 0 : i32
    return %arg0, %c0_i32, %c0_i32_0 : i32, i32, i32
  }
  func.func @transform_1(%arg0: i32) -> (i32, i32, i32) {
    %c0_i32 = arith.constant 0 : i32
    %c0_i32_0 = arith.constant 0 : i32
    %c0_i32_1 = arith.constant 0 : i32
    return %arg0, %c0_i32, %c0_i32_0 : i32, i32, i32
  }
  func.func @transform_2(%arg0: i32) -> (i32, i32, i32) {
    %c0_i32 = arith.constant 0 : i32
    %c0_i32_0 = arith.constant 0 : i32
    %c0_i32_1 = arith.constant 0 : i32
    return %arg0, %c0_i32, %c0_i32_0 : i32, i32, i32
  }
  func.func @transform_3(%arg0: i32) -> (i32, i32) {
    %c0_i32 = arith.constant 0 : i32
    %c0_i32_0 = arith.constant 0 : i32
    %c0_i32_1 = arith.constant 0 : i32
    return %c0_i32, %c0_i32_0 : i32, i32
  }
  func.func @transform_4(%arg0: i32) -> (i32, i32) {
    %c0_i32 = arith.constant 0 : i32
    %c0_i32_0 = arith.constant 0 : i32
    %c0_i32_1 = arith.constant 0 : i32
    return %c0_i32, %c0_i32_0 : i32, i32
  }
  func.func @transform_5(%arg0: i32) -> (i32, i32) {
    %c0_i32 = arith.constant 0 : i32
    %c0_i32_0 = arith.constant 0 : i32
    %c0_i32_1 = arith.constant 0 : i32
    return %c0_i32, %c0_i32_0 : i32, i32
  }
  func.func @transform_6(%arg0: i32) -> (i32, i32, i32) {
    %c0_i32 = arith.constant 0 : i32
    %c0_i32_0 = arith.constant 0 : i32
    %c0_i32_1 = arith.constant 0 : i32
    %c0_i32_2 = arith.constant 0 : i32
    return %c0_i32, %c0_i32_0, %c0_i32_1 : i32, i32, i32
  }
  func.func @transform_7(%arg0: i32) -> (i32, i32) {
    %c0_i32 = arith.constant 0 : i32
    %c0_i32_0 = arith.constant 0 : i32
    %c0_i32_1 = arith.constant 0 : i32
    return %c0_i32, %c0_i32_0 : i32, i32
  }
  func.func @transform_8(%arg0: i32) -> (i32, i32) {
    %c0_i32 = arith.constant 0 : i32
    %c0_i32_0 = arith.constant 0 : i32
    %c0_i32_1 = arith.constant 0 : i32
    return %c0_i32, %c0_i32_0 : i32, i32
  }
  func.func @transform_9(%arg0: i32) -> (i32, i32) {
    %c0_i32 = arith.constant 0 : i32
    %c0_i32_0 = arith.constant 0 : i32
    %c0_i32_1 = arith.constant 0 : i32
    return %c0_i32, %c0_i32_0 : i32, i32
  }
  func.func @transform_10(%arg0: i32) -> (i32, i32) {
    %c0_i32 = arith.constant 0 : i32
    %c0_i32_0 = arith.constant 0 : i32
    %c0_i32_1 = arith.constant 0 : i32
    return %c0_i32, %c0_i32_0 : i32, i32
  }
  func.func @transform_11(%arg0: i32) -> (i32, i32, i32) {
    %c0_i32 = arith.constant 0 : i32
    %c0_i32_0 = arith.constant 0 : i32
    %c0_i32_1 = arith.constant 0 : i32
    %c0_i32_2 = arith.constant 0 : i32
    return %c0_i32, %c0_i32_0, %c0_i32_1 : i32, i32, i32
  }
  func.func @transform_12(%arg0: i32) -> (i32, i32) {
    %c0_i32 = arith.constant 0 : i32
    %c0_i32_0 = arith.constant 0 : i32
    %c0_i32_1 = arith.constant 0 : i32
    return %c0_i32, %c0_i32_0 : i32, i32
  }
  func.func @transform_13(%arg0: i32) -> (i32, i32) {
    %c0_i32 = arith.constant 0 : i32
    %c0_i32_0 = arith.constant 0 : i32
    %c0_i32_1 = arith.constant 0 : i32
    return %c0_i32, %c0_i32_0 : i32, i32
  }
  func.func @transform_14(%arg0: i32) -> (i32, i32) {
    %c0_i32 = arith.constant 0 : i32
    %c0_i32_0 = arith.constant 0 : i32
    %c0_i32_1 = arith.constant 0 : i32
    return %c0_i32, %c0_i32_0 : i32, i32
  }
  func.func @transform_15(%arg0: i32) -> (i32, i32) {
    %c0_i32 = arith.constant 0 : i32
    %c0_i32_0 = arith.constant 0 : i32
    %c0_i32_1 = arith.constant 0 : i32
    return %c0_i32, %c0_i32_0 : i32, i32
  }
  func.func @transform_16(%arg0: i32) -> (i32, i32) {
    %c0_i32 = arith.constant 0 : i32
    %c0_i32_0 = arith.constant 0 : i32
    %c0_i32_1 = arith.constant 0 : i32
    return %c0_i32, %c0_i32_0 : i32, i32
  }
  func.func @transform_17(%arg0: i32) -> (i32, i32) {
    %c0_i32 = arith.constant 0 : i32
    %c0_i32_0 = arith.constant 0 : i32
    %c0_i32_1 = arith.constant 0 : i32
    return %c0_i32, %c0_i32_0 : i32, i32
  }
  func.func @transform_18(%arg0: i32) -> (i32, i32) {
    %c0_i32 = arith.constant 0 : i32
    %c0_i32_0 = arith.constant 0 : i32
    %c0_i32_1 = arith.constant 0 : i32
    return %c0_i32, %c0_i32_0 : i32, i32
  }
  func.func @transform_19(%arg0: i32) -> (i32, i32) {
    %c0_i32 = arith.constant 0 : i32
    %c0_i32_0 = arith.constant 0 : i32
    %c0_i32_1 = arith.constant 0 : i32
    return %c0_i32, %c0_i32_0 : i32, i32
  }
  func.func @transform_20(%arg0: i32) -> (i32, i32) {
    %c0_i32 = arith.constant 0 : i32
    %c0_i32_0 = arith.constant 0 : i32
    %c0_i32_1 = arith.constant 0 : i32
    return %c0_i32, %c0_i32_0 : i32, i32
  }
  func.func @transform_21(%arg0: i32) -> (i32, i32, i32) {
    %c0_i32 = arith.constant 0 : i32
    %c0_i32_0 = arith.constant 0 : i32
    %c0_i32_1 = arith.constant 0 : i32
    return %arg0, %c0_i32, %c0_i32_0 : i32, i32, i32
  }
}

</mosaic_0001>

<bundles_post_ra>
// kernel: tpu_custom_call.1
= control target key start
LH: loop header
LB: loop body
LE: loop exit
PB: predicated region body
PF: predicated region fallthrough
CT: control target
= control target key end

     0   :  { %s4412_s0 = inlined_call_operand.vmem [shape: f32[2,16,128], index: 0, kind: input, shape index: {}]   ;;  %s4413_s1 = inlined_call_operand.hbm [shape: f32[2,1,256], index: 1, kind: input, shape index: {}]   ;;  %s4414_s2 = inlined_call_operand.hbm [shape: f32[2,1,256], index: 2, kind: input, shape index: {}]   ;;  %s4415_s3 = inlined_call_operand.hbm [shape: f32[1,128], index: 3, kind: input, shape index: {}]   ;;  %s4416_s4 = inlined_call_operand.hbm [shape: f32[1,128], index: 4, kind: input, shape index: {}]   ;;  %s4417_s5 = inlined_call_operand.hbm [shape: f32[128,128], index: 5, kind: input, shape index: {}]   ;;  %s4418_s6 = inlined_call_operand.hbm [shape: f32[3,128,256], index: 6, kind: input, shape index: {}]   ;;  %s4419_s7 = inlined_call_operand.vmem [shape: f32[1,256], index: 7, kind: input, shape index: {}]   ;;  %s4420_s8 = inlined_call_operand.hbm [shape: f32[1,256], index: 8, kind: input, shape index: {}]   ;;  %s4421_s9 = inlined_call_operand.hbm [shape: f32[1,256], index: 9, kind: input, shape index: {}]   ;;  %s4422_s10 = inlined_call_operand.vmem [shape: f32[256,256], index: 10, kind: input, shape index: {}]   ;;  %s4423_s11 = inlined_call_operand.hbm [shape: f32[3,256,256], index: 11, kind: input, shape index: {}]   ;;  %s4424_s12 = inlined_call_operand.vmem [shape: f32[1,256], index: 12, kind: input, shape index: {}]   ;;  %s4425_s13 = inlined_call_operand.vmem [shape: f32[256,16], index: 13, kind: input, shape index: {}]   ;;  %s4426_s14 = inlined_call_operand.vmem [shape: f32[16,256], index: 14, kind: input, shape index: {}]   ;;  %s4427_s15 = inlined_call_operand.vmem [shape: f32[256,8], index: 15, kind: input, shape index: {}]   ;;  %s4428_s16 = inlined_call_operand.vmem [shape: f32[1,8], index: 16, kind: input, shape index: {}]   ;;  %s4429_s17 = inlined_call_operand.hbm [shape: f32[8,256], index: 17, kind: input, shape index: {}]   ;;  %s4430_s18 = inlined_call_operand.vmem [shape: f32[1,256], index: 18, kind: input, shape index: {}]   ;;  %s4431_s19 = inlined_call_operand.hbm [shape: f32[128,256], index: 19, kind: input, shape index: {}]   ;;  %s4432_s20 = inlined_call_operand.vmem [shape: f32[1,256], index: 20, kind: input, shape index: {}]   ;;  %s4433_s21 = inlined_call_operand.hbm [shape: f32[2,16,256], index: 21, kind: output, shape index: {}]  }
   0x1   :  { %4435 = sst [smem:[#allocation28_spill]] %s4412_s0 }
   0x2   :  { %4436 = sst [smem:[#allocation29_spill]] %s4413_s1 }
   0x3   :  { %4437 = sst [smem:[#allocation30_spill]] %s4414_s2 }
   0x4   :  { %4438 = sst [smem:[#allocation31_spill]] %s4415_s3 }
   0x5   :  { %4439 = sst [smem:[#allocation32_spill]] %s4416_s4 }
   0x6   :  { %4440 = sst [smem:[#allocation33_spill]] %s4417_s5 }
   0x7   :  { %26 = vsyncpa [#allocation3], 0 }
   0x8   :  { %27 = vsyncpa [#allocation6], 0 }
   0x9   :  { %28 = vsyncpa [#allocation9], 0 }
   0xa   :  { %29 = vsyncpa [#allocation12], 0 }
   0xb   :  { %30 = vsyncpa [#allocation15], 0 }
   0xc   :  { %31 = vsyncpa [#allocation18], 0 }
   0xd   :  { %32 = vsyncpa [#allocation4], 0  ;;  %s3404_s2 = smov [#allocation5]   ;;  %s3405_s26 = smov [#allocation8]  }
   0xe   :  { %s52_s25 = sshll.u32 %s3404_s2, 4  ;;  %s75_s27 = sshll.u32 %s3405_s26, 4  ;;  %s53_s25 = int_to_ptr.vmem [resolvable:$true] %s52_s25  ;;  %s76_s27 = int_to_ptr.vmem [resolvable:$true] %s75_s27 }
   0xf   :  { %s3158_s3 = scalar_lea.vmem %s53_s25, 64  ;;  %p3163_p1 = scmp.lt.s32.totalorder %s53_s25, %s53_s25 }
  0x10   :  { %p3159_p0 = scmp.ne.s32.totalorder %s53_s25, %s3158_s3  ;;  %p3164_p2 = scmp.lt.s32.totalorder %s3158_s3, %s3158_s3 }
  0x12   :  { %p3165_p3 = por %p3164_p2, %p3163_p1 }
  0x14   :  { %p3166_p4 = pnand %p3165_p3, %p3159_p0 }
  0x16   :  { %3169 = shalt.err (!%p3166_p4)
}
  0x17   :  { %s3406_s28 = smov 32   ;;  %s3407_s29 = smov 2  }
  0x18   :  { %s4441_s30 = sld [smem:[#allocation30_spill]]  ;;  %s3178_s5 = scalar_lea.vmem %s76_s27, 16 }
  0x19   :  { %p3179_p5 = scmp.ne.s32.totalorder %s76_s27, %s3178_s5  ;;  %s3182_s22 = scalar_lea.vmem %s76_s27, 32 }
  0x1a   :  { %p3183_p6 = scmp.lt.s32.totalorder %s76_s27, %s76_s27  ;;  %p3184_p7 = scmp.lt.s32.totalorder %s3182_s22, %s3178_s5 }
  0x1c   :  { %p3185_p8 = por %p3184_p7, %p3183_p6 }
  0x1e   :  { %58 = dma.hbm_to_vmem [thread:$0]  %s4441_s30, 64, %s53_s25, [#allocation6], %s3406_s28, %s3406_s28, %s3407_s29  }
  0x1f   :  { %p3186_p9 = pnand %p3185_p8, %p3179_p5 }
  0x21   :  { %3189 = shalt.err (!%p3186_p9)
}
  0x22   :  { %s4442_s24 = sld [smem:[#allocation32_spill]]  ;;  %s3408_s2 = smov [#allocation11]  }
  0x23   :  { %s96_s26 = sshll.u32 %s3408_s2, 4  ;;  %s97_s26 = int_to_ptr.vmem [resolvable:$true] %s96_s26 }
  0x24   :  { %s3198_s3 = scalar_lea.vmem %s97_s26, 12288  ;;  %p3203_p11 = scmp.lt.s32.totalorder %s97_s26, %s97_s26 }
  0x25   :  { %p3199_p10 = scmp.ne.s32.totalorder %s97_s26, %s3198_s3  ;;  %p3204_p12 = scmp.lt.s32.totalorder %s3198_s3, %s3198_s3 }
  0x27   :  { %p3205_p13 = por %p3204_p12, %p3203_p11 }
  0x28   :  { %78 = dma.hbm_to_vmem [thread:$0]  %s4442_s24, 16, %s76_s27, [#allocation9]  }
  0x29   :  { %p3206_p0 = pnand %p3205_p13, %p3199_p10 }
  0x2b   :  { %3209 = shalt.err (!%p3206_p0)
}
  0x2c   :  { %s3409_s25 = smov 256   ;;  %s3410_s0 = smov 16  }
  0x2d   :  { %102 = dma.hbm_to_vmem [thread:$0]  %s4418_s6, 12288, %s97_s26, [#allocation12], %s3409_s25, %s3409_s25, %s3410_s0  }
  0x2e   :  { %s3411_s27 = smov [#allocation14]   ;;  %s3412_s22 = smov [#allocation17]  }
  0x2f   :  { %s121_s5 = sshll.u32 %s3411_s27, 4  ;;  %s155_s23 = sshll.u32 %s3412_s22, 4  ;;  %s122_s5 = int_to_ptr.vmem [resolvable:$true] %s121_s5  ;;  %s156_s23 = int_to_ptr.vmem [resolvable:$true] %s155_s23 }
  0x30   :  { %s3218_s1 = scalar_lea.vmem %s122_s5, 32  ;;  %p3223_p2 = scmp.lt.s32.totalorder %s122_s5, %s122_s5 }
  0x31   :  { %p3219_p1 = scmp.ne.s32.totalorder %s122_s5, %s3218_s1  ;;  %p3224_p3 = scmp.lt.s32.totalorder %s3218_s1, %s3218_s1 }
  0x33   :  { %p3225_p4 = por %p3224_p3, %p3223_p2 }
  0x35   :  { %p3226_p5 = pnand %p3225_p4, %p3219_p1 }
  0x37   :  { %3229 = shalt.err (!%p3226_p5)
}
  0x38   :  { %124 = dma.hbm_to_vmem [thread:$0]  %s4421_s9, 32, %s122_s5, [#allocation15]  }
  0x39   :  { %s3238_s3 = scalar_lea.vmem %s156_s23, 256  ;;  %p3243_p7 = scmp.lt.s32.totalorder %s156_s23, %s156_s23 }
  0x3a   :  { %p3239_p6 = scmp.ne.s32.totalorder %s156_s23, %s3238_s3  ;;  %p3244_p8 = scmp.lt.s32.totalorder %s3238_s3, %s3238_s3 }
  0x3c   :  { %p3245_p9 = por %p3244_p8, %p3243_p7 }
  0x3e   :  { %p3246_p10 = pnand %p3245_p9, %p3239_p6 }
  0x40   :  { %3249 = shalt.err (!%p3246_p10)
}
  0x41   :  { %158 = dma.hbm_to_vmem [thread:$0]  %s4429_s17, 256, %s156_s23, [#allocation18]  }
  0x42   :  { %s3413_s4 = smov [#allocation2]   ;;  %s3414_s27 = smov [#allocation7]  }
  0x43   :  { %s40_s30 = sshll.u32 %s3413_s4, 4  ;;  %s65_s22 = sshll.u32 %s3414_s27, 4  ;;  %s41_s30 = int_to_ptr.vmem [resolvable:$true] %s40_s30  ;;  %s66_s22 = int_to_ptr.vmem [resolvable:$true] %s65_s22 }
  0x44   :  { %s3258_s1 = scalar_lea.vmem %s41_s30, 64  ;;  %p3263_p12 = scmp.lt.s32.totalorder %s41_s30, %s41_s30 }
  0x45   :  { %p3259_p11 = scmp.ne.s32.totalorder %s41_s30, %s3258_s1  ;;  %p3264_p13 = scmp.lt.s32.totalorder %s3258_s1, %s3258_s1 }
  0x47   :  { %p3265_p0 = por %p3264_p13, %p3263_p12 }
  0x49   :  { %p3266_p1 = pnand %p3265_p0, %p3259_p11 }
  0x4b   :  { %3269 = shalt.err (!%p3266_p1)
}
  0x4c   :  { %s4443_s24 = sld [smem:[#allocation29_spill]]  ;;  %s3278_s17 = scalar_lea.vmem %s66_s22, 16 }
  0x4d   :  { %p3279_p2 = scmp.ne.s32.totalorder %s66_s22, %s3278_s17  ;;  %s3282_s23 = scalar_lea.vmem %s66_s22, 32 }
  0x4e   :  { %p3283_p3 = scmp.lt.s32.totalorder %s66_s22, %s66_s22  ;;  %p3284_p4 = scmp.lt.s32.totalorder %s3282_s23, %s3278_s17 }
  0x50   :  { %p3285_p5 = por %p3284_p4, %p3283_p3 }
  0x52   :  { %46 = dma.hbm_to_vmem [thread:$0]  %s4443_s24, 64, %s41_s30, [#allocation3], %s3406_s28, %s3406_s28, %s3407_s29  }
  0x53   :  { %p3286_p6 = pnand %p3285_p5, %p3279_p2 }
  0x55   :  { %3289 = shalt.err (!%p3286_p6)
}
  0x56   :  { %s4444_s6 = sld [smem:[#allocation31_spill]]  ;;  %s3415_s26 = smov [#allocation10]  }
  0x57   :  { %s84_s4 = sshll.u32 %s3415_s26, 4  ;;  %s85_s4 = int_to_ptr.vmem [resolvable:$true] %s84_s4 }
  0x58   :  { %s3298_s27 = scalar_lea.vmem %s85_s4, 2048  ;;  %p3303_p8 = scmp.lt.s32.totalorder %s85_s4, %s85_s4 }
  0x59   :  { %p3299_p7 = scmp.ne.s32.totalorder %s85_s4, %s3298_s27  ;;  %p3304_p9 = scmp.lt.s32.totalorder %s3298_s27, %s3298_s27 }
  0x5b   :  { %p3305_p10 = por %p3304_p9, %p3303_p8 }
  0x5c   :  { %68 = dma.hbm_to_vmem [thread:$0]  %s4444_s6, 16, %s66_s22, [#allocation6]  }
  0x5d   :  { %p3306_p11 = pnand %p3305_p10, %p3299_p7 }
  0x5f   :  { %3309 = shalt.err (!%p3306_p11)
}
  0x60   :  { %s3416_s28 = smov 128   ;;  %s3417_s29 = smov 8  }
  0x61   :  { %s4445_s9 = sld [smem:[#allocation33_spill]]  ;;  %s3418_s5 = smov [#allocation13]  }
  0x62   :  { %s111_s24 = sshll.u32 %s3418_s5, 4  ;;  %s3419_s17 = smov [#allocation16]   ;;  %s112_s24 = int_to_ptr.vmem [resolvable:$true] %s111_s24 }
  0x63   :  { %s132_s22 = sshll.u32 %s3419_s17, 4  ;;  %s3318_s23 = scalar_lea.vmem %s112_s24, 32  ;;  %s133_s22 = int_to_ptr.vmem [resolvable:$true] %s132_s22 }
  0x64   :  { %p3319_p12 = scmp.ne.s32.totalorder %s112_s24, %s3318_s23  ;;  %p3323_p13 = scmp.lt.s32.totalorder %s112_s24, %s112_s24 }
  0x65   :  { %p3324_p0 = scmp.lt.s32.totalorder %s3318_s23, %s3318_s23 }
  0x67   :  { %90 = dma.hbm_to_vmem [thread:$0]  %s4445_s9, 2048, %s85_s4, [#allocation9], %s3416_s28, %s3416_s28, %s3417_s29  }
  0x68   :  { %p3325_p1 = por %p3324_p0, %p3323_p13 }
  0x6a   :  { %p3326_p2 = pnand %p3325_p1, %p3319_p12 }
  0x6c   :  { %3329 = shalt.err (!%p3326_p2)
}
  0x6d   :  { %114 = dma.hbm_to_vmem [thread:$0]  %s4420_s8, 32, %s112_s24, [#allocation12]  }
  0x6e   :  { %s3338_s6 = scalar_lea.vmem %s133_s22, 24576  ;;  %p3343_p4 = scmp.lt.s32.totalorder %s133_s22, %s133_s22 }
  0x6f   :  { %p3339_p3 = scmp.ne.s32.totalorder %s133_s22, %s3338_s6  ;;  %p3344_p5 = scmp.lt.s32.totalorder %s3338_s6, %s3338_s6 }
  0x71   :  { %p3345_p6 = por %p3344_p5, %p3343_p4 }
  0x73   :  { %p3346_p7 = pnand %p3345_p6, %p3339_p3 }
  0x75   :  { %3349 = shalt.err (!%p3346_p7)
}
  0x76   :  { %138 = dma.hbm_to_vmem [thread:$0]  %s4423_s11, 24576, %s133_s22, [#allocation15], %s3409_s25, %s3409_s25, %s3410_s0  }
  0x77   :  { %s3420_s27 = smov [#allocation19]  }
  0x78   :  { %s166_s28 = sshll.u32 %s3420_s27, 4  ;;  %s167_s28 = int_to_ptr.vmem [resolvable:$true] %s166_s28 }
  0x79   :  { %s3358_s29 = scalar_lea.vmem %s167_s28, 4096  ;;  %p3363_p9 = scmp.lt.s32.totalorder %s167_s28, %s167_s28 }
  0x7a   :  { %p3359_p8 = scmp.ne.s32.totalorder %s167_s28, %s3358_s29  ;;  %p3364_p10 = scmp.lt.s32.totalorder %s3358_s29, %s3358_s29 }
  0x7c   :  { %p3365_p11 = por %p3364_p10, %p3363_p9 }
  0x7e   :  { %p3366_p12 = pnand %p3365_p11, %p3359_p8 }
  0x80   :  { %3369 = shalt.err (!%p3366_p12)
}
  0x81   :  { %172 = dma.hbm_to_vmem [thread:$0]  %s4431_s19, 4096, %s167_s28, [#allocation18], %s3409_s25, %s3409_s25, %s3410_s0  }
  0x82   :  { %3390 = dma.done.wait [#allocation3], 64  }
  0x83   :  { %3391 = vsyncadd [#allocation3], 4294967232 }
  0x84   :  { %3392 = dma.done.wait [#allocation6], 80  }
  0x85   :  { %3393 = vsyncadd [#allocation6], 4294967216 }
  0x86   :  { %3394 = dma.done.wait [#allocation9], 2064  }
  0x87   :  { %3395 = vsyncadd [#allocation9], 4294965232 }
  0x88   :  { %3396 = dma.done.wait [#allocation12], 12320  }
  0x89   :  { %3397 = vsyncadd [#allocation12], 4294954976 }
  0x8a   :  { %3398 = dma.done.wait [#allocation15], 24608  }
  0x8b   :  { %3399 = vsyncadd [#allocation15], 4294942688 }
  0x8c   :  { %3400 = dma.done.wait [#allocation18], 4352  }
  0x8d   :  { %3401 = vsyncadd [#allocation18], 4294962944  ;;  %v3421_v0 = vmov 0.0   ;;  %vm3422_vm0 = vmmov 0   ;;  %v241_v1 = vld [vmem:[#allocation10 + $0x78] sm:$0xff]  ;;  %v240_v2 = vld [vmem:[#allocation10 + $0x70] sm:$0xff]  ;;  %v321_v38 = vlaneseq }
  0x8e   :  { %2977 = vmatprep.subr.mxu0 %v3421_v0  ;;  %3009 = vmatprep.mubr.msk.f32.mxu0 %vm3422_vm0, %v3421_v0  ;;  %v239_v3 = vld [vmem:[#allocation10 + $0x68] sm:$0xff]  ;;  %v238_v4 = vld [vmem:[#allocation10 + $0x60] sm:$0xff]  ;;  %s4446_s1 = sld [smem:[#allocation28_spill]]  ;;  %v237_v7 = vld [vmem:[#allocation10 + $0x58] sm:$0xff]  ;;  %vm244_vm1 = vcmask 1041409   ;;  %vm538_vm2 = vcmask 1040384  }
  0x8f   :  { %3012 = vmatprep.subr.mxu1 %v3421_v0  ;;  %3044 = vmatprep.mubr.msk.f32.mxu1 %vm3422_vm0, %v3421_v0  ;;  %v236_v12 = vld [vmem:[#allocation10 + $0x50] sm:$0xff]  ;;  %v235_v15 = vld [vmem:[#allocation10 + $0x48] sm:$0xff]  ;;  %v234_v18 = vld [vmem:[#allocation10 + $0x40] sm:$0xff]  ;;  %v3423_v36 = vmov 1966171168   ;;  %v3643_v40 = vshrl.u32 %v321_v38, 7 }
  0x90   :  { %2978 = vmatpush3.msra.mxu0 %v241_v1  ;;  %3013 = vmatpush3.msra.mxu1 %v241_v1  ;;  %v233_v21 = vld [vmem:[#allocation10 + $0x38] sm:$0xff]  ;;  %v232_v22 = vld [vmem:[#allocation10 + $0x30] sm:$0xff]  ;;  %v231_v25 = vld [vmem:[#allocation10 + $0x28] sm:$0xff]  ;;  %v319_v37 = vunpack.c.l.s4 %v3423_v36  ;;  %vm551_vm4 = vcmask 1046528   ;;  %vm2175_vm5 = vcmask 130048   ;;  %vm2527_vm6 = vcmask 64512  }
  0x91   :  { %2979 = vmatprep.subr.mxu0 %v3421_v0  ;;  %3014 = vmatprep.subr.mxu1 %v3421_v0  ;;  %v230_v26 = vld [vmem:[#allocation10 + $0x20] sm:$0xff]  ;;  %v229_v29 = vld [vmem:[#allocation10 + $0x18] sm:$0xff]  ;;  %v228_v30 = vld [vmem:[#allocation10 + $0x10] sm:$0xff]  ;;  %v3650_v44 = vsub.s32 0, %v3643_v40 }
  0x92   :  { %2980 = vmatpush3.msra.mxu0 %v240_v2  ;;  %3015 = vmatpush3.msra.mxu1 %v240_v2  ;;  %v227_v33 = vld [vmem:[#allocation10 + $0x8] sm:$0xff]  ;;  %v226_v34 = vld [vmem:[#allocation10] sm:$0xff]  ;;  %v320_v39 = vunpack.c.0.s8 %v319_v37  ;;  %v615_v36 = vld [vmem:[#allocation11 + $0x190] sm:$0xff] }
  0x93   :  { %2981 = vmatprep.subr.mxu0 %v3421_v0  ;;  %3016 = vmatprep.subr.mxu1 %v3421_v0  ;;  %v583_v37 = vld [vmem:[#allocation11 + $0x98] sm:$0xff]  ;;  %v614_v38 = vld [vmem:[#allocation11 + $0x188] sm:$0xff]  ;;  %vm3690_vm3 = vmneg %vm538_vm2 }
  0x94   :  { %2982 = vmatpush3.msra.mxu0 %v239_v3  ;;  %v3594_v5 = vld [vmem:[%s4446_s1] sm:$0xff]  ;;  %v3599_v6 = vld [vmem:[%s4446_s1 + $0x8] sm:$0xff]  ;;  %3017 = vmatpush3.msra.mxu1 %v239_v3  ;;  %v3605_v8 = vld [vmem:[%s4446_s1 + $0x10] sm:$0xff]  ;;  %v3646_v41 = vsub.s32 %v320_v39, %v3643_v40 }
  0x95   :  { %2983 = vmatprep.subr.mxu0 %v3421_v0  ;;  %v3610_v9 = vld [vmem:[%s4446_s1 + $0x18] sm:$0xff]  ;;  %v212_v10 = vadd.f32 %v3599_v6, %v3594_v5  ;;  %3018 = vmatprep.subr.mxu1 %v3421_v0 }
  0x96   :  { %2984 = vmatpush3.msra.mxu0 %v238_v4  ;;  %v219_v11 = vadd.f32 %v3610_v9, %v3605_v8  ;;  %3019 = vmatpush3.msra.mxu1 %v238_v4  ;;  %v582_v39 = vld [vmem:[#allocation11 + $0x90] sm:$0xff] }
  0x97   :  { %2985 = vmatprep.subr.mxu0 %v3421_v0  ;;  %v213_v13 = vrot.slane %v212_v10, 4  ;;  %3020 = vmatprep.subr.mxu1 %v3421_v0 }
  0x98   :  { %2986 = vmatpush3.msra.mxu0 %v237_v7  ;;  %v220_v14 = vrot.slane %v219_v11, 4  ;;  %3021 = vmatpush3.msra.mxu1 %v237_v7 }
  0x99   :  { %2987 = vmatprep.subr.mxu0 %v3421_v0  ;;  %v214_v16 = vadd.f32 %v213_v13, %v212_v10  ;;  %3022 = vmatprep.subr.mxu1 %v3421_v0  ;;  %v626_v13 = vld [vmem:[#allocation11 + $0x1e8] sm:$0xff] }
  0x9a   :  { %2988 = vmatpush3.msra.mxu0 %v236_v12  ;;  %v221_v17 = vadd.f32 %v220_v14, %v219_v11  ;;  %3023 = vmatpush3.msra.mxu1 %v236_v12  ;;  %v628_v11 = vld [vmem:[#allocation11 + $0x1f8] sm:$0xff]  ;;  %v627_v12 = vld [vmem:[#allocation11 + $0x1f0] sm:$0xff]  ;;  %v625_v14 = vld [vmem:[#allocation11 + $0x1e0] sm:$0xff] }
  0x9b   :  { %2989 = vmatprep.subr.mxu0 %v3421_v0  ;;  %3024 = vmatprep.subr.mxu1 %v3421_v0  ;;  %v215_v19 = vrot.slane %v214_v16, 2 }
  0x9c   :  { %2990 = vmatpush3.msra.mxu0 %v235_v15  ;;  %v222_v20 = vrot.slane %v221_v17, 2  ;;  %3025 = vmatpush3.msra.mxu1 %v235_v15  ;;  %v595_v15 = vld [vmem:[#allocation11 + $0xf8] sm:$0xff] }
  0x9d   :  { %2991 = vmatprep.subr.mxu0 %v3421_v0  ;;  %3026 = vmatprep.subr.mxu1 %v3421_v0  ;;  %v216_v23 = vadd.f32 %v215_v19, %v214_v16  ;;  %v624_v16 = vld [vmem:[#allocation11 + $0x1d8] sm:$0xff]  ;;  %v623_v19 = vld [vmem:[#allocation11 + $0x1d0] sm:$0xff] }
  0x9e   :  { %2992 = vmatpush3.msra.mxu0 %v234_v18  ;;  %3027 = vmatpush3.msra.mxu1 %v234_v18  ;;  %v223_v24 = vadd.f32 %v222_v20, %v221_v17  ;;  %v594_v17 = vld [vmem:[#allocation11 + $0xf0] sm:$0xff]  ;;  %v593_v18 = vld [vmem:[#allocation11 + $0xe8] sm:$0xff]  ;;  %v592_v20 = vld [vmem:[#allocation11 + $0xe0] sm:$0xff] }
  0x9f   :  { %2993 = vmatprep.subr.mxu0 %v3421_v0  ;;  %3028 = vmatprep.subr.mxu1 %v3421_v0  ;;  %v217_v27 = vrot.slane %v216_v23, 1 }
  0xa0   :  { %2994 = vmatpush3.msra.mxu0 %v233_v21  ;;  %3029 = vmatpush3.msra.mxu1 %v233_v21  ;;  %v224_v28 = vrot.slane %v223_v24, 1  ;;  %v622_v21 = vld [vmem:[#allocation11 + $0x1c8] sm:$0xff] }
  0xa1   :  { %2995 = vmatprep.subr.mxu0 %v3421_v0  ;;  %3030 = vmatprep.subr.mxu1 %v3421_v0  ;;  %v218_v31 = vadd.f32 %v217_v27, %v216_v23  ;;  %v590_v23 = vld [vmem:[#allocation11 + $0xd0] sm:$0xff]  ;;  %v588_v27 = vld [vmem:[#allocation11 + $0xc0] sm:$0xff] }
  0xa2   :  { %2996 = vmatpush3.msra.mxu0 %v232_v22  ;;  %3031 = vmatpush3.msra.mxu1 %v232_v22  ;;  %v225_v32 = vadd.f32 %v224_v28, %v223_v24  ;;  %v591_v22 = vld [vmem:[#allocation11 + $0xd8] sm:$0xff]  ;;  %v621_v24 = vld [vmem:[#allocation11 + $0x1c0] sm:$0xff]  ;;  %v619_v28 = vld [vmem:[#allocation11 + $0x1b0] sm:$0xff] }
  0xa3   :  { %2997 = vmatprep.subr.mxu0 %v3421_v0  ;;  %3032 = vmatprep.subr.mxu1 %v3421_v0 }
  0xa4   :  { %2998 = vmatpush3.msra.mxu0 %v231_v25  ;;  %3033 = vmatpush3.msra.mxu1 %v231_v25  ;;  %v245_v35 = vsel %vm244_vm1, %v225_v32, %v218_v31  ;;  %v589_v25 = vld [vmem:[#allocation11 + $0xc8] sm:$0xff]  ;;  %v586_v31 = vld [vmem:[#allocation11 + $0xb0] sm:$0xff]  ;;  %v617_v32 = vld [vmem:[#allocation11 + $0x1a0] sm:$0xff] }
  0xa5   :  { %2999 = vmatprep.subr.mxu0 %v3421_v0  ;;  %3034 = vmatprep.subr.mxu1 %v3421_v0 }
  0xa6   :  { %3000 = vmatpush3.msra.mxu0 %v230_v26  ;;  %3035 = vmatpush3.msra.mxu1 %v230_v26  ;;  %v620_v26 = vld [vmem:[#allocation11 + $0x1b8] sm:$0xff] }
  0xa7   :  { %3001 = vmatprep.subr.mxu0 %v3421_v0  ;;  %3036 = vmatprep.subr.mxu1 %v3421_v0 }
  0xa8   :  { %3002 = vmatpush3.msra.mxu0 %v229_v29  ;;  %3037 = vmatpush3.msra.mxu1 %v229_v29  ;;  %v587_v29 = vld [vmem:[#allocation11 + $0xb8] sm:$0xff] }
  0xa9   :  { %3003 = vmatprep.subr.mxu0 %v3421_v0  ;;  %3038 = vmatprep.subr.mxu1 %v3421_v0 }
  0xaa   :  { %3004 = vmatpush3.msra.mxu0 %v228_v30  ;;  %3039 = vmatpush3.msra.mxu1 %v228_v30  ;;  %v618_v30 = vld [vmem:[#allocation11 + $0x1a8] sm:$0xff] }
  0xab   :  { %3005 = vmatprep.subr.mxu0 %v3421_v0  ;;  %3040 = vmatprep.subr.mxu1 %v3421_v0 }
  0xac   :  { %3006 = vmatpush3.msra.mxu0 %v227_v33  ;;  %3041 = vmatpush3.msra.mxu1 %v227_v33  ;;  %v585_v33 = vld [vmem:[#allocation11 + $0xa8] sm:$0xff] }
  0xad   :  { %3007 = vmatprep.subr.mxu0 %v3421_v0  ;;  %3042 = vmatprep.subr.mxu1 %v3421_v0 }
  0xae   :  { %3008 = vmatpush3.msra.mxu0 %v226_v34  ;;  %3043 = vmatpush3.msra.mxu1 %v226_v34  ;;  %v616_v34 = vld [vmem:[#allocation11 + $0x198] sm:$0xff] }
  0xaf   :  { %3010 = vmatmul.mubr.f32.vlgmr.msra.gmra.mxu0 %v245_v35  ;;  %629 = vmatprep.subr.mxu0 %v628_v11  ;;  %v584_v35 = vld [vmem:[#allocation11 + $0xa0] sm:$0xff] }
  0xb0   :  { %693 = vmatprep.mubr.f32.mxu0 %v3421_v0  ;;  %630 = vmatpush1.msra.mxu0 %v627_v12  ;;  %v568_v11 = vld [vmem:[#allocation11 + $0x20] sm:$0xff]  ;;  %v599_v12 = vld [vmem:[#allocation11 + $0x110] sm:$0xff] }
  0xb1   :  { %718 = vmatprep.subr.mxu1 %v595_v15  ;;  %631 = vmatprep.subr.mxu0 %v626_v13  ;;  %v567_v13 = vld [vmem:[#allocation11 + $0x18] sm:$0xff]  ;;  %v566_v15 = vld [vmem:[#allocation11 + $0x10] sm:$0xff] }
  0xb2   :  { %632 = vmatpush1.msra.mxu0 %v625_v14  ;;  %v598_v14 = vld [vmem:[#allocation11 + $0x108] sm:$0xff] }
  0xb3   :  { %633 = vmatprep.subr.mxu0 %v624_v16  ;;  %v597_v16 = vld [vmem:[#allocation11 + $0x100] sm:$0xff] }
  0xb4   :  { %634 = vmatpush1.msra.mxu0 %v623_v19  ;;  %v564_v19 = vld [vmem:[#allocation11] sm:$0xff] }
  0xb5   :  { %635 = vmatprep.subr.mxu0 %v622_v21 }
  0xb6   :  { %636 = vmatpush1.msra.mxu0 %v621_v24 }
  0xb7   :  { %637 = vmatprep.subr.mxu0 %v620_v26 }
  0xb8   :  { %638 = vmatpush1.msra.mxu0 %v619_v28 }
  0xb9   :  { %639 = vmatprep.subr.mxu0 %v618_v30 }
  0xba   :  { %640 = vmatpush1.msra.mxu0 %v617_v32 }
  0xbb   :  { %641 = vmatprep.subr.mxu0 %v616_v34 }
  0xbc   :  { %642 = vmatpush1.msra.mxu0 %v615_v36 }
  0xbd   :  { %643 = vmatprep.subr.mxu0 %v614_v38 }
 0x16f   :  { %v313_v42 = vpop.f32.mrf.mxu0 }
 0x170   :  { %v324_v43 = vrot.slane %v313_v42, %v3646_v41  ;;  %v613_v42 = vld [vmem:[#allocation11 + $0x180] sm:$0xff] }
 0x171   :  { %v3011_v45 = vpop.f32.mrf.mxu0  ;;  %644 = vmatpush1.msra.mxu0 %v613_v42 }
 0x172   :  { %v325_v46 = vcombine.high %v324_v43, %v324_v43  ;;  %v332_v47 = vrot.slane %v324_v43, %v3646_v41  ;;  %v581_v43 = vld [vmem:[#allocation11 + $0x88] sm:$0xff]  ;;  %v612_v45 = vld [vmem:[#allocation11 + $0x178] sm:$0xff] }
 0x173   :  { %645 = vmatprep.subr.mxu0 %v612_v45 }
 0x174   :  { %v339_v48 = vrot.slane %v325_v46, %v3646_v41  ;;  %v343_v49 = vrot.slane %v332_v47, %v3650_v44  ;;  %v580_v46 = vld [vmem:[#allocation11 + $0x80] sm:$0xff]  ;;  %v611_v47 = vld [vmem:[#allocation11 + $0x170] sm:$0xff] }
 0x175   :  { %646 = vmatpush1.msra.mxu0 %v611_v47 }
 0x176   :  { %v347_v50 = vrot.slane %v339_v48, %v3650_v44  ;;  %v3657_v51 = vsub.f32 %v3594_v5, %v343_v49  ;;  %v3660_v52 = vsub.f32 %v3599_v6, %v343_v49  ;;  %v579_v48 = vld [vmem:[#allocation11 + $0x78] sm:$0xff]  ;;  %v610_v49 = vld [vmem:[#allocation11 + $0x168] sm:$0xff] }
 0x177   :  { %647 = vmatprep.subr.mxu0 %v610_v49 }
 0x178   :  { %v3663_v53 = vsub.f32 %v3605_v8, %v347_v50  ;;  %v3666_v54 = vsub.f32 %v3610_v9, %v347_v50  ;;  %v354_v55 = vmul.f32 %v3657_v51, %v3657_v51  ;;  %v355_v56 = vmul.f32 %v3660_v52, %v3660_v52  ;;  %v578_v50 = vld [vmem:[#allocation11 + $0x70] sm:$0xff] }
 0x17a   :  { %v356_v57 = vmul.f32 %v3663_v53, %v3663_v53  ;;  %v357_v58 = vmul.f32 %v3666_v54, %v3666_v54  ;;  %v358_v59 = vadd.f32 %v355_v56, %v354_v55  ;;  %v609_v55 = vld [vmem:[#allocation11 + $0x160] sm:$0xff]  ;;  %v577_v56 = vld [vmem:[#allocation11 + $0x68] sm:$0xff] }
 0x17b   :  { %648 = vmatpush1.msra.mxu0 %v609_v55 }
 0x17c   :  { %v359_v60 = vrot.slane %v358_v59, 4  ;;  %v365_v61 = vadd.f32 %v357_v58, %v356_v57  ;;  %v608_v57 = vld [vmem:[#allocation11 + $0x158] sm:$0xff]  ;;  %v576_v58 = vld [vmem:[#allocation11 + $0x60] sm:$0xff] }
 0x17d   :  { %649 = vmatprep.subr.mxu0 %v608_v57 }
 0x17e   :  { %v360_v62 = vadd.f32 %v359_v60, %v358_v59  ;;  %v366_v63 = vrot.slane %v365_v61, 4  ;;  %v607_v59 = vld [vmem:[#allocation11 + $0x150] sm:$0xff]  ;;  %v575_v60 = vld [vmem:[#allocation11 + $0x58] sm:$0xff] }
 0x17f   :  { %650 = vmatpush1.msra.mxu0 %v607_v59 }
 0x180   :  { %v361_v1 = vrot.slane %v360_v62, 2  ;;  %v367_v2 = vadd.f32 %v366_v63, %v365_v61  ;;  %v606_v61 = vld [vmem:[#allocation11 + $0x148] sm:$0xff]  ;;  %v605_v63 = vld [vmem:[#allocation11 + $0x140] sm:$0xff] }
 0x181   :  { %651 = vmatprep.subr.mxu0 %v606_v61 }
 0x182   :  { %v362_v3 = vadd.f32 %v361_v1, %v360_v62  ;;  %v368_v4 = vrot.slane %v367_v2, 2  ;;  %v574_v62 = vld [vmem:[#allocation11 + $0x50] sm:$0xff]  ;;  %v573_v1 = vld [vmem:[#allocation11 + $0x48] sm:$0xff]  ;;  %652 = vmatpush1.msra.mxu0 %v605_v63 }
 0x184   :  { %v363_v5 = vrot.slane %v362_v3, 1  ;;  %v369_v6 = vadd.f32 %v368_v4, %v367_v2  ;;  %v604_v2 = vld [vmem:[#allocation11 + $0x138] sm:$0xff]  ;;  %v603_v4 = vld [vmem:[#allocation11 + $0x130] sm:$0xff] }
 0x185   :  { %653 = vmatprep.subr.mxu0 %v604_v2 }
 0x186   :  { %v370_v7 = vrot.slane %v369_v6, 1  ;;  %v364_v8 = vadd.f32 %v363_v5, %v362_v3  ;;  %v572_v3 = vld [vmem:[#allocation11 + $0x40] sm:$0xff]  ;;  %v571_v5 = vld [vmem:[#allocation11 + $0x38] sm:$0xff]  ;;  %654 = vmatpush1.msra.mxu0 %v603_v4  ;;  %v837_v4 = vld [vmem:[#allocation11 + $0x2e8] sm:$0xff] }
 0x188   :  { %v371_v9 = vadd.f32 %v370_v7, %v369_v6  ;;  %v602_v6 = vld [vmem:[#allocation11 + $0x128] sm:$0xff]  ;;  %v570_v7 = vld [vmem:[#allocation11 + $0x30] sm:$0xff] }
 0x189   :  { %655 = vmatprep.subr.mxu0 %v602_v6 }
 0x18a   :  { %v374_v10 = vsel %vm244_vm1, %v371_v9, %v364_v8  ;;  %v601_v8 = vld [vmem:[#allocation11 + $0x120] sm:$0xff]  ;;  %v569_v9 = vld [vmem:[#allocation11 + $0x28] sm:$0xff] }
 0x18b   :  { %3045 = vmatmul.mubr.f32.vlgmr.msra.gmra.mxu1 %v374_v10  ;;  %v600_v10 = vld [vmem:[#allocation11 + $0x118] sm:$0xff]  ;;  %656 = vmatpush1.msra.mxu0 %v601_v8  ;;  %v836_v8 = vld [vmem:[#allocation11 + $0x2e0] sm:$0xff] }
 0x18c   :  { %782 = vmatprep.mubr.f32.mxu1 %v3421_v0  ;;  %719 = vmatpush1.msra.mxu1 %v594_v17  ;;  %v839_v17 = vld [vmem:[#allocation11 + $0x2f8] sm:$0xff] }
 0x18d   :  { %720 = vmatprep.subr.mxu1 %v593_v18  ;;  %657 = vmatprep.subr.mxu0 %v600_v10  ;;  %v565_v18 = vld [vmem:[#allocation11 + $0x8] sm:$0xff]  ;;  %v835_v10 = vld [vmem:[#allocation11 + $0x2d8] sm:$0xff] }
 0x18e   :  { %721 = vmatpush1.msra.mxu1 %v592_v20  ;;  %658 = vmatpush1.msra.mxu0 %v599_v12 }
 0x18f   :  { %722 = vmatprep.subr.mxu1 %v591_v22  ;;  %659 = vmatprep.subr.mxu0 %v598_v14  ;;  %v833_v14 = vld [vmem:[#allocation11 + $0x2c8] sm:$0xff] }
 0x190   :  { %723 = vmatpush1.msra.mxu1 %v590_v23  ;;  %660 = vmatpush1.msra.mxu0 %v597_v16 }
 0x191   :  { %724 = vmatprep.subr.mxu1 %v589_v25  ;;  %840 = vmatprep.subr.mxu0 %v839_v17 }
 0x192   :  { %725 = vmatpush1.msra.mxu1 %v588_v27 }
 0x193   :  { %726 = vmatprep.subr.mxu1 %v587_v29  ;;  %v2838_v29 = vld [vmem:[#allocation7] ss:$0 sm:$0xff] }
 0x194   :  { %727 = vmatpush1.msra.mxu1 %v586_v31 }
 0x195   :  { %728 = vmatprep.subr.mxu1 %v585_v33  ;;  %v2839_v33 = vld [vmem:[#allocation8] ss:$0 sm:$0xff] }
 0x196   :  { %729 = vmatpush1.msra.mxu1 %v584_v35 }
 0x197   :  { %730 = vmatprep.subr.mxu1 %v583_v37 }
 0x198   :  { %731 = vmatpush1.msra.mxu1 %v582_v39 }
 0x199   :  { %732 = vmatprep.subr.mxu1 %v581_v43 }
 0x19a   :  { %733 = vmatpush1.msra.mxu1 %v580_v46 }
 0x19b   :  { %734 = vmatprep.subr.mxu1 %v579_v48 }
 0x19c   :  { %735 = vmatpush1.msra.mxu1 %v578_v50 }
 0x19d   :  { %736 = vmatprep.subr.mxu1 %v577_v56 }
 0x19e   :  { %737 = vmatpush1.msra.mxu1 %v576_v58 }
 0x19f   :  { %738 = vmatprep.subr.mxu1 %v575_v60 }
 0x1a0   :  { %739 = vmatpush1.msra.mxu1 %v574_v62 }
 0x1a1   :  { %740 = vmatprep.subr.mxu1 %v573_v1 }
 0x1a2   :  { %741 = vmatpush1.msra.mxu1 %v572_v3  ;;  %v838_v3 = vld [vmem:[#allocation11 + $0x2f0] sm:$0xff] }
 0x1a3   :  { %742 = vmatprep.subr.mxu1 %v571_v5  ;;  %v1892_v5 = vld [vmem:[#allocation16 + $0x478] sm:$0xff] }
 0x1a4   :  { %743 = vmatpush1.msra.mxu1 %v570_v7 }
 0x1a5   :  { %744 = vmatprep.subr.mxu1 %v569_v9 }
 0x1a6   :  { %745 = vmatpush1.msra.mxu1 %v568_v11 }
 0x1a7   :  { %746 = vmatprep.subr.mxu1 %v567_v13  ;;  %v834_v13 = vld [vmem:[#allocation11 + $0x2d0] sm:$0xff] }
 0x1a8   :  { %747 = vmatpush1.msra.mxu1 %v566_v15  ;;  %v832_v15 = vld [vmem:[#allocation11 + $0x2c0] sm:$0xff] }
 0x1a9   :  { %748 = vmatprep.subr.mxu1 %v565_v18  ;;  %v831_v18 = vld [vmem:[#allocation11 + $0x2b8] sm:$0xff] }
 0x1aa   :  { %749 = vmatpush1.msra.mxu1 %v564_v19 }
 0x24b   :  { %v442_v20 = vpop.f32.mrf.mxu1 }
 0x24c   :  { %v443_v21 = vadd.f32 1e-05, %v442_v20  ;;  %v830_v20 = vld [vmem:[#allocation11 + $0x2b0] sm:$0xff] }
 0x24d   :  { %v3046_v22 = vpop.f32.mrf.mxu1 }
 0x24e   :  { %3068 = vrsqrt.f32 %v443_v21  ;;  %v829_v21 = vld [vmem:[#allocation11 + $0x2a8] sm:$0xff] }
 0x25b   :  { %v3069_v23 = vpop.eup %3068 }
 0x25c   :  { %v454_v24 = vrot.slane %v3069_v23, %v3646_v41  ;;  %v828_v23 = vld [vmem:[#allocation11 + $0x2a0] sm:$0xff] }
 0x25e   :  { %v462_v25 = vrot.slane %v454_v24, %v3646_v41  ;;  %v455_v26 = vcombine.high %v454_v24, %v454_v24  ;;  %v827_v24 = vld [vmem:[#allocation11 + $0x298] sm:$0xff] }
 0x260   :  { %v473_v27 = vrot.slane %v462_v25, %v3650_v44  ;;  %v469_v28 = vrot.slane %v455_v26, %v3646_v41  ;;  %v826_v26 = vld [vmem:[#allocation11 + $0x290] sm:$0xff] }
 0x262   :  { %v480_v30 = vmul.f32 %v473_v27, %v3657_v51  ;;  %v481_v31 = vmul.f32 %v473_v27, %v3660_v52  ;;  %v477_v32 = vrot.slane %v469_v28, %v3650_v44  ;;  %v825_v27 = vld [vmem:[#allocation11 + $0x288] sm:$0xff]  ;;  %v824_v28 = vld [vmem:[#allocation11 + $0x280] sm:$0xff] }
 0x264   :  { %v491_v34 = vmul.f32 %v2838_v29, %v480_v30  ;;  %v492_v35 = vmul.f32 %v2838_v29, %v481_v31  ;;  %v482_v36 = vmul.f32 %v477_v32, %v3663_v53  ;;  %v483_v37 = vmul.f32 %v477_v32, %v3666_v54  ;;  %v823_v30 = vld [vmem:[#allocation11 + $0x278] sm:$0xff]  ;;  %v822_v31 = vld [vmem:[#allocation11 + $0x270] sm:$0xff]  ;;  %v821_v32 = vld [vmem:[#allocation11 + $0x268] sm:$0xff] }
 0x266   :  { %v502_v38 = vadd.f32 %v2839_v33, %v491_v34  ;;  %v503_v39 = vadd.f32 %v2839_v33, %v492_v35  ;;  %v493_v42 = vmul.f32 %v2838_v29, %v482_v36  ;;  %v494_v43 = vmul.f32 %v2838_v29, %v483_v37  ;;  %v819_v34 = vld [vmem:[#allocation11 + $0x258] sm:$0xff]  ;;  %v818_v35 = vld [vmem:[#allocation11 + $0x250] sm:$0xff]  ;;  %v817_v36 = vld [vmem:[#allocation11 + $0x248] sm:$0xff] }
 0x267   :  { %v816_v37 = vld [vmem:[#allocation11 + $0x240] sm:$0xff] }
 0x268   :  { %v506_v45 = vsub.f32 0.0, %v502_v38  ;;  %v507_v46 = vsub.f32 0.0, %v503_v39  ;;  %v504_v47 = vadd.f32 %v2839_v33, %v493_v42  ;;  %v505_v48 = vadd.f32 %v2839_v33, %v494_v43  ;;  %v820_v33 = vld [vmem:[#allocation11 + $0x260] sm:$0xff]  ;;  %v813_v42 = vld [vmem:[#allocation11 + $0x228] sm:$0xff] }
 0x269   :  { %v812_v43 = vld [vmem:[#allocation11 + $0x220] sm:$0xff] }
 0x26a   :  { %v510_v51 = vmul.f32 1.442695, %v506_v45  ;;  %v512_v49 = vmul.f32 1.442695, %v507_v46  ;;  %v508_v52 = vsub.f32 0.0, %v504_v47  ;;  %v509_v50 = vsub.f32 0.0, %v505_v48 }
 0x26b   :  { %v811_v45 = vld [vmem:[#allocation11 + $0x218] sm:$0xff]  ;;  %v810_v46 = vld [vmem:[#allocation11 + $0x210] sm:$0xff] }
 0x26c   :  { %3070 = vpow2.f32 %v510_v51  ;;  %v514_v55 = vmul.f32 1.442695, %v508_v52  ;;  %v516_v56 = vmul.f32 1.442695, %v509_v50 }
 0x26d   :  { %3072 = vpow2.f32 %v512_v49  ;;  %v808_v49 = vld [vmem:[#allocation11 + $0x200] sm:$0xff] }
 0x26e   :  { %3074 = vpow2.f32 %v514_v55 }
 0x26f   :  { %3076 = vpow2.f32 %v516_v56 }
 0x279   :  { %v3071_v53 = vpop.eup %3070 }
 0x27a   :  { %v3073_v54 = vpop.eup %3072  ;;  %v518_v57 = vadd.f32 1.0, %v3071_v53  ;;  %v1016_v53 = vld [vmem:[%s4422_s10 + $0xf8] sm:$0xff] }
 0x27b   :  { %v3075_v58 = vpop.eup %3074  ;;  %v519_v59 = vadd.f32 1.0, %v3073_v54  ;;  %1057 = vmatprep.subr.mxu1 %v1016_v53  ;;  %v1015_v54 = vld [vmem:[%s4422_s10 + $0xf0] sm:$0xff] }
 0x27c   :  { %v3077_v60 = vpop.eup %3076  ;;  %3078 = vrcp.f32 %v518_v57  ;;  %v520_v61 = vadd.f32 1.0, %v3075_v58  ;;  %v1014_v57 = vld [vmem:[%s4422_s10 + $0xe8] sm:$0xff]  ;;  %v1013_v58 = vld [vmem:[%s4422_s10 + $0xe0] sm:$0xff] }
 0x27d   :  { %3080 = vrcp.f32 %v519_v59  ;;  %v521_v62 = vadd.f32 1.0, %v3077_v60  ;;  %v1012_v59 = vld [vmem:[%s4422_s10 + $0xd8] sm:$0xff]  ;;  %v1011_v60 = vld [vmem:[%s4422_s10 + $0xd0] sm:$0xff] }
 0x27e   :  { %3082 = vrcp.f32 %v520_v61  ;;  %v1010_v61 = vld [vmem:[%s4422_s10 + $0xc8] sm:$0xff] }
 0x27f   :  { %3084 = vrcp.f32 %v521_v62  ;;  %v1009_v62 = vld [vmem:[%s4422_s10 + $0xc0] sm:$0xff] }
 0x289   :  { %v3079_v63 = vpop.eup %3078 }
 0x28a   :  { %v3081_v1 = vpop.eup %3080  ;;  %v3687_v2 = vmul.f32 %v3079_v63, %v502_v38  ;;  %v815_v38 = vld [vmem:[#allocation11 + $0x238] sm:$0xff]  ;;  %v1008_v63 = vld [vmem:[%s4422_s10 + $0xb8] sm:$0xff] }
 0x28b   :  { %v3694_v6 = vmul.f32 %v3081_v1, %v503_v39  ;;  %v3083_v9 = vpop.eup %3082  ;;  %v814_v39 = vld [vmem:[#allocation11 + $0x230] sm:$0xff]  ;;  %v1007_v1 = vld [vmem:[%s4422_s10 + $0xb0] sm:$0xff] }
 0x28c   :  { %694 = vmatmul.mubr.f32.vlgmr.msra.gmra.mxu0 %v3687_v2  ;;  %v539_v7 = vrot.slane %v3687_v2, 7  ;;  %v3085_v12 = vpop.eup %3084  ;;  %v3704_v16 = vmul.f32 %v3083_v9, %v504_v47  ;;  %v552_v51 = vrot.slane %v3687_v2, 1  ;;  %v1006_v2 = vld [vmem:[%s4422_s10 + $0xa8] sm:$0xff]  ;;  %v1000_v9 = vld [vmem:[%s4422_s10 + $0x78] sm:$0xff] }
 0x28d   :  { %841 = vmatpush1.msra.mxu0 %v838_v3  ;;  %699 = vmatprep.mubr.f32.mxu0 %v3421_v0  ;;  %v540_v11 = vrot.slane %v3694_v6, 7  ;;  %v3708_v19 = vmul.f32 %v3085_v12, %v505_v48  ;;  %v553_v47 = vrot.slane %v3694_v6, 1  ;;  %v809_v48 = vld [vmem:[#allocation11 + $0x208] sm:$0xff]  ;;  %v1005_v3 = vld [vmem:[%s4422_s10 + $0xa0] sm:$0xff] }
 0x28e   :  { %842 = vmatprep.subr.mxu0 %v837_v4  ;;  %2841 = vmatmul.mubr.msk.f32.vlgmr.msra.gmra.mxu1 %vm3690_vm3, %v539_v7  ;;  %v542_v22 = vrot.slane %v3704_v16, 7  ;;  %v555_v50 = vrot.slane %v3704_v16, 1  ;;  %v1004_v4 = vld [vmem:[%s4422_s10 + $0x98] sm:$0xff]  ;;  %v997_v12 = vld [vmem:[%s4422_s10 + $0x60] sm:$0xff] }
 0x28f   :  { %843 = vmatpush1.msra.mxu0 %v836_v8  ;;  %788 = vmatprep.mubr.f32.mxu1 %v3421_v0  ;;  %v541_v17 = vsel %vm538_vm2, %v539_v7, %v540_v11  ;;  %v543_v25 = vrot.slane %v3708_v19, 7  ;;  %v554_v52 = vsel %vm551_vm4, %v552_v51, %v553_v47  ;;  %v556_v55 = vrot.slane %v3708_v19, 1  ;;  %v1002_v7 = vld [vmem:[%s4422_s10 + $0x88] sm:$0xff]  ;;  %v1001_v8 = vld [vmem:[%s4422_s10 + $0x80] sm:$0xff]  ;;  %v1027_v51 = vld [vmem:[%s4422_s10 + $0x150] sm:$0xff] }
 0x290   :  { %844 = vmatprep.subr.mxu0 %v835_v10  ;;  %700 = vmatmul.mubr.f32.gmra.mxu0 %v3694_v6  ;;  %v1003_v6 = vld [vmem:[%s4422_s10 + $0x90] sm:$0xff]  ;;  %v998_v11 = vld [vmem:[%s4422_s10 + $0x68] sm:$0xff] }
 0x291   :  { %845 = vmatpush1.msra.mxu0 %v834_v13  ;;  %705 = vmatprep.mubr.f32.mxu0 %v3421_v0  ;;  %v544_v29 = vsel %vm538_vm2, %v542_v22, %v543_v25  ;;  %v557_v56 = vsel %vm551_vm4, %v555_v50, %v556_v55  ;;  %v999_v10 = vld [vmem:[%s4422_s10 + $0x70] sm:$0xff]  ;;  %v996_v13 = vld [vmem:[%s4422_s10 + $0x58] sm:$0xff] }
 0x292   :  { %846 = vmatprep.subr.mxu0 %v833_v14  ;;  %789 = vmatmul.mubr.f32.gmra.mxu1 %v541_v17  ;;  %v995_v14 = vld [vmem:[%s4422_s10 + $0x50] sm:$0xff]  ;;  %v992_v17 = vld [vmem:[%s4422_s10 + $0x38] sm:$0xff] }
 0x293   :  { %847 = vmatpush1.msra.mxu0 %v832_v15  ;;  %794 = vmatprep.mubr.f32.mxu1 %v3421_v0  ;;  %v994_v15 = vld [vmem:[%s4422_s10 + $0x48] sm:$0xff]  ;;  %v1048_v25 = vld [vmem:[%s4422_s10 + $0x1f8] sm:$0xff] }
 0x294   :  { %848 = vmatprep.subr.mxu0 %v831_v18  ;;  %706 = vmatmul.mubr.f32.gmra.mxu0 %v3704_v16  ;;  %v993_v16 = vld [vmem:[%s4422_s10 + $0x40] sm:$0xff]  ;;  %v991_v18 = vld [vmem:[%s4422_s10 + $0x30] sm:$0xff]  ;;  %v1024_v50 = vld [vmem:[%s4422_s10 + $0x138] sm:$0xff] }
 0x295   :  { %849 = vmatpush1.msra.mxu0 %v830_v20  ;;  %711 = vmatprep.mubr.f32.mxu0 %v3421_v0  ;;  %v989_v20 = vld [vmem:[%s4422_s10 + $0x20] sm:$0xff] }
 0x296   :  { %850 = vmatprep.subr.mxu0 %v829_v21  ;;  %2843 = vmatmul.mubr.msk.f32.gmra.mxu1 %vm3690_vm3, %v542_v22  ;;  %v988_v21 = vld [vmem:[%s4422_s10 + $0x18] sm:$0xff]  ;;  %v987_v22 = vld [vmem:[%s4422_s10 + $0x10] sm:$0xff] }
 0x297   :  { %851 = vmatpush1.msra.mxu0 %v828_v23  ;;  %800 = vmatprep.mubr.f32.mxu1 %v3421_v0  ;;  %v986_v23 = vld [vmem:[%s4422_s10 + $0x8] sm:$0xff] }
 0x298   :  { %852 = vmatprep.subr.mxu0 %v827_v24  ;;  %712 = vmatmul.mubr.f32.gmra.mxu0 %v3708_v19  ;;  %v990_v19 = vld [vmem:[%s4422_s10 + $0x28] sm:$0xff]  ;;  %v985_v24 = vld [vmem:[%s4422_s10] sm:$0xff] }
 0x299   :  { %853 = vmatpush1.msra.mxu0 %v826_v26  ;;  %904 = vmatprep.mubr.f32.mxu0 %v3421_v0  ;;  %v1047_v26 = vld [vmem:[%s4422_s10 + $0x1f0] sm:$0xff] }
 0x29a   :  { %854 = vmatprep.subr.mxu0 %v825_v27  ;;  %801 = vmatmul.mubr.f32.gmra.mxu1 %v544_v29  ;;  %v1046_v27 = vld [vmem:[%s4422_s10 + $0x1e8] sm:$0xff]  ;;  %v1044_v29 = vld [vmem:[%s4422_s10 + $0x1d8] sm:$0xff] }
 0x29b   :  { %855 = vmatpush1.msra.mxu0 %v824_v28  ;;  %1058 = vmatpush1.msra.mxu1 %v1015_v54  ;;  %v1045_v28 = vld [vmem:[%s4422_s10 + $0x1e0] sm:$0xff] }
 0x29c   :  { %856 = vmatprep.subr.mxu0 %v823_v30  ;;  %1059 = vmatprep.subr.mxu1 %v1014_v57  ;;  %v1043_v30 = vld [vmem:[%s4422_s10 + $0x1d0] sm:$0xff] }
 0x29d   :  { %857 = vmatpush1.msra.mxu0 %v822_v31  ;;  %1060 = vmatpush1.msra.mxu1 %v1013_v58  ;;  %v1042_v31 = vld [vmem:[%s4422_s10 + $0x1c8] sm:$0xff] }
 0x29e   :  { %858 = vmatprep.subr.mxu0 %v821_v32  ;;  %1061 = vmatprep.subr.mxu1 %v1012_v59  ;;  %v1041_v32 = vld [vmem:[%s4422_s10 + $0x1c0] sm:$0xff] }
 0x29f   :  { %859 = vmatpush1.msra.mxu0 %v820_v33  ;;  %1062 = vmatpush1.msra.mxu1 %v1011_v60  ;;  %v1040_v33 = vld [vmem:[%s4422_s10 + $0x1b8] sm:$0xff] }
 0x2a0   :  { %860 = vmatprep.subr.mxu0 %v819_v34  ;;  %1063 = vmatprep.subr.mxu1 %v1010_v61  ;;  %v1039_v34 = vld [vmem:[%s4422_s10 + $0x1b0] sm:$0xff] }
 0x2a1   :  { %861 = vmatpush1.msra.mxu0 %v818_v35  ;;  %1064 = vmatpush1.msra.mxu1 %v1009_v62  ;;  %v1038_v35 = vld [vmem:[%s4422_s10 + $0x1a8] sm:$0xff] }
 0x2a2   :  { %862 = vmatprep.subr.mxu0 %v817_v36  ;;  %1065 = vmatprep.subr.mxu1 %v1008_v63  ;;  %v1037_v36 = vld [vmem:[%s4422_s10 + $0x1a0] sm:$0xff] }
 0x2a3   :  { %863 = vmatpush1.msra.mxu0 %v816_v37  ;;  %1066 = vmatpush1.msra.mxu1 %v1007_v1  ;;  %v1036_v37 = vld [vmem:[%s4422_s10 + $0x198] sm:$0xff] }
 0x2a4   :  { %864 = vmatprep.subr.mxu0 %v815_v38  ;;  %1067 = vmatprep.subr.mxu1 %v1006_v2  ;;  %v1035_v38 = vld [vmem:[%s4422_s10 + $0x190] sm:$0xff] }
 0x2a5   :  { %865 = vmatpush1.msra.mxu0 %v814_v39  ;;  %1068 = vmatpush1.msra.mxu1 %v1005_v3  ;;  %v1034_v39 = vld [vmem:[%s4422_s10 + $0x188] sm:$0xff] }
 0x2a6   :  { %866 = vmatprep.subr.mxu0 %v813_v42  ;;  %1069 = vmatprep.subr.mxu1 %v1004_v4  ;;  %v1033_v42 = vld [vmem:[%s4422_s10 + $0x180] sm:$0xff] }
 0x2a7   :  { %867 = vmatpush1.msra.mxu0 %v812_v43  ;;  %1070 = vmatpush1.msra.mxu1 %v1003_v6  ;;  %v1032_v43 = vld [vmem:[%s4422_s10 + $0x178] sm:$0xff] }
 0x2a8   :  { %868 = vmatprep.subr.mxu0 %v811_v45  ;;  %1071 = vmatprep.subr.mxu1 %v1002_v7  ;;  %v1031_v45 = vld [vmem:[%s4422_s10 + $0x170] sm:$0xff] }
 0x2a9   :  { %869 = vmatpush1.msra.mxu0 %v810_v46  ;;  %1072 = vmatpush1.msra.mxu1 %v1001_v8  ;;  %v1030_v46 = vld [vmem:[%s4422_s10 + $0x168] sm:$0xff] }
 0x2aa   :  { %870 = vmatprep.subr.mxu0 %v809_v48  ;;  %1073 = vmatprep.subr.mxu1 %v1000_v9  ;;  %v1028_v48 = vld [vmem:[%s4422_s10 + $0x158] sm:$0xff] }
 0x2ab   :  { %871 = vmatpush1.msra.mxu0 %v808_v49  ;;  %1074 = vmatpush1.msra.mxu1 %v999_v10  ;;  %v1026_v49 = vld [vmem:[%s4422_s10 + $0x148] sm:$0xff] }
 0x2ac   :  { %905 = vmatmul.mubr.f32.vlgmr.msra.gmra.mxu0 %v554_v52  ;;  %1225 = vmatprep.subr.mxu0 %v1016_v53  ;;  %v1025_v52 = vld [vmem:[%s4422_s10 + $0x140] sm:$0xff] }
 0x2ad   :  { %910 = vmatprep.mubr.f32.mxu0 %v3421_v0  ;;  %1226 = vmatpush1.msra.mxu0 %v1015_v54  ;;  %v1021_v53 = vld [vmem:[%s4422_s10 + $0x120] sm:$0xff]  ;;  %v1020_v54 = vld [vmem:[%s4422_s10 + $0x118] sm:$0xff] }
 0x2ae   :  { %1227 = vmatprep.subr.mxu0 %v1014_v57  ;;  %1075 = vmatprep.subr.mxu1 %v998_v11  ;;  %v1019_v57 = vld [vmem:[%s4422_s10 + $0x110] sm:$0xff] }
 0x2af   :  { %1228 = vmatpush1.msra.mxu0 %v1013_v58  ;;  %1076 = vmatpush1.msra.mxu1 %v997_v12  ;;  %v1018_v58 = vld [vmem:[%s4422_s10 + $0x108] sm:$0xff] }
 0x2b0   :  { %2844 = vmatmul.mubr.msk.f32.gmra.mxu0 %vm551_vm4, %v553_v47  ;;  %1229 = vmatprep.subr.mxu0 %v1012_v59  ;;  %v1029_v47 = vld [vmem:[%s4422_s10 + $0x160] sm:$0xff] }
 0x2b1   :  { %916 = vmatprep.mubr.f32.mxu0 %v3421_v0  ;;  %1230 = vmatpush1.msra.mxu0 %v1011_v60  ;;  %v1017_v59 = vld [vmem:[%s4422_s10 + $0x100] sm:$0xff] }
 0x2b2   :  { %1231 = vmatprep.subr.mxu0 %v1010_v61  ;;  %1077 = vmatprep.subr.mxu1 %v996_v13 }
 0x2b3   :  { %1232 = vmatpush1.msra.mxu0 %v1009_v62  ;;  %1078 = vmatpush1.msra.mxu1 %v995_v14 }
 0x2b4   :  { %917 = vmatmul.mubr.f32.gmra.mxu0 %v557_v56  ;;  %1233 = vmatprep.subr.mxu0 %v1008_v63  ;;  %v1022_v56 = vld [vmem:[%s4422_s10 + $0x128] sm:$0xff] }
 0x2b5   :  { %922 = vmatprep.mubr.f32.mxu0 %v3421_v0  ;;  %1234 = vmatpush1.msra.mxu0 %v1007_v1 }
 0x2b6   :  { %1235 = vmatprep.subr.mxu0 %v1006_v2  ;;  %1079 = vmatprep.subr.mxu1 %v994_v15 }
 0x2b7   :  { %1236 = vmatpush1.msra.mxu0 %v1005_v3  ;;  %1080 = vmatpush1.msra.mxu1 %v993_v16 }
 0x2b8   :  { %2845 = vmatmul.mubr.msk.f32.gmra.mxu0 %vm551_vm4, %v556_v55  ;;  %1237 = vmatprep.subr.mxu0 %v1004_v4  ;;  %v1023_v55 = vld [vmem:[%s4422_s10 + $0x130] sm:$0xff] }
 0x2b9   :  { %1238 = vmatpush1.msra.mxu0 %v1003_v6  ;;  %1081 = vmatprep.subr.mxu1 %v992_v17 }
 0x2ba   :  { %1239 = vmatprep.subr.mxu0 %v1002_v7  ;;  %1082 = vmatpush1.msra.mxu1 %v991_v18 }
 0x2bb   :  { %1240 = vmatpush1.msra.mxu0 %v1001_v8  ;;  %1083 = vmatprep.subr.mxu1 %v990_v19 }
 0x2bc   :  { %1241 = vmatprep.subr.mxu0 %v1000_v9  ;;  %1084 = vmatpush1.msra.mxu1 %v989_v20 }
 0x2bd   :  { %1242 = vmatpush1.msra.mxu0 %v999_v10  ;;  %1085 = vmatprep.subr.mxu1 %v988_v21 }
 0x2be   :  { %1243 = vmatprep.subr.mxu0 %v998_v11  ;;  %1086 = vmatpush1.msra.mxu1 %v987_v22 }
 0x2bf   :  { %1244 = vmatpush1.msra.mxu0 %v997_v12  ;;  %1087 = vmatprep.subr.mxu1 %v986_v23  ;;  %v937_v12 = vld [vmem:[%s4419_s7] sm:$0x3] }
 0x2c0   :  { %1245 = vmatprep.subr.mxu0 %v996_v13  ;;  %1088 = vmatpush1.msra.mxu1 %v985_v24  ;;  %v3928_v13 = vsub.s32 1, %v3643_v40 }
 0x2c1   :  { %1246 = vmatpush1.msra.mxu0 %v995_v14  ;;  %1089 = vmatprep.subr.mxu1 %v1048_v25 }
 0x2c2   :  { %1247 = vmatprep.subr.mxu0 %v994_v15  ;;  %1090 = vmatpush2.msra.mxu1 %v1047_v26 }
 0x2c3   :  { %1248 = vmatpush1.msra.mxu0 %v993_v16  ;;  %1091 = vmatprep.subr.mxu1 %v1046_v27 }
 0x2c4   :  { %1249 = vmatprep.subr.mxu0 %v992_v17  ;;  %1092 = vmatpush2.msra.mxu1 %v1045_v28 }
 0x2c5   :  { %1250 = vmatpush1.msra.mxu0 %v991_v18  ;;  %1093 = vmatprep.subr.mxu1 %v1044_v29 }
 0x2c6   :  { %1251 = vmatprep.subr.mxu0 %v990_v19  ;;  %1094 = vmatpush2.msra.mxu1 %v1043_v30 }
 0x2c7   :  { %1252 = vmatpush1.msra.mxu0 %v989_v20  ;;  %1095 = vmatprep.subr.mxu1 %v1042_v31  ;;  %v942_v20 = vrot.slane %v937_v12, %v3650_v44 }
 0x2c8   :  { %1253 = vmatprep.subr.mxu0 %v988_v21  ;;  %1096 = vmatpush2.msra.mxu1 %v1041_v32 }
 0x2c9   :  { %1254 = vmatpush1.msra.mxu0 %v987_v22  ;;  %1097 = vmatprep.subr.mxu1 %v1040_v33 }
 0x2ca   :  { %1255 = vmatprep.subr.mxu0 %v986_v23  ;;  %1098 = vmatpush2.msra.mxu1 %v1039_v34 }
 0x2cb   :  { %1256 = vmatpush1.msra.mxu0 %v985_v24  ;;  %1099 = vmatprep.subr.mxu1 %v1038_v35  ;;  %v946_v24 = vrot.slane %v937_v12, %v3928_v13 }
 0x2cc   :  { %1257 = vmatprep.subr.mxu0 %v1048_v25  ;;  %1100 = vmatpush2.msra.mxu1 %v1037_v36 }
 0x2cd   :  { %1258 = vmatpush2.msra.mxu0 %v1047_v26  ;;  %1101 = vmatprep.subr.mxu1 %v1036_v37 }
 0x2ce   :  { %1259 = vmatprep.subr.mxu0 %v1046_v27  ;;  %1102 = vmatpush2.msra.mxu1 %v1035_v38 }
 0x2cf   :  { %1260 = vmatpush2.msra.mxu0 %v1045_v28  ;;  %1103 = vmatprep.subr.mxu1 %v1034_v39 }
 0x2d0   :  { %1261 = vmatprep.subr.mxu0 %v1044_v29  ;;  %1104 = vmatpush2.msra.mxu1 %v1033_v42 }
 0x2d1   :  { %1262 = vmatpush2.msra.mxu0 %v1043_v30  ;;  %1105 = vmatprep.subr.mxu1 %v1032_v43 }
 0x2d2   :  { %1263 = vmatprep.subr.mxu0 %v1042_v31  ;;  %1106 = vmatpush2.msra.mxu1 %v1031_v45 }
 0x2d3   :  { %1264 = vmatpush2.msra.mxu0 %v1041_v32  ;;  %1107 = vmatprep.subr.mxu1 %v1030_v46 }
 0x2d4   :  { %1265 = vmatprep.subr.mxu0 %v1040_v33  ;;  %1108 = vmatpush2.msra.mxu1 %v1029_v47 }
 0x2d5   :  { %1266 = vmatpush2.msra.mxu0 %v1039_v34  ;;  %1109 = vmatprep.subr.mxu1 %v1028_v48 }
 0x2d6   :  { %1267 = vmatprep.subr.mxu0 %v1038_v35  ;;  %1110 = vmatpush2.msra.mxu1 %v1027_v51 }
 0x2d7   :  { %1268 = vmatpush2.msra.mxu0 %v1037_v36  ;;  %1111 = vmatprep.subr.mxu1 %v1026_v49 }
 0x2d8   :  { %1269 = vmatprep.subr.mxu0 %v1036_v37  ;;  %1112 = vmatpush2.msra.mxu1 %v1025_v52 }
 0x2d9   :  { %1270 = vmatpush2.msra.mxu0 %v1035_v38  ;;  %1113 = vmatprep.subr.mxu1 %v1024_v50 }
 0x2da   :  { %1271 = vmatprep.subr.mxu0 %v1034_v39  ;;  %1114 = vmatpush2.msra.mxu1 %v1023_v55 }
 0x2db   :  { %1272 = vmatpush2.msra.mxu0 %v1033_v42  ;;  %1115 = vmatprep.subr.mxu1 %v1022_v56 }
 0x2dc   :  { %1273 = vmatprep.subr.mxu0 %v1032_v43  ;;  %1116 = vmatpush2.msra.mxu1 %v1021_v53 }
 0x2dd   :  { %1274 = vmatpush2.msra.mxu0 %v1031_v45  ;;  %1117 = vmatprep.subr.mxu1 %v1020_v54 }
 0x2de   :  { %1275 = vmatprep.subr.mxu0 %v1030_v46  ;;  %1118 = vmatpush2.msra.mxu1 %v1019_v57 }
 0x2df   :  { %1276 = vmatpush2.msra.mxu0 %v1029_v47  ;;  %1119 = vmatprep.subr.mxu1 %v1018_v58 }
 0x2e0   :  { %1277 = vmatprep.subr.mxu0 %v1028_v48  ;;  %1120 = vmatpush2.msra.mxu1 %v1017_v59 }
 0x2e1   :  { %1278 = vmatpush2.msra.mxu0 %v1027_v51 }
 0x2e2   :  { %1279 = vmatprep.subr.mxu0 %v1026_v49 }
 0x2e3   :  { %1280 = vmatpush2.msra.mxu0 %v1025_v52 }
 0x2e4   :  { %1281 = vmatprep.subr.mxu0 %v1024_v50 }
 0x2e5   :  { %1282 = vmatpush2.msra.mxu0 %v1023_v55 }
 0x2e6   :  { %1283 = vmatprep.subr.mxu0 %v1022_v56 }
 0x2e7   :  { %1284 = vmatpush2.msra.mxu0 %v1021_v53 }
 0x2e8   :  { %1285 = vmatprep.subr.mxu0 %v1020_v54 }
 0x2e9   :  { %1286 = vmatpush2.msra.mxu0 %v1019_v57 }
 0x2ea   :  { %1287 = vmatprep.subr.mxu0 %v1018_v58 }
 0x2eb   :  { %1288 = vmatpush2.msra.mxu0 %v1017_v59 }
 0x34c   :  { %v695_v60 = vpop.f32.mrf.mxu0 }
 0x34e   :  { %v697_v61 = vpop.f32.mrf.mxu0  ;;  %v784_v63 = vpop.f32.mrf.mxu1 }
 0x34f   :  { %v785_v14 = vadd.f32 %v784_v63, %v695_v60 }
 0x350   :  { %v701_v62 = vpop.f32.mrf.mxu0  ;;  %v786_v2 = vpop.f32.mrf.mxu1 }
 0x351   :  { %v787_v17 = vadd.f32 %v786_v2, %v697_v61 }
 0x352   :  { %v703_v1 = vpop.f32.mrf.mxu0  ;;  %v790_v4 = vpop.f32.mrf.mxu1 }
 0x353   :  { %v791_v18 = vadd.f32 %v790_v4, %v701_v62 }
 0x354   :  { %v707_v3 = vpop.f32.mrf.mxu0  ;;  %v792_v7 = vpop.f32.mrf.mxu1 }
 0x355   :  { %v793_v22 = vadd.f32 %v792_v7, %v703_v1 }
 0x356   :  { %v709_v6 = vpop.f32.mrf.mxu0  ;;  %v796_v9 = vpop.f32.mrf.mxu1 }
 0x357   :  { %v797_v31 = vadd.f32 %v796_v9, %v707_v3 }
 0x358   :  { %v713_v8 = vpop.f32.mrf.mxu0  ;;  %v798_v15 = vpop.f32.mrf.mxu1 }
 0x359   :  { %v799_v37 = vadd.f32 %v798_v15, %v709_v6 }
 0x35a   :  { %v715_v10 = vpop.f32.mrf.mxu0  ;;  %v802_v26 = vpop.f32.mrf.mxu1 }
 0x35b   :  { %v803_v38 = vadd.f32 %v802_v26, %v713_v8 }
 0x35c   :  { %v804_v35 = vpop.f32.mrf.mxu1 }
 0x35d   :  { %v805_v46 = vadd.f32 %v804_v35, %v715_v10 }
 0x36c   :  { %v906_v11 = vpop.f32.mrf.mxu0 }
 0x36d   :  { %v929_v19 = vadd.f32 %v906_v11, %v785_v14 }
 0x36e   :  { %v908_v16 = vpop.f32.mrf.mxu0 }
 0x36f   :  { %v930_v23 = vadd.f32 %v908_v16, %v787_v17  ;;  %v3932_v28 = vadd.f32 %v942_v20, %v929_v19 }
 0x370   :  { %v912_v21 = vpop.f32.mrf.mxu0 }
 0x371   :  { %v931_v25 = vadd.f32 %v912_v21, %v791_v18  ;;  %v950_v32 = vadd.f32 %v946_v24, %v930_v23 }
 0x372   :  { %v914_v27 = vpop.f32.mrf.mxu0 }
 0x373   :  { %v3934_v40 = vadd.f32 %v942_v20, %v931_v25  ;;  %v932_v29 = vadd.f32 %v914_v27, %v793_v22 }
 0x374   :  { %v918_v30 = vpop.f32.mrf.mxu0 }
 0x375   :  { %v957_v33 = vadd.f32 %v3934_v40, %v3932_v28  ;;  %v952_v34 = vadd.f32 %v946_v24, %v932_v29  ;;  %v933_v42 = vadd.f32 %v918_v30, %v797_v31 }
 0x376   :  { %v920_v36 = vpop.f32.mrf.mxu0 }
 0x377   :  { %v964_v39 = vadd.f32 %v952_v34, %v950_v32  ;;  %v958_v43 = vrot.slane %v957_v33, 4  ;;  %v934_v48 = vadd.f32 %v920_v36, %v799_v37  ;;  %v953_v50 = vadd.f32 %v942_v20, %v933_v42 }
 0x378   :  { %v924_v45 = vpop.f32.mrf.mxu0 }
 0x379   :  { %v965_v47 = vrot.slane %v964_v39, 4  ;;  %v935_v51 = vadd.f32 %v924_v45, %v803_v38  ;;  %v959_v53 = vadd.f32 %v958_v43, %v957_v33  ;;  %v954_v54 = vadd.f32 %v946_v24, %v934_v48 }
 0x37a   :  { %v926_v49 = vpop.f32.mrf.mxu0 }
 0x37b   :  { %v966_v52 = vadd.f32 %v965_v47, %v964_v39  ;;  %v955_v55 = vadd.f32 %v942_v20, %v935_v51  ;;  %v936_v56 = vadd.f32 %v926_v49, %v805_v46  ;;  %v960_v62 = vrot.slane %v959_v53, 2 }
 0x37d   :  { %v971_v57 = vadd.f32 %v955_v55, %v953_v50  ;;  %v956_v58 = vadd.f32 %v946_v24, %v936_v56  ;;  %v967_v59 = vrot.slane %v966_v52, 2  ;;  %v961_v6 = vadd.f32 %v960_v62, %v959_v53 }
 0x37f   :  { %v972_v60 = vrot.slane %v971_v57, 4  ;;  %v978_v61 = vadd.f32 %v956_v58, %v954_v54  ;;  %v968_v4 = vadd.f32 %v967_v59, %v966_v52  ;;  %v962_v12 = vrot.slane %v961_v6, 1 }
 0x381   :  { %v973_v63 = vadd.f32 %v972_v60, %v971_v57  ;;  %v979_v1 = vrot.slane %v978_v61, 4  ;;  %v969_v10 = vrot.slane %v968_v4, 1  ;;  %v963_v18 = vadd.f32 %v962_v12, %v961_v6 }
 0x383   :  { %v974_v2 = vrot.slane %v973_v63, 2  ;;  %v980_v3 = vadd.f32 %v979_v1, %v978_v61  ;;  %v970_v16 = vadd.f32 %v969_v10, %v968_v4 }
 0x385   :  { %v975_v7 = vadd.f32 %v974_v2, %v973_v63  ;;  %v981_v8 = vrot.slane %v980_v3, 2 }
 0x387   :  { %v976_v9 = vrot.slane %v975_v7, 1  ;;  %v982_v11 = vadd.f32 %v981_v8, %v980_v3 }
 0x389   :  { %v983_v14 = vrot.slane %v982_v11, 1  ;;  %v977_v15 = vadd.f32 %v976_v9, %v975_v7 }
 0x38b   :  { %v984_v17 = vadd.f32 %v983_v14, %v982_v11  ;;  %v1053_v20 = vsel %vm244_vm1, %v977_v15, %v963_v18 }
 0x38d   :  { %v1054_v19 = vsel %vm244_vm1, %v984_v17, %v970_v16 }
 0x38e   :  { %1121 = vmatprep.mubr.f32.mxu1 %v1054_v19  ;;  %v1665_v19 = vld [vmem:[#allocation16 + $0x2f8] sm:$0xff] }
 0x38f   :  { %1122 = vmatmul.mubr.f32.vlgmr.msra.gmra.mxu1 %v1053_v20  ;;  %1698 = vmatprep.subr.mxu1 %v1665_v19  ;;  %v1664_v20 = vld [vmem:[#allocation16 + $0x2f0] sm:$0xff]  ;;  %v1638_v19 = vld [vmem:[#allocation16 + $0x220] sm:$0xff] }
 0x390   :  { %1699 = vmatpush1.msra.mxu1 %v1664_v20  ;;  %v1576_v20 = vld [vmem:[#allocation16 + $0x38] sm:$0xff] }
 0x44f   :  { %v1123_v21 = vpop.f32.mrf.mxu1 }
 0x451   :  { %v1125_v22 = vpop.f32.mrf.mxu1 }
 0x452   :  { %v1130_v23 = vcombine.low %v1123_v21, %v1125_v22  ;;  %v1663_v21 = vld [vmem:[#allocation16 + $0x2e8] sm:$0xff]  ;;  %v1662_v22 = vld [vmem:[#allocation16 + $0x2e0] sm:$0xff] }
 0x453   :  { %1700 = vmatprep.subr.mxu1 %v1663_v21  ;;  %v1637_v21 = vld [vmem:[#allocation16 + $0x218] sm:$0xff] }
 0x454   :  { %v1137_v24 = vrot.slane %v1130_v23, %v3646_v41  ;;  %v1600_v23 = vld [vmem:[#allocation16 + $0xf8] sm:$0xff]  ;;  %1701 = vmatpush1.msra.mxu1 %v1662_v22  ;;  %v1575_v22 = vld [vmem:[#allocation16 + $0x30] sm:$0xff] }
 0x455   :  { %1787 = vmatprep.subr.mxu0 %v1600_v23  ;;  %v1636_v23 = vld [vmem:[#allocation16 + $0x210] sm:$0xff] }
 0x456   :  { %v1138_v25 = vcombine.high %v1137_v24, %v1137_v24  ;;  %v1145_v26 = vrot.slane %v1137_v24, %v3646_v41  ;;  %v1661_v24 = vld [vmem:[#allocation16 + $0x2d8] sm:$0xff] }
 0x457   :  { %1702 = vmatprep.subr.mxu1 %v1661_v24  ;;  %v1574_v24 = vld [vmem:[#allocation16 + $0x28] sm:$0xff] }
 0x458   :  { %v1152_v27 = vrot.slane %v1138_v25, %v3646_v41  ;;  %v1156_v29 = vrot.slane %v1145_v26, %v3650_v44  ;;  %v1160_v30 = vrot.slane %v1145_v26, %v3928_v13  ;;  %v1599_v25 = vld [vmem:[#allocation16 + $0xf0] sm:$0xff] }
 0x459   :  { %v1660_v26 = vld [vmem:[#allocation16 + $0x2d0] sm:$0xff] }
 0x45a   :  { %v1164_v31 = vrot.slane %v1152_v27, %v3650_v44  ;;  %v1168_v33 = vrot.slane %v1152_v27, %v3928_v13  ;;  %v3948_v35 = vsub.f32 %v3932_v28, %v1156_v29  ;;  %v3950_v36 = vsub.f32 %v950_v32, %v1160_v30  ;;  %v1598_v27 = vld [vmem:[#allocation16 + $0xe8] sm:$0xff]  ;;  %1703 = vmatpush1.msra.mxu1 %v1660_v26  ;;  %v1573_v26 = vld [vmem:[#allocation16 + $0x20] sm:$0xff] }
 0x45b   :  { %v3953_v37 = vsub.f32 %v3934_v40, %v1156_v29  ;;  %v3955_v38 = vsub.f32 %v952_v34, %v1160_v30  ;;  %v1659_v29 = vld [vmem:[#allocation16 + $0x2c8] sm:$0xff]  ;;  %v1597_v30 = vld [vmem:[#allocation16 + $0xe0] sm:$0xff] }
 0x45c   :  { %v3957_v39 = vsub.f32 %v953_v50, %v1164_v31  ;;  %v3959_v42 = vsub.f32 %v954_v54, %v1168_v33  ;;  %v3961_v43 = vsub.f32 %v955_v55, %v1164_v31  ;;  %v3963_v45 = vsub.f32 %v956_v58, %v1168_v33  ;;  %1704 = vmatprep.subr.mxu1 %v1659_v29  ;;  %v1658_v31 = vld [vmem:[#allocation16 + $0x2c0] sm:$0xff]  ;;  %v1596_v33 = vld [vmem:[#allocation16 + $0xd8] sm:$0xff] }
 0x45d   :  { %v1181_v46 = vmul.f32 %v3948_v35, %v3948_v35  ;;  %v1182_v28 = vmul.f32 %v3950_v36, %v3950_v36  ;;  %v1183_v40 = vmul.f32 %v3953_v37, %v3953_v37  ;;  %v1184_v32 = vmul.f32 %v3955_v38, %v3955_v38  ;;  %1705 = vmatpush1.msra.mxu1 %v1658_v31  ;;  %v1572_v29 = vld [vmem:[#allocation16 + $0x18] sm:$0xff]  ;;  %v1571_v31 = vld [vmem:[#allocation16 + $0x10] sm:$0xff] }
 0x45e   :  { %v1185_v34 = vmul.f32 %v3957_v39, %v3957_v39  ;;  %v1186_v47 = vmul.f32 %v3959_v42, %v3959_v42  ;;  %v1187_v48 = vmul.f32 %v3961_v43, %v3961_v43  ;;  %v1188_v51 = vmul.f32 %v3963_v45, %v3963_v45 }
 0x45f   :  { %v1189_v49 = vadd.f32 %v1183_v40, %v1181_v46  ;;  %v1196_v52 = vadd.f32 %v1184_v32, %v1182_v28  ;;  %v1657_v46 = vld [vmem:[#allocation16 + $0x2b8] sm:$0xff]  ;;  %v1595_v28 = vld [vmem:[#allocation16 + $0xd0] sm:$0xff]  ;;  %v1594_v32 = vld [vmem:[#allocation16 + $0xc8] sm:$0xff] }
 0x460   :  { %v1203_v50 = vadd.f32 %v1187_v48, %v1185_v34  ;;  %v1210_v55 = vadd.f32 %v1188_v51, %v1186_v47  ;;  %1706 = vmatprep.subr.mxu1 %v1657_v46  ;;  %v1656_v40 = vld [vmem:[#allocation16 + $0x2b0] sm:$0xff]  ;;  %v1655_v34 = vld [vmem:[#allocation16 + $0x2a8] sm:$0xff]  ;;  %v1593_v47 = vld [vmem:[#allocation16 + $0xc0] sm:$0xff] }
 0x461   :  { %v1190_v56 = vrot.slane %v1189_v49, 4  ;;  %v1197_v53 = vrot.slane %v1196_v52, 4  ;;  %1707 = vmatpush1.msra.mxu1 %v1656_v40  ;;  %v1654_v48 = vld [vmem:[#allocation16 + $0x2a0] sm:$0xff]  ;;  %v1592_v51 = vld [vmem:[#allocation16 + $0xb8] sm:$0xff]  ;;  %v1570_v46 = vld [vmem:[#allocation16 + $0x8] sm:$0xff] }
 0x462   :  { %v1211_v54 = vrot.slane %v1210_v55, 4  ;;  %v1204_v57 = vrot.slane %v1203_v50, 4  ;;  %1708 = vmatprep.subr.mxu1 %v1655_v34  ;;  %v1569_v40 = vld [vmem:[#allocation16] sm:$0xff]  ;;  %v1632_v34 = vld [vmem:[#allocation16 + $0x1f8] sm:$0xff] }
 0x463   :  { %v1198_v58 = vadd.f32 %v1197_v53, %v1196_v52  ;;  %v1191_v59 = vadd.f32 %v1190_v56, %v1189_v49  ;;  %1709 = vmatpush1.msra.mxu1 %v1654_v48  ;;  %v1653_v49 = vld [vmem:[#allocation16 + $0x298] sm:$0xff]  ;;  %v1591_v52 = vld [vmem:[#allocation16 + $0xb0] sm:$0xff]  ;;  %v1651_v56 = vld [vmem:[#allocation16 + $0x288] sm:$0xff] }
 0x464   :  { %v1212_v60 = vadd.f32 %v1211_v54, %v1210_v55  ;;  %v1205_v61 = vadd.f32 %v1204_v57, %v1203_v50  ;;  %1710 = vmatprep.subr.mxu1 %v1653_v49  ;;  %v1652_v50 = vld [vmem:[#allocation16 + $0x290] sm:$0xff]  ;;  %v1590_v55 = vld [vmem:[#allocation16 + $0xa8] sm:$0xff]  ;;  %v1589_v53 = vld [vmem:[#allocation16 + $0xa0] sm:$0xff] }
 0x465   :  { %v1199_v62 = vrot.slane %v1198_v58, 2  ;;  %v1192_v63 = vrot.slane %v1191_v59, 2  ;;  %1711 = vmatpush1.msra.mxu1 %v1652_v50  ;;  %v1650_v54 = vld [vmem:[#allocation16 + $0x280] sm:$0xff]  ;;  %v1588_v57 = vld [vmem:[#allocation16 + $0x98] sm:$0xff]  ;;  %v1631_v48 = vld [vmem:[#allocation16 + $0x1f0] sm:$0xff] }
 0x466   :  { %v1213_v1 = vrot.slane %v1212_v60, 2  ;;  %v1206_v2 = vrot.slane %v1205_v61, 2  ;;  %1712 = vmatprep.subr.mxu1 %v1651_v56  ;;  %v1630_v49 = vld [vmem:[#allocation16 + $0x1e8] sm:$0xff]  ;;  %v1629_v50 = vld [vmem:[#allocation16 + $0x1e0] sm:$0xff]  ;;  %v1628_v56 = vld [vmem:[#allocation16 + $0x1d8] sm:$0xff] }
 0x467   :  { %v1200_v3 = vadd.f32 %v1199_v62, %v1198_v58  ;;  %v1193_v4 = vadd.f32 %v1192_v63, %v1191_v59  ;;  %v1649_v58 = vld [vmem:[#allocation16 + $0x278] sm:$0xff]  ;;  %v1587_v59 = vld [vmem:[#allocation16 + $0x90] sm:$0xff]  ;;  %1713 = vmatpush1.msra.mxu1 %v1650_v54  ;;  %v1647_v62 = vld [vmem:[#allocation16 + $0x268] sm:$0xff] }
 0x468   :  { %v1214_v6 = vadd.f32 %v1213_v1, %v1212_v60  ;;  %v1207_v7 = vadd.f32 %v1206_v2, %v1205_v61  ;;  %v1648_v60 = vld [vmem:[#allocation16 + $0x270] sm:$0xff]  ;;  %v1586_v61 = vld [vmem:[#allocation16 + $0x88] sm:$0xff]  ;;  %1714 = vmatprep.subr.mxu1 %v1649_v58  ;;  %v1585_v63 = vld [vmem:[#allocation16 + $0x80] sm:$0xff] }
 0x469   :  { %v1201_v8 = vrot.slane %v1200_v3, 1  ;;  %v1194_v9 = vrot.slane %v1193_v4, 1  ;;  %v1646_v1 = vld [vmem:[#allocation16 + $0x260] sm:$0xff]  ;;  %v1584_v2 = vld [vmem:[#allocation16 + $0x78] sm:$0xff]  ;;  %1715 = vmatpush1.msra.mxu1 %v1648_v60  ;;  %v1627_v54 = vld [vmem:[#allocation16 + $0x1d0] sm:$0xff] }
 0x46a   :  { %v1215_v10 = vrot.slane %v1214_v6, 1  ;;  %v1208_v11 = vrot.slane %v1207_v7, 1  ;;  %1716 = vmatprep.subr.mxu1 %v1647_v62  ;;  %v1626_v58 = vld [vmem:[#allocation16 + $0x1c8] sm:$0xff]  ;;  %v1625_v60 = vld [vmem:[#allocation16 + $0x1c0] sm:$0xff]  ;;  %v1624_v62 = vld [vmem:[#allocation16 + $0x1b8] sm:$0xff] }
 0x46b   :  { %v1202_v12 = vadd.f32 %v1201_v8, %v1200_v3  ;;  %v1195_v15 = vadd.f32 %v1194_v9, %v1193_v4  ;;  %v1645_v3 = vld [vmem:[#allocation16 + $0x258] sm:$0xff]  ;;  %v1583_v4 = vld [vmem:[#allocation16 + $0x70] sm:$0xff]  ;;  %1717 = vmatpush1.msra.mxu1 %v1646_v1  ;;  %v1643_v8 = vld [vmem:[#allocation16 + $0x248] sm:$0xff] }
 0x46c   :  { %v1216_v14 = vadd.f32 %v1215_v10, %v1214_v6  ;;  %v1209_v16 = vadd.f32 %v1208_v11, %v1207_v7  ;;  %v1644_v6 = vld [vmem:[#allocation16 + $0x250] sm:$0xff]  ;;  %v1582_v7 = vld [vmem:[#allocation16 + $0x68] sm:$0xff]  ;;  %v1581_v9 = vld [vmem:[#allocation16 + $0x60] sm:$0xff]  ;;  %1718 = vmatprep.subr.mxu1 %v1645_v3 }
 0x46d   :  { %v1642_v10 = vld [vmem:[#allocation16 + $0x240] sm:$0xff]  ;;  %v1580_v11 = vld [vmem:[#allocation16 + $0x58] sm:$0xff]  ;;  %1719 = vmatpush1.msra.mxu1 %v1644_v6  ;;  %v1623_v1 = vld [vmem:[#allocation16 + $0x1b0] sm:$0xff] }
 0x46e   :  { %v1222_v17 = vsel %vm244_vm1, %v1216_v14, %v1202_v12  ;;  %v1221_v18 = vsel %vm244_vm1, %v1209_v16, %v1195_v15  ;;  %v1641_v12 = vld [vmem:[#allocation16 + $0x238] sm:$0xff]  ;;  %v1579_v14 = vld [vmem:[#allocation16 + $0x50] sm:$0xff]  ;;  %1720 = vmatprep.subr.mxu1 %v1643_v8  ;;  %v1578_v16 = vld [vmem:[#allocation16 + $0x48] sm:$0xff] }
 0x46f   :  { %1289 = vmatprep.mubr.f32.mxu0 %v1222_v17  ;;  %v1640_v15 = vld [vmem:[#allocation16 + $0x230] sm:$0xff]  ;;  %1721 = vmatpush1.msra.mxu1 %v1642_v10  ;;  %v1639_v17 = vld [vmem:[#allocation16 + $0x228] sm:$0xff]  ;;  %v1621_v6 = vld [vmem:[#allocation16 + $0x1a0] sm:$0xff] }
 0x470   :  { %1290 = vmatmul.mubr.f32.vlgmr.msra.gmra.mxu0 %v1221_v18  ;;  %v1577_v18 = vld [vmem:[#allocation16 + $0x40] sm:$0xff]  ;;  %1722 = vmatprep.subr.mxu1 %v1641_v12  ;;  %v1622_v3 = vld [vmem:[#allocation16 + $0x1a8] sm:$0xff]  ;;  %v1620_v8 = vld [vmem:[#allocation16 + $0x198] sm:$0xff] }
 0x471   :  { %1788 = vmatpush1.msra.mxu0 %v1599_v25  ;;  %1723 = vmatpush1.msra.mxu1 %v1640_v15  ;;  %v1635_v25 = vld [vmem:[#allocation16 + $0x208] sm:$0xff]  ;;  %v1619_v10 = vld [vmem:[#allocation16 + $0x190] sm:$0xff]  ;;  %v1617_v15 = vld [vmem:[#allocation16 + $0x180] sm:$0xff] }
 0x472   :  { %1789 = vmatprep.subr.mxu0 %v1598_v27  ;;  %1724 = vmatprep.subr.mxu1 %v1639_v17  ;;  %v1634_v27 = vld [vmem:[#allocation16 + $0x200] sm:$0xff]  ;;  %v1618_v12 = vld [vmem:[#allocation16 + $0x188] sm:$0xff]  ;;  %v1616_v17 = vld [vmem:[#allocation16 + $0x178] sm:$0xff] }
 0x473   :  { %1790 = vmatpush1.msra.mxu0 %v1597_v30  ;;  %1725 = vmatpush1.msra.mxu1 %v1638_v19  ;;  %v1697_v30 = vld [vmem:[#allocation16 + $0x3f8] sm:$0xff]  ;;  %v1615_v19 = vld [vmem:[#allocation16 + $0x170] sm:$0xff] }
 0x474   :  { %1791 = vmatprep.subr.mxu0 %v1596_v33  ;;  %1726 = vmatprep.subr.mxu1 %v1637_v21  ;;  %v1696_v33 = vld [vmem:[#allocation16 + $0x3f0] sm:$0xff]  ;;  %v1614_v21 = vld [vmem:[#allocation16 + $0x168] sm:$0xff] }
 0x475   :  { %1792 = vmatpush1.msra.mxu0 %v1595_v28  ;;  %1727 = vmatpush1.msra.mxu1 %v1636_v23  ;;  %v1695_v28 = vld [vmem:[#allocation16 + $0x3e8] sm:$0xff]  ;;  %v1613_v23 = vld [vmem:[#allocation16 + $0x160] sm:$0xff] }
 0x476   :  { %1793 = vmatprep.subr.mxu0 %v1594_v32  ;;  %1728 = vmatprep.subr.mxu1 %v1635_v25  ;;  %v1694_v32 = vld [vmem:[#allocation16 + $0x3e0] sm:$0xff]  ;;  %v1612_v25 = vld [vmem:[#allocation16 + $0x158] sm:$0xff] }
 0x477   :  { %1794 = vmatpush1.msra.mxu0 %v1593_v47  ;;  %1729 = vmatpush1.msra.mxu1 %v1634_v27  ;;  %v1693_v47 = vld [vmem:[#allocation16 + $0x3d8] sm:$0xff]  ;;  %v1611_v27 = vld [vmem:[#allocation16 + $0x150] sm:$0xff] }
 0x478   :  { %1795 = vmatprep.subr.mxu0 %v1592_v51  ;;  %1730 = vmatprep.subr.mxu1 %v1697_v30  ;;  %v1692_v51 = vld [vmem:[#allocation16 + $0x3d0] sm:$0xff]  ;;  %v1610_v30 = vld [vmem:[#allocation16 + $0x148] sm:$0xff] }
 0x479   :  { %1796 = vmatpush1.msra.mxu0 %v1591_v52  ;;  %1731 = vmatpush2.msra.mxu1 %v1696_v33  ;;  %v1691_v52 = vld [vmem:[#allocation16 + $0x3c8] sm:$0xff]  ;;  %v1609_v33 = vld [vmem:[#allocation16 + $0x140] sm:$0xff] }
 0x47a   :  { %1797 = vmatprep.subr.mxu0 %v1590_v55  ;;  %1732 = vmatprep.subr.mxu1 %v1695_v28  ;;  %v1690_v55 = vld [vmem:[#allocation16 + $0x3c0] sm:$0xff]  ;;  %v1608_v28 = vld [vmem:[#allocation16 + $0x138] sm:$0xff] }
 0x47b   :  { %1798 = vmatpush1.msra.mxu0 %v1589_v53  ;;  %1733 = vmatpush2.msra.mxu1 %v1694_v32  ;;  %v1689_v53 = vld [vmem:[#allocation16 + $0x3b8] sm:$0xff]  ;;  %v1607_v32 = vld [vmem:[#allocation16 + $0x130] sm:$0xff] }
 0x47c   :  { %1799 = vmatprep.subr.mxu0 %v1588_v57  ;;  %1734 = vmatprep.subr.mxu1 %v1693_v47  ;;  %v1688_v57 = vld [vmem:[#allocation16 + $0x3b0] sm:$0xff]  ;;  %v1606_v47 = vld [vmem:[#allocation16 + $0x128] sm:$0xff] }
 0x47d   :  { %1800 = vmatpush1.msra.mxu0 %v1587_v59  ;;  %1735 = vmatpush2.msra.mxu1 %v1692_v51  ;;  %v1687_v59 = vld [vmem:[#allocation16 + $0x3a8] sm:$0xff]  ;;  %v1605_v51 = vld [vmem:[#allocation16 + $0x120] sm:$0xff] }
 0x47e   :  { %1801 = vmatprep.subr.mxu0 %v1586_v61  ;;  %1736 = vmatprep.subr.mxu1 %v1691_v52  ;;  %v1686_v61 = vld [vmem:[#allocation16 + $0x3a0] sm:$0xff]  ;;  %v1604_v52 = vld [vmem:[#allocation16 + $0x118] sm:$0xff] }
 0x47f   :  { %1802 = vmatpush1.msra.mxu0 %v1585_v63  ;;  %1737 = vmatpush2.msra.mxu1 %v1690_v55  ;;  %v1685_v63 = vld [vmem:[#allocation16 + $0x398] sm:$0xff] }
 0x480   :  { %1803 = vmatprep.subr.mxu0 %v1584_v2  ;;  %1738 = vmatprep.subr.mxu1 %v1689_v53  ;;  %v1684_v2 = vld [vmem:[#allocation16 + $0x390] sm:$0xff]  ;;  %v1908_v55 = vld [vmem:[#allocation16 + $0x4f8] sm:$0xff]  ;;  %v1601_v53 = vld [vmem:[#allocation16 + $0x100] sm:$0xff] }
 0x481   :  { %1804 = vmatpush1.msra.mxu0 %v1583_v4  ;;  %1739 = vmatpush2.msra.mxu1 %v1688_v57  ;;  %v1683_v4 = vld [vmem:[#allocation16 + $0x388] sm:$0xff] }
 0x482   :  { %1805 = vmatprep.subr.mxu0 %v1582_v7  ;;  %1740 = vmatprep.subr.mxu1 %v1687_v59  ;;  %v1682_v7 = vld [vmem:[#allocation16 + $0x380] sm:$0xff] }
 0x483   :  { %1806 = vmatpush1.msra.mxu0 %v1581_v9  ;;  %1741 = vmatpush2.msra.mxu1 %v1686_v61  ;;  %v1681_v9 = vld [vmem:[#allocation16 + $0x378] sm:$0xff] }
 0x484   :  { %1807 = vmatprep.subr.mxu0 %v1580_v11  ;;  %1742 = vmatprep.subr.mxu1 %v1685_v63  ;;  %v1680_v11 = vld [vmem:[#allocation16 + $0x370] sm:$0xff] }
 0x485   :  { %1808 = vmatpush1.msra.mxu0 %v1579_v14  ;;  %1743 = vmatpush2.msra.mxu1 %v1684_v2  ;;  %v1679_v14 = vld [vmem:[#allocation16 + $0x368] sm:$0xff]  ;;  %v1391_v63 = vld [vmem:[#allocation2] sm:$0x3] }
 0x486   :  { %1809 = vmatprep.subr.mxu0 %v1578_v16  ;;  %1744 = vmatprep.subr.mxu1 %v1683_v4  ;;  %v1678_v16 = vld [vmem:[#allocation16 + $0x360] sm:$0xff]  ;;  %v1425_v4 = vld [vmem:[#allocation5] sm:$0x3] }
 0x487   :  { %1810 = vmatpush1.msra.mxu0 %v1577_v18  ;;  %1745 = vmatpush2.msra.mxu1 %v1682_v7  ;;  %v1677_v18 = vld [vmem:[#allocation16 + $0x358] sm:$0xff]  ;;  %v1393_v7 = vadd.f32 1.0, %v1391_v63 }
 0x488   :  { %1811 = vmatprep.subr.mxu0 %v1576_v20  ;;  %1746 = vmatprep.subr.mxu1 %v1681_v9  ;;  %v1676_v20 = vld [vmem:[#allocation16 + $0x350] sm:$0xff] }
 0x489   :  { %1812 = vmatpush1.msra.mxu0 %v1575_v22  ;;  %1747 = vmatpush2.msra.mxu1 %v1680_v11  ;;  %v1675_v22 = vld [vmem:[#allocation16 + $0x348] sm:$0xff] }
 0x48a   :  { %1813 = vmatprep.subr.mxu0 %v1574_v24  ;;  %1748 = vmatprep.subr.mxu1 %v1679_v14  ;;  %v1674_v24 = vld [vmem:[#allocation16 + $0x340] sm:$0xff] }
 0x48b   :  { %1814 = vmatpush1.msra.mxu0 %v1573_v26  ;;  %1749 = vmatpush2.msra.mxu1 %v1678_v16  ;;  %v1673_v26 = vld [vmem:[#allocation16 + $0x338] sm:$0xff]  ;;  %v1432_v16 = vrot.slane %v1425_v4, %v3650_v44 }
 0x48c   :  { %1815 = vmatprep.subr.mxu0 %v1572_v29  ;;  %1750 = vmatprep.subr.mxu1 %v1677_v18  ;;  %v1672_v29 = vld [vmem:[#allocation16 + $0x330] sm:$0xff] }
 0x48d   :  { %1816 = vmatpush1.msra.mxu0 %v1571_v31  ;;  %1751 = vmatpush2.msra.mxu1 %v1676_v20  ;;  %v1671_v31 = vld [vmem:[#allocation16 + $0x328] sm:$0xff] }
 0x48e   :  { %1817 = vmatprep.subr.mxu0 %v1570_v46  ;;  %1752 = vmatprep.subr.mxu1 %v1675_v22  ;;  %v1670_v46 = vld [vmem:[#allocation16 + $0x320] sm:$0xff]  ;;  %v1404_v22 = vrot.slane %v1393_v7, %v3928_v13 }
 0x48f   :  { %1818 = vmatpush1.msra.mxu0 %v1569_v40  ;;  %1753 = vmatpush2.msra.mxu1 %v1674_v24  ;;  %v1669_v40 = vld [vmem:[#allocation16 + $0x318] sm:$0xff] }
 0x490   :  { %1819 = vmatprep.subr.mxu0 %v1632_v34  ;;  %1754 = vmatprep.subr.mxu1 %v1673_v26  ;;  %v1668_v34 = vld [vmem:[#allocation16 + $0x310] sm:$0xff] }
 0x491   :  { %1820 = vmatpush2.msra.mxu0 %v1631_v48  ;;  %1755 = vmatpush2.msra.mxu1 %v1672_v29  ;;  %v1667_v48 = vld [vmem:[#allocation16 + $0x308] sm:$0xff] }
 0x492   :  { %1821 = vmatprep.subr.mxu0 %v1630_v49  ;;  %1756 = vmatprep.subr.mxu1 %v1671_v31  ;;  %v1666_v49 = vld [vmem:[#allocation16 + $0x300] sm:$0xff] }
 0x493   :  { %1822 = vmatpush2.msra.mxu0 %v1629_v50  ;;  %1757 = vmatpush2.msra.mxu1 %v1670_v46  ;;  %v1603_v50 = vld [vmem:[#allocation16 + $0x110] sm:$0xff] }
 0x494   :  { %1823 = vmatprep.subr.mxu0 %v1628_v56  ;;  %1758 = vmatprep.subr.mxu1 %v1669_v40  ;;  %v1602_v56 = vld [vmem:[#allocation16 + $0x108] sm:$0xff] }
 0x495   :  { %1824 = vmatpush2.msra.mxu0 %v1627_v54  ;;  %1759 = vmatpush2.msra.mxu1 %v1668_v34 }
 0x496   :  { %1825 = vmatprep.subr.mxu0 %v1626_v58  ;;  %1760 = vmatprep.subr.mxu1 %v1667_v48 }
 0x497   :  { %1826 = vmatpush2.msra.mxu0 %v1625_v60  ;;  %1761 = vmatpush2.msra.mxu1 %v1666_v49 }
 0x498   :  { %1827 = vmatprep.subr.mxu0 %v1624_v62  ;;  %1941 = vmatprep.subr.mxu1 %v1908_v55 }
 0x499   :  { %1828 = vmatpush2.msra.mxu0 %v1623_v1  ;;  %v1351_v1 = vld [vmem:[#allocation13] sm:$0x3] }
 0x49a   :  { %1829 = vmatprep.subr.mxu0 %v1622_v3  ;;  %v1371_v3 = vld [vmem:[#allocation14] sm:$0x3]  ;;  %v1360_v11 = vrot.slane %v1351_v1, %v3928_v13 }
 0x49b   :  { %1830 = vmatpush2.msra.mxu0 %v1621_v6  ;;  %v1392_v6 = vld [vmem:[#allocation2 + $0x2] sm:$0x3]  ;;  %v1376_v14 = vrot.slane %v1371_v3, %v3650_v44 }
 0x49c   :  { %1831 = vmatprep.subr.mxu0 %v1620_v8 }
 0x49d   :  { %1832 = vmatpush2.msra.mxu0 %v1619_v10  ;;  %v1356_v10 = vrot.slane %v1351_v1, %v3650_v44 }
 0x49e   :  { %1833 = vmatprep.subr.mxu0 %v1618_v12  ;;  %v1426_v12 = vld [vmem:[#allocation5 + $0x2] sm:$0x3] }
 0x49f   :  { %1834 = vmatpush2.msra.mxu0 %v1617_v15  ;;  %v1380_v15 = vrot.slane %v1371_v3, %v3928_v13  ;;  %v1444_v24 = vrot.slane %v1426_v12, %v3928_v13 }
 0x4a0   :  { %1835 = vmatprep.subr.mxu0 %v1616_v17  ;;  %v1394_v17 = vadd.f32 1.0, %v1392_v6 }
 0x4a1   :  { %1836 = vmatpush2.msra.mxu0 %v1615_v19  ;;  %v1436_v19 = vrot.slane %v1425_v4, %v3928_v13 }
 0x4a2   :  { %1837 = vmatprep.subr.mxu0 %v1614_v21 }
 0x4a3   :  { %1838 = vmatpush2.msra.mxu0 %v1613_v23  ;;  %v1400_v23 = vrot.slane %v1393_v7, %v3650_v44 }
 0x4a4   :  { %1839 = vmatprep.subr.mxu0 %v1612_v25  ;;  %v1440_v25 = vrot.slane %v1426_v12, %v3650_v44 }
 0x4a5   :  { %1840 = vmatpush2.msra.mxu0 %v1611_v27 }
 0x4a6   :  { %1841 = vmatprep.subr.mxu0 %v1610_v30 }
 0x4a7   :  { %1842 = vmatpush2.msra.mxu0 %v1609_v33  ;;  %v1412_v33 = vrot.slane %v1394_v17, %v3928_v13 }
 0x4a8   :  { %1843 = vmatprep.subr.mxu0 %v1608_v28  ;;  %v1408_v28 = vrot.slane %v1394_v17, %v3650_v44 }
 0x4a9   :  { %1844 = vmatpush2.msra.mxu0 %v1607_v32 }
 0x4aa   :  { %1845 = vmatprep.subr.mxu0 %v1606_v47 }
 0x4ab   :  { %1846 = vmatpush2.msra.mxu0 %v1605_v51 }
 0x4ac   :  { %1847 = vmatprep.subr.mxu0 %v1604_v52 }
 0x4ad   :  { %1848 = vmatpush2.msra.mxu0 %v1603_v50 }
 0x4ae   :  { %1849 = vmatprep.subr.mxu0 %v1602_v56 }
 0x4af   :  { %1850 = vmatpush2.msra.mxu0 %v1601_v53 }
 0x530   :  { %v1291_v54 = vpop.f32.mrf.mxu0 }
 0x531   :  { %v1292_v57 = vadd.f32 1e-05, %v1291_v54 }
 0x532   :  { %v1293_v58 = vpop.f32.mrf.mxu0 }
 0x533   :  { %v1294_v59 = vadd.f32 1e-05, %v1293_v58  ;;  %3086 = vrsqrt.f32 %v1292_v57 }
 0x535   :  { %3088 = vrsqrt.f32 %v1294_v59 }
 0x540   :  { %v3087_v60 = vpop.eup %3086 }
 0x542   :  { %v3089_v61 = vpop.eup %3088 }
 0x543   :  { %v1300_v62 = vcombine.low %v3087_v60, %v3089_v61 }
 0x545   :  { %v1307_v2 = vrot.slane %v1300_v62, %v3646_v41 }
 0x547   :  { %v1308_v8 = vcombine.high %v1307_v2, %v1307_v2  ;;  %v1315_v9 = vrot.slane %v1307_v2, %v3646_v41 }
 0x549   :  { %v1330_v18 = vrot.slane %v1315_v9, %v3928_v13  ;;  %v1326_v20 = vrot.slane %v1315_v9, %v3650_v44  ;;  %v1322_v21 = vrot.slane %v1308_v8, %v3646_v41 }
 0x54b   :  { %v1344_v26 = vmul.f32 %v1330_v18, %v3950_v36  ;;  %v1343_v27 = vmul.f32 %v1326_v20, %v3948_v35  ;;  %v1346_v29 = vmul.f32 %v1330_v18, %v3955_v38  ;;  %v1345_v30 = vmul.f32 %v1326_v20, %v3953_v37 }
 0x54c   :  { %v1338_v31 = vrot.slane %v1322_v21, %v3928_v13  ;;  %v1334_v46 = vrot.slane %v1322_v21, %v3650_v44 }
 0x54d   :  { %v1364_v40 = vmul.f32 %v1360_v11, %v1344_v26  ;;  %v1363_v32 = vmul.f32 %v1356_v10, %v1343_v27  ;;  %v1366_v34 = vmul.f32 %v1360_v11, %v1346_v29  ;;  %v1365_v47 = vmul.f32 %v1356_v10, %v1345_v30 }
 0x54e   :  { %v1348_v36 = vmul.f32 %v1338_v31, %v3959_v42  ;;  %v1347_v35 = vmul.f32 %v1334_v46, %v3957_v39  ;;  %v1350_v38 = vmul.f32 %v1338_v31, %v3963_v45  ;;  %v1349_v37 = vmul.f32 %v1334_v46, %v3961_v43 }
 0x54f   :  { %v1384_v48 = vadd.f32 %v1380_v15, %v1364_v40  ;;  %v1383_v51 = vadd.f32 %v1376_v14, %v1363_v32  ;;  %v1386_v49 = vadd.f32 %v1380_v15, %v1366_v34  ;;  %v1385_v52 = vadd.f32 %v1376_v14, %v1365_v47 }
 0x550   :  { %v1368_v50 = vmul.f32 %v1360_v11, %v1348_v36  ;;  %v1367_v55 = vmul.f32 %v1356_v10, %v1347_v35  ;;  %v1370_v56 = vmul.f32 %v1360_v11, %v1350_v38  ;;  %v1369_v53 = vmul.f32 %v1356_v10, %v1349_v37 }
 0x551   :  { %v1418_v54 = vmul.f32 %v1404_v22, %v1384_v48  ;;  %v1417_v57 = vmul.f32 %v1400_v23, %v1383_v51  ;;  %v1420_v58 = vmul.f32 %v1404_v22, %v1386_v49  ;;  %v1419_v59 = vmul.f32 %v1400_v23, %v1385_v52 }
 0x552   :  { %v1388_v60 = vadd.f32 %v1380_v15, %v1368_v50  ;;  %v1387_v42 = vadd.f32 %v1376_v14, %v1367_v55  ;;  %v1390_v61 = vadd.f32 %v1380_v15, %v1370_v56  ;;  %v1389_v39 = vadd.f32 %v1376_v14, %v1369_v53  ;;  %v1907_v56 = vld [vmem:[#allocation16 + $0x4f0] sm:$0xff] }
 0x553   :  { %v1450_v62 = vadd.f32 %v1436_v19, %v1418_v54  ;;  %v4010_v45 = vadd.f32 %v1432_v16, %v1417_v57  ;;  %v4012_v43 = vadd.f32 %v1436_v19, %v1420_v58  ;;  %v4014_v63 = vadd.f32 %v1432_v16, %v1419_v59  ;;  %v1906_v58 = vld [vmem:[#allocation16 + $0x4e8] sm:$0xff] }
 0x554   :  { %v1422_v1 = vmul.f32 %v1412_v33, %v1388_v60  ;;  %v1421_v2 = vmul.f32 %v1408_v28, %v1387_v42  ;;  %v1424_v3 = vmul.f32 %v1412_v33, %v1390_v61  ;;  %v1423_v4 = vmul.f32 %v1408_v28, %v1389_v39  ;;  %v1905_v42 = vld [vmem:[#allocation16 + $0x4e0] sm:$0xff] }
 0x555   :  { %v1458_v6 = vsub.f32 0.0, %v1450_v62  ;;  %v1457_v7 = vsub.f32 0.0, %v4010_v45  ;;  %v1460_v8 = vsub.f32 0.0, %v4012_v43  ;;  %v1459_v9 = vsub.f32 0.0, %v4014_v63 }
 0x556   :  { %v4019_v10 = vadd.f32 %v1444_v24, %v1422_v1  ;;  %v4021_v11 = vadd.f32 %v1440_v25, %v1421_v2  ;;  %v4023_v12 = vadd.f32 %v1444_v24, %v1424_v3  ;;  %v4025_v14 = vadd.f32 %v1440_v25, %v1423_v4  ;;  %v1903_v4 = vld [vmem:[#allocation16 + $0x4d0] sm:$0xff] }
 0x557   :  { %v1467_v15 = vmul.f32 1.442695, %v1458_v6  ;;  %v1465_v16 = vmul.f32 1.442695, %v1457_v7  ;;  %v1471_v17 = vmul.f32 1.442695, %v1460_v8 }
 0x558   :  { %v1469_v18 = vmul.f32 1.442695, %v1459_v9  ;;  %v1462_v19 = vsub.f32 0.0, %v4019_v10  ;;  %v1461_v20 = vsub.f32 0.0, %v4021_v11  ;;  %v1464_v21 = vsub.f32 0.0, %v4023_v12  ;;  %v1902_v7 = vld [vmem:[#allocation16 + $0x4c8] sm:$0xff] }
 0x559   :  { %3090 = vpow2.f32 %v1467_v15  ;;  %v1463_v22 = vsub.f32 0.0, %v4025_v14  ;;  %v1901_v8 = vld [vmem:[#allocation16 + $0x4c0] sm:$0xff] }
 0x55a   :  { %3092 = vpow2.f32 %v1465_v16  ;;  %v1475_v23 = vmul.f32 1.442695, %v1462_v19  ;;  %v1473_v26 = vmul.f32 1.442695, %v1461_v20  ;;  %v1479_v24 = vmul.f32 1.442695, %v1464_v21 }
 0x55b   :  { %3094 = vpow2.f32 %v1471_v17  ;;  %v1477_v25 = vmul.f32 1.442695, %v1463_v22  ;;  %v1900_v16 = vld [vmem:[#allocation16 + $0x4b8] sm:$0xff]  ;;  %v1899_v17 = vld [vmem:[#allocation16 + $0x4b0] sm:$0xff]  ;;  %v1897_v20 = vld [vmem:[#allocation16 + $0x4a0] sm:$0xff] }
 0x55c   :  { %3096 = vpow2.f32 %v1469_v18  ;;  %v1896_v22 = vld [vmem:[#allocation16 + $0x498] sm:$0xff] }
 0x55d   :  { %3098 = vpow2.f32 %v1475_v23 }
 0x55e   :  { %3100 = vpow2.f32 %v1473_v26 }
 0x55f   :  { %3102 = vpow2.f32 %v1479_v24  ;;  %v1895_v24 = vld [vmem:[#allocation16 + $0x490] sm:$0xff] }
 0x560   :  { %3104 = vpow2.f32 %v1477_v25  ;;  %v1894_v25 = vld [vmem:[#allocation16 + $0x488] sm:$0xff] }
 0x566   :  { %v3091_v27 = vpop.eup %3090 }
 0x567   :  { %v3093_v29 = vpop.eup %3092  ;;  %v1482_v30 = vadd.f32 1.0, %v3091_v27 }
 0x568   :  { %v3095_v31 = vpop.eup %3094  ;;  %v1481_v33 = vadd.f32 1.0, %v3093_v29  ;;  %v1893_v29 = vld [vmem:[#allocation16 + $0x480] sm:$0xff] }
 0x569   :  { %v3097_v46 = vpop.eup %3096  ;;  %3106 = vrcp.f32 %v1482_v30  ;;  %v1484_v28 = vadd.f32 1.0, %v3095_v31  ;;  %v1891_v31 = vld [vmem:[#allocation16 + $0x470] sm:$0xff] }
 0x56a   :  { %v3099_v40 = vpop.eup %3098  ;;  %3108 = vrcp.f32 %v1481_v33  ;;  %v1483_v32 = vadd.f32 1.0, %v3097_v46  ;;  %v1890_v33 = vld [vmem:[#allocation16 + $0x468] sm:$0xff]  ;;  %v1889_v46 = vld [vmem:[#allocation16 + $0x460] sm:$0xff] }
 0x56b   :  { %v3101_v34 = vpop.eup %3100  ;;  %3110 = vrcp.f32 %v1484_v28  ;;  %v1486_v47 = vadd.f32 1.0, %v3099_v40  ;;  %v1888_v28 = vld [vmem:[#allocation16 + $0x458] sm:$0xff]  ;;  %v1887_v40 = vld [vmem:[#allocation16 + $0x450] sm:$0xff] }
 0x56c   :  { %v3103_v36 = vpop.eup %3102  ;;  %3112 = vrcp.f32 %v1483_v32  ;;  %v1485_v35 = vadd.f32 1.0, %v3101_v34  ;;  %v1886_v32 = vld [vmem:[#allocation16 + $0x448] sm:$0xff]  ;;  %v1885_v34 = vld [vmem:[#allocation16 + $0x440] sm:$0xff] }
 0x56d   :  { %v3105_v38 = vpop.eup %3104  ;;  %3114 = vrcp.f32 %v1486_v47  ;;  %v1488_v37 = vadd.f32 1.0, %v3103_v36  ;;  %v1884_v47 = vld [vmem:[#allocation16 + $0x438] sm:$0xff]  ;;  %v1883_v36 = vld [vmem:[#allocation16 + $0x430] sm:$0xff] }
 0x56e   :  { %3116 = vrcp.f32 %v1485_v35  ;;  %v1487_v48 = vadd.f32 1.0, %v3105_v38  ;;  %v1882_v35 = vld [vmem:[#allocation16 + $0x428] sm:$0xff]  ;;  %v1881_v38 = vld [vmem:[#allocation16 + $0x420] sm:$0xff] }
 0x56f   :  { %3118 = vrcp.f32 %v1488_v37  ;;  %v1880_v37 = vld [vmem:[#allocation16 + $0x418] sm:$0xff] }
 0x570   :  { %3120 = vrcp.f32 %v1487_v48  ;;  %v1879_v48 = vld [vmem:[#allocation16 + $0x410] sm:$0xff] }
 0x576   :  { %v3107_v51 = vpop.eup %3106 }
 0x577   :  { %v3109_v49 = vpop.eup %3108  ;;  %v4031_v52 = vmul.f32 %v3107_v51, %v1450_v62  ;;  %v1878_v51 = vld [vmem:[#allocation16 + $0x408] sm:$0xff] }
 0x578   :  { %v3111_v50 = vpop.eup %3110  ;;  %v4034_v55 = vmul.f32 %v3109_v49, %v4010_v45  ;;  %v1904_v45 = vld [vmem:[#allocation16 + $0x4d8] sm:$0xff]  ;;  %v1877_v49 = vld [vmem:[#allocation16 + $0x400] sm:$0xff] }
 0x579   :  { %v3113_v53 = vpop.eup %3112  ;;  %1762 = vmatprep.mubr.f32.mxu1 %v4031_v52  ;;  %v4038_v54 = vmul.f32 %v3111_v50, %v4012_v43  ;;  %v1522_v57 = vrot.slane %v4031_v52, 7  ;;  %v1548_v21 = vrot.slane %v4031_v52, 1  ;;  %v1940_v52 = vld [vmem:[#allocation16 + $0x5f8] sm:$0xff]  ;;  %v1939_v50 = vld [vmem:[#allocation16 + $0x5f0] sm:$0xff] }
 0x57a   :  { %v3115_v59 = vpop.eup %3114  ;;  %1763 = vmatmul.mubr.f32.vlgmr.msra.gmra.mxu1 %v4034_v55  ;;  %v1521_v60 = vrot.slane %v4034_v55, 7  ;;  %v4044_v61 = vmul.f32 %v3113_v53, %v4014_v63  ;;  %v1937_v53 = vld [vmem:[#allocation16 + $0x5e0] sm:$0xff] }
 0x57b   :  { %v3117_v39 = vpop.eup %3116  ;;  %1942 = vmatpush1.msra.mxu1 %v1907_v56  ;;  %1768 = vmatprep.mubr.f32.mxu1 %v4038_v54  ;;  %v1525_v62 = vrot.slane %v4038_v54, 7  ;;  %v4051_v1 = vmul.f32 %v3115_v59, %v4019_v10  ;;  %v1938_v56 = vld [vmem:[#allocation16 + $0x5e8] sm:$0xff] }
 0x57c   :  { %v3119_v43 = vpop.eup %3118  ;;  %2847 = vmatprep.mubr.msk.f32.mxu0 %vm3690_vm3, %v1522_v57  ;;  %1943 = vmatprep.subr.mxu1 %v1906_v58  ;;  %v1523_v2 = vrot.slane %v4044_v61, 7  ;;  %v4062_v9 = vmul.f32 %v3117_v39, %v4021_v11  ;;  %v1898_v11 = vld [vmem:[#allocation16 + $0x4a8] sm:$0xff]  ;;  %v1935_v58 = vld [vmem:[#allocation16 + $0x5d0] sm:$0xff] }
 0x57d   :  { %v3121_v3 = vpop.eup %3120  ;;  %2849 = vmatmul.mubr.msk.f32.vlgmr.msra.gmra.mxu0 %vm3690_vm3, %v1521_v60  ;;  %1944 = vmatpush1.msra.mxu1 %v1905_v42  ;;  %v1526_v63 = vsel %vm538_vm2, %v1522_v57, %v1525_v62  ;;  %v4058_v6 = vmul.f32 %v3119_v43, %v4023_v12  ;;  %v1528_v15 = vrot.slane %v4051_v1, 7  ;;  %v1936_v57 = vld [vmem:[#allocation16 + $0x5d8] sm:$0xff]  ;;  %v1934_v59 = vld [vmem:[#allocation16 + $0x5c8] sm:$0xff]  ;;  %v1931_v39 = vld [vmem:[#allocation16 + $0x5b0] sm:$0xff] }
 0x57e   :  { %1857 = vmatprep.mubr.f32.mxu0 %v1526_v63  ;;  %1945 = vmatprep.subr.mxu1 %v1904_v45  ;;  %v1524_v10 = vsel %vm538_vm2, %v1521_v60, %v1523_v2  ;;  %v4068_v12 = vmul.f32 %v3121_v3, %v4025_v14  ;;  %v1527_v19 = vrot.slane %v4062_v9, 7  ;;  %v1549_v14 = vrot.slane %v4038_v54, 1  ;;  %v1933_v60 = vld [vmem:[#allocation16 + $0x5c0] sm:$0xff]  ;;  %v1932_v42 = vld [vmem:[#allocation16 + $0x5b8] sm:$0xff]  ;;  %v1930_v62 = vld [vmem:[#allocation16 + $0x5a8] sm:$0xff] }
 0x57f   :  { %1769 = vmatmul.mubr.f32.gmra.mxu1 %v4044_v61  ;;  %v1531_v18 = vrot.slane %v4058_v6, 7  ;;  %v1929_v45 = vld [vmem:[#allocation16 + $0x5a0] sm:$0xff]  ;;  %v1928_v43 = vld [vmem:[#allocation16 + $0x598] sm:$0xff]  ;;  %v1927_v2 = vld [vmem:[#allocation16 + $0x590] sm:$0xff] }
 0x580   :  { %1946 = vmatpush1.msra.mxu1 %v1903_v4  ;;  %1774 = vmatprep.mubr.f32.mxu1 %v4051_v1  ;;  %v1529_v23 = vrot.slane %v4068_v12, 7  ;;  %v1550_v27 = vsel %vm551_vm4, %v1548_v21, %v1549_v14  ;;  %v1926_v3 = vld [vmem:[#allocation16 + $0x588] sm:$0xff]  ;;  %v1925_v63 = vld [vmem:[#allocation16 + $0x580] sm:$0xff]  ;;  %v1924_v4 = vld [vmem:[#allocation16 + $0x578] sm:$0xff] }
 0x581   :  { %1947 = vmatprep.subr.mxu1 %v1902_v7  ;;  %1858 = vmatmul.mubr.f32.gmra.mxu0 %v1524_v10  ;;  %v1532_v26 = vsel %vm538_vm2, %v1528_v15, %v1531_v18  ;;  %v1923_v7 = vld [vmem:[#allocation16 + $0x570] sm:$0xff]  ;;  %v1921_v10 = vld [vmem:[#allocation16 + $0x560] sm:$0xff]  ;;  %v2089_v54 = vld [vmem:[%s4425_s13 + $0xf8] sm:$0xff] }
 0x582   :  { %1948 = vmatpush1.msra.mxu1 %v1901_v8  ;;  %2851 = vmatprep.mubr.msk.f32.mxu0 %vm3690_vm3, %v1528_v15  ;;  %v1530_v30 = vsel %vm538_vm2, %v1527_v19, %v1529_v23  ;;  %v1922_v8 = vld [vmem:[#allocation16 + $0x568] sm:$0xff]  ;;  %v1920_v15 = vld [vmem:[#allocation16 + $0x558] sm:$0xff]  ;;  %v1917_v18 = vld [vmem:[#allocation16 + $0x540] sm:$0xff] }
 0x583   :  { %1949 = vmatprep.subr.mxu1 %v1900_v16  ;;  %1775 = vmatmul.mubr.f32.gmra.mxu1 %v4062_v9  ;;  %v1919_v16 = vld [vmem:[#allocation16 + $0x550] sm:$0xff]  ;;  %v1913_v21 = vld [vmem:[#allocation16 + $0x520] sm:$0xff] }
 0x584   :  { %1950 = vmatpush1.msra.mxu1 %v1899_v17  ;;  %1780 = vmatprep.mubr.f32.mxu1 %v4058_v6  ;;  %v1918_v17 = vld [vmem:[#allocation16 + $0x548] sm:$0xff]  ;;  %v1911_v23 = vld [vmem:[#allocation16 + $0x510] sm:$0xff] }
 0x585   :  { %1951 = vmatprep.subr.mxu1 %v1898_v11  ;;  %2853 = vmatmul.mubr.msk.f32.gmra.mxu0 %vm3690_vm3, %v1527_v19  ;;  %v1916_v11 = vld [vmem:[#allocation16 + $0x538] sm:$0xff]  ;;  %v1915_v19 = vld [vmem:[#allocation16 + $0x530] sm:$0xff] }
 0x586   :  { %1952 = vmatpush1.msra.mxu1 %v1897_v20  ;;  %1869 = vmatprep.mubr.f32.mxu0 %v1532_v26  ;;  %v1914_v20 = vld [vmem:[#allocation16 + $0x528] sm:$0xff]  ;;  %v1546_v26 = vrot.slane %v4044_v61, 1  ;;  %v1551_v61 = vrot.slane %v4062_v9, 1  ;;  %v2072_v9 = vld [vmem:[%s4425_s13 + $0x70] sm:$0xff] }
 0x587   :  { %1953 = vmatprep.subr.mxu1 %v1896_v22  ;;  %1781 = vmatmul.mubr.f32.gmra.mxu1 %v4068_v12  ;;  %v1912_v22 = vld [vmem:[#allocation16 + $0x518] sm:$0xff] }
 0x588   :  { %1954 = vmatpush1.msra.mxu1 %v1895_v24  ;;  %2005 = vmatprep.mubr.f32.mxu1 %v1550_v27  ;;  %v1910_v24 = vld [vmem:[#allocation16 + $0x508] sm:$0xff]  ;;  %v1909_v27 = vld [vmem:[#allocation16 + $0x500] sm:$0xff] }
 0x589   :  { %1955 = vmatprep.subr.mxu1 %v1894_v25  ;;  %1870 = vmatmul.mubr.f32.gmra.mxu0 %v1530_v30  ;;  %v1545_v25 = vrot.slane %v4034_v55, 1  ;;  %v1554_v30 = vrot.slane %v4051_v1, 1  ;;  %v1552_v55 = vrot.slane %v4068_v12, 1  ;;  %v2073_v1 = vld [vmem:[%s4425_s13 + $0x78] sm:$0xff]  ;;  %v2087_v12 = vld [vmem:[%s4425_s13 + $0xe8] sm:$0xff] }
 0x58a   :  { %1956 = vmatpush1.msra.mxu1 %v1893_v29  ;;  %2898 = vmatprep.subr.mxu0 %v2089_v54 }
 0x58b   :  { %1957 = vmatprep.subr.mxu1 %v1892_v5  ;;  %v1547_v29 = vsel %vm551_vm4, %v1545_v25, %v1546_v26  ;;  %v1555_v5 = vrot.slane %v4058_v6, 1  ;;  %v2088_v6 = vld [vmem:[%s4425_s13 + $0xf0] sm:$0xff]  ;;  %2899 = vmatpush3.msra.mxu0 %v2073_v1 }
 0x58c   :  { %1958 = vmatpush1.msra.mxu1 %v1891_v31  ;;  %2900 = vmatprep.subr.mxu0 %v2088_v6 }
 0x58d   :  { %1959 = vmatprep.subr.mxu1 %v1890_v33  ;;  %v1556_v31 = vsel %vm551_vm4, %v1554_v30, %v1555_v5  ;;  %v1553_v33 = vsel %vm551_vm4, %v1551_v61, %v1552_v55  ;;  %2901 = vmatpush3.msra.mxu0 %v2072_v9 }
 0x58e   :  { %1960 = vmatpush1.msra.mxu1 %v1889_v46  ;;  %v2086_v46 = vld [vmem:[%s4425_s13 + $0xe0] sm:$0xff]  ;;  %2902 = vmatprep.subr.mxu0 %v2087_v12 }
 0x58f   :  { %1961 = vmatprep.subr.mxu1 %v1888_v28  ;;  %v2070_v28 = vld [vmem:[%s4425_s13 + $0x60] sm:$0xff] }
 0x590   :  { %1962 = vmatpush1.msra.mxu1 %v1887_v40  ;;  %v2085_v40 = vld [vmem:[%s4425_s13 + $0xd8] sm:$0xff] }
 0x591   :  { %1963 = vmatprep.subr.mxu1 %v1886_v32  ;;  %v2069_v32 = vld [vmem:[%s4425_s13 + $0x58] sm:$0xff] }
 0x592   :  { %1964 = vmatpush1.msra.mxu1 %v1885_v34  ;;  %v2084_v34 = vld [vmem:[%s4425_s13 + $0xd0] sm:$0xff] }
 0x593   :  { %1965 = vmatprep.subr.mxu1 %v1884_v47  ;;  %v2068_v47 = vld [vmem:[%s4425_s13 + $0x50] sm:$0xff] }
 0x594   :  { %1966 = vmatpush1.msra.mxu1 %v1883_v36  ;;  %v2083_v36 = vld [vmem:[%s4425_s13 + $0xc8] sm:$0xff] }
 0x595   :  { %1967 = vmatprep.subr.mxu1 %v1882_v35  ;;  %v2067_v35 = vld [vmem:[%s4425_s13 + $0x48] sm:$0xff] }
 0x596   :  { %1968 = vmatpush1.msra.mxu1 %v1881_v38  ;;  %v2082_v38 = vld [vmem:[%s4425_s13 + $0xc0] sm:$0xff] }
 0x597   :  { %1969 = vmatprep.subr.mxu1 %v1880_v37  ;;  %v2066_v37 = vld [vmem:[%s4425_s13 + $0x40] sm:$0xff] }
 0x598   :  { %1970 = vmatpush1.msra.mxu1 %v1879_v48  ;;  %v2081_v48 = vld [vmem:[%s4425_s13 + $0xb8] sm:$0xff] }
 0x599   :  { %1971 = vmatprep.subr.mxu1 %v1878_v51  ;;  %v2065_v51 = vld [vmem:[%s4425_s13 + $0x38] sm:$0xff] }
 0x59a   :  { %1972 = vmatpush1.msra.mxu1 %v1877_v49  ;;  %v2080_v49 = vld [vmem:[%s4425_s13 + $0xb0] sm:$0xff] }
 0x59b   :  { %1973 = vmatprep.subr.mxu1 %v1940_v52  ;;  %v2064_v52 = vld [vmem:[%s4425_s13 + $0x30] sm:$0xff] }
 0x59c   :  { %1974 = vmatpush2.msra.mxu1 %v1939_v50  ;;  %v2079_v50 = vld [vmem:[%s4425_s13 + $0xa8] sm:$0xff] }
 0x59d   :  { %1975 = vmatprep.subr.mxu1 %v1938_v56  ;;  %v2063_v56 = vld [vmem:[%s4425_s13 + $0x28] sm:$0xff] }
 0x59e   :  { %1976 = vmatpush2.msra.mxu1 %v1937_v53  ;;  %v2078_v53 = vld [vmem:[%s4425_s13 + $0xa0] sm:$0xff] }
 0x59f   :  { %1977 = vmatprep.subr.mxu1 %v1936_v57  ;;  %v2062_v57 = vld [vmem:[%s4425_s13 + $0x20] sm:$0xff] }
 0x5a0   :  { %1978 = vmatpush2.msra.mxu1 %v1935_v58  ;;  %v2077_v58 = vld [vmem:[%s4425_s13 + $0x98] sm:$0xff] }
 0x5a1   :  { %1979 = vmatprep.subr.mxu1 %v1934_v59  ;;  %v2061_v59 = vld [vmem:[%s4425_s13 + $0x18] sm:$0xff] }
 0x5a2   :  { %1980 = vmatpush2.msra.mxu1 %v1933_v60  ;;  %v2076_v60 = vld [vmem:[%s4425_s13 + $0x90] sm:$0xff] }
 0x5a3   :  { %1981 = vmatprep.subr.mxu1 %v1932_v42  ;;  %v2060_v42 = vld [vmem:[%s4425_s13 + $0x10] sm:$0xff] }
 0x5a4   :  { %1982 = vmatpush2.msra.mxu1 %v1931_v39  ;;  %v2075_v39 = vld [vmem:[%s4425_s13 + $0x88] sm:$0xff] }
 0x5a5   :  { %1983 = vmatprep.subr.mxu1 %v1930_v62  ;;  %v2059_v62 = vld [vmem:[%s4425_s13 + $0x8] sm:$0xff] }
 0x5a6   :  { %1984 = vmatpush2.msra.mxu1 %v1929_v45  ;;  %v2074_v45 = vld [vmem:[%s4425_s13 + $0x80] sm:$0xff] }
 0x5a7   :  { %1985 = vmatprep.subr.mxu1 %v1928_v43  ;;  %v2058_v43 = vld [vmem:[%s4425_s13] sm:$0xff] }
 0x5a8   :  { %1986 = vmatpush2.msra.mxu1 %v1927_v2 }
 0x5a9   :  { %1987 = vmatprep.subr.mxu1 %v1926_v3 }
 0x5aa   :  { %1988 = vmatpush2.msra.mxu1 %v1925_v63 }
 0x5ab   :  { %1989 = vmatprep.subr.mxu1 %v1924_v4 }
 0x5ac   :  { %1990 = vmatpush2.msra.mxu1 %v1923_v7 }
 0x5ad   :  { %1991 = vmatprep.subr.mxu1 %v1922_v8 }
 0x5ae   :  { %1992 = vmatpush2.msra.mxu1 %v1921_v10 }
 0x5af   :  { %1993 = vmatprep.subr.mxu1 %v1920_v15 }
 0x5b0   :  { %1994 = vmatpush2.msra.mxu1 %v1919_v16 }
 0x5b1   :  { %1995 = vmatprep.subr.mxu1 %v1918_v17 }
 0x5b2   :  { %1996 = vmatpush2.msra.mxu1 %v1917_v18 }
 0x5b3   :  { %1997 = vmatprep.subr.mxu1 %v1916_v11 }
 0x5b4   :  { %1998 = vmatpush2.msra.mxu1 %v1915_v19 }
 0x5b5   :  { %1999 = vmatprep.subr.mxu1 %v1914_v20  ;;  %v2038_v20 = vld [vmem:[%s4424_s12] sm:$0x3] }
 0x5b6   :  { %2000 = vmatpush2.msra.mxu1 %v1913_v21 }
 0x5b7   :  { %2001 = vmatprep.subr.mxu1 %v1912_v22 }
 0x5b8   :  { %2002 = vmatpush2.msra.mxu1 %v1911_v23 }
 0x5b9   :  { %2003 = vmatprep.subr.mxu1 %v1910_v24 }
 0x5ba   :  { %2004 = vmatpush2.msra.mxu1 %v1909_v27  ;;  %v2043_v27 = vrot.slane %v2038_v20, %v3650_v44 }
 0x5bb   :  { %2006 = vmatmul.mubr.f32.vlgmr.msra.gmra.mxu1 %v1547_v29 }
 0x5bc   :  { %2854 = vmatprep.mubr.msk.f32.mxu1 %vm551_vm4, %v1549_v14  ;;  %v2071_v14 = vld [vmem:[%s4425_s13 + $0x68] sm:$0xff] }
 0x5bd   :  { %2903 = vmatpush3.msra.mxu0 %v2071_v14 }
 0x5be   :  { %2904 = vmatprep.subr.mxu0 %v2086_v46 }
 0x5bf   :  { %2855 = vmatmul.mubr.msk.f32.gmra.mxu1 %vm551_vm4, %v1546_v26  ;;  %2905 = vmatpush3.msra.mxu0 %v2070_v28  ;;  %v2047_v26 = vrot.slane %v2038_v20, %v3928_v13 }
 0x5c0   :  { %2017 = vmatprep.mubr.f32.mxu1 %v1556_v31  ;;  %2906 = vmatprep.subr.mxu0 %v2085_v40 }
 0x5c1   :  { %2907 = vmatpush3.msra.mxu0 %v2069_v32 }
 0x5c2   :  { %2908 = vmatprep.subr.mxu0 %v2084_v34 }
 0x5c3   :  { %2018 = vmatmul.mubr.f32.gmra.mxu1 %v1553_v33  ;;  %2909 = vmatpush3.msra.mxu0 %v2068_v47 }
 0x5c4   :  { %2856 = vmatprep.mubr.msk.f32.mxu1 %vm551_vm4, %v1555_v5  ;;  %2910 = vmatprep.subr.mxu0 %v2083_v36 }
 0x5c5   :  { %2911 = vmatpush3.msra.mxu0 %v2067_v35 }
 0x5c6   :  { %2912 = vmatprep.subr.mxu0 %v2082_v38 }
 0x5c7   :  { %2857 = vmatmul.mubr.msk.f32.gmra.mxu1 %vm551_vm4, %v1552_v55  ;;  %2913 = vmatpush3.msra.mxu0 %v2066_v37 }
 0x5c8   :  { %2328 = vmatprep.mubr.f32.mxu1 %v3421_v0  ;;  %2914 = vmatprep.subr.mxu0 %v2081_v48 }
 0x5c9   :  { %2915 = vmatpush3.msra.mxu0 %v2065_v51 }
 0x5ca   :  { %2916 = vmatprep.subr.mxu0 %v2080_v49 }
 0x5cb   :  { %2917 = vmatpush3.msra.mxu0 %v2064_v52 }
 0x5cc   :  { %2918 = vmatprep.subr.mxu0 %v2079_v50 }
 0x5cd   :  { %2919 = vmatpush3.msra.mxu0 %v2063_v56 }
 0x5ce   :  { %2920 = vmatprep.subr.mxu0 %v2078_v53 }
 0x5cf   :  { %2921 = vmatpush3.msra.mxu0 %v2062_v57 }
 0x5d0   :  { %2922 = vmatprep.subr.mxu0 %v2077_v58 }
 0x5d1   :  { %2923 = vmatpush3.msra.mxu0 %v2061_v59 }
 0x5d2   :  { %2924 = vmatprep.subr.mxu0 %v2076_v60 }
 0x5d3   :  { %2925 = vmatpush3.msra.mxu0 %v2060_v42 }
 0x5d4   :  { %2926 = vmatprep.subr.mxu0 %v2075_v39 }
 0x5d5   :  { %2927 = vmatpush3.msra.mxu0 %v2059_v62 }
 0x5d6   :  { %2928 = vmatprep.subr.mxu0 %v2074_v45 }
 0x5d7   :  { %2929 = vmatpush3.msra.mxu0 %v2058_v43 }
 0x63a   :  { %v1764_v2 = vpop.f32.mrf.mxu1 }
 0x63c   :  { %v1766_v3 = vpop.f32.mrf.mxu1 }
 0x63d   :  { %v1853_v4 = vpop.f32.mrf.mxu0 }
 0x63e   :  { %v1854_v21 = vadd.f32 %v1853_v4, %v1764_v2 }
 0x63f   :  { %v1770_v63 = vpop.f32.mrf.mxu1  ;;  %v1855_v8 = vpop.f32.mrf.mxu0 }
 0x640   :  { %v1856_v23 = vadd.f32 %v1855_v8, %v1766_v3 }
 0x641   :  { %v1772_v7 = vpop.f32.mrf.mxu1  ;;  %v1859_v15 = vpop.f32.mrf.mxu0 }
 0x642   :  { %v1860_v5 = vadd.f32 %v1859_v15, %v1770_v63 }
 0x643   :  { %v1776_v10 = vpop.f32.mrf.mxu1  ;;  %v1861_v17 = vpop.f32.mrf.mxu0 }
 0x644   :  { %v1862_v55 = vadd.f32 %v1861_v17, %v1772_v7 }
 0x645   :  { %v1778_v16 = vpop.f32.mrf.mxu1  ;;  %v1865_v11 = vpop.f32.mrf.mxu0 }
 0x646   :  { %v1866_v12 = vadd.f32 %v1865_v11, %v1776_v10 }
 0x647   :  { %v1782_v18 = vpop.f32.mrf.mxu1  ;;  %v1867_v24 = vpop.f32.mrf.mxu0 }
 0x648   :  { %v1868_v46 = vadd.f32 %v1867_v24, %v1778_v16 }
 0x649   :  { %v1784_v19 = vpop.f32.mrf.mxu1  ;;  %v1871_v33 = vpop.f32.mrf.mxu0 }
 0x64a   :  { %v1872_v35 = vadd.f32 %v1871_v33, %v1782_v18 }
 0x64b   :  { %v1873_v40 = vpop.f32.mrf.mxu0 }
 0x64c   :  { %v1874_v37 = vadd.f32 %v1873_v40, %v1784_v19 }
 0x67b   :  { %v2007_v22 = vpop.f32.mrf.mxu1 }
 0x67c   :  { %v2030_v25 = vadd.f32 %v2007_v22, %v1854_v21 }
 0x67d   :  { %v2009_v29 = vpop.f32.mrf.mxu1 }
 0x67e   :  { %v2031_v30 = vadd.f32 %v2009_v29, %v1856_v23  ;;  %v4206_v54 = vadd.f32 %v2043_v27, %v2030_v25 }
 0x67f   :  { %v2013_v61 = vpop.f32.mrf.mxu1 }
 0x680   :  { %v4204_v31 = vadd.f32 %v2047_v26, %v2031_v30  ;;  %v2032_v1 = vadd.f32 %v2013_v61, %v1860_v5 }
 0x681   :  { %v2015_v6 = vpop.f32.mrf.mxu1 }
 0x682   :  { %v2033_v9 = vadd.f32 %v2015_v6, %v1862_v55  ;;  %2154 = vmatprep.mubr.f32.mxu0 %v4204_v31  ;;  %v4212_v32 = vadd.f32 %v2043_v27, %v2032_v1 }
 0x683   :  { %v2019_v14 = vpop.f32.mrf.mxu1  ;;  %2155 = vmatmul.mubr.f32.vlgmr.msra.gmra.mxu0 %v4206_v54 }
 0x684   :  { %v4210_v28 = vadd.f32 %v2047_v26, %v2033_v9  ;;  %v2034_v34 = vadd.f32 %v2019_v14, %v1866_v12 }
 0x685   :  { %v2021_v47 = vpop.f32.mrf.mxu1 }
 0x686   :  { %v2035_v36 = vadd.f32 %v2021_v47, %v1868_v46  ;;  %2159 = vmatprep.mubr.f32.mxu0 %v4210_v28  ;;  %v4218_v51 = vadd.f32 %v2043_v27, %v2034_v34 }
 0x687   :  { %v2025_v38 = vpop.f32.mrf.mxu1  ;;  %2160 = vmatmul.mubr.f32.gmra.mxu0 %v4212_v32 }
 0x688   :  { %v4216_v48 = vadd.f32 %v2047_v26, %v2035_v36  ;;  %v2036_v49 = vadd.f32 %v2025_v38, %v1872_v35 }
 0x689   :  { %v2027_v52 = vpop.f32.mrf.mxu1 }
 0x68a   :  { %v2037_v50 = vadd.f32 %v2027_v52, %v1874_v37  ;;  %2164 = vmatprep.mubr.f32.mxu0 %v4216_v48  ;;  %v4224_v53 = vadd.f32 %v2043_v27, %v2036_v49  ;;  %v2251_v52 = vld [vmem:[%s4426_s14 + $0x18] sm:$0xff] }
 0x68b   :  { %2165 = vmatmul.mubr.f32.gmra.mxu0 %v4218_v51  ;;  %2292 = vmatprep.subr.mxu1 %v2251_v52  ;;  %v2408_v52 = vld [vmem:[%s4427_s15 + $0x98] sm:$0xff] }
 0x68c   :  { %v4222_v56 = vadd.f32 %v2047_v26, %v2037_v50  ;;  %v2250_v50 = vld [vmem:[%s4426_s14 + $0x10] sm:$0xff] }
 0x68d   :  { %2293 = vmatpush1.msra.mxu1 %v2250_v50  ;;  %v2392_v50 = vld [vmem:[%s4427_s15 + $0x18] sm:$0xff] }
 0x68e   :  { %2169 = vmatprep.mubr.f32.mxu0 %v4222_v56 }
 0x68f   :  { %2170 = vmatmul.mubr.f32.gmra.mxu0 %v4224_v53 }
 0x690   :  { %2722 = vmatprep.mubr.f32.mxu0 %v3421_v0 }
 0x743   :  { %v2930_v57 = vpop.f32.mrf.mxu0 }
 0x745   :  { %v2931_v58 = vpop.f32.mrf.mxu0 }
 0x746   :  { %v2932_v59 = vadd.f32 %v2931_v58, %v2930_v57  ;;  %v2249_v57 = vld [vmem:[%s4426_s14 + $0x8] sm:$0xff]  ;;  %v2248_v58 = vld [vmem:[%s4426_s14] sm:$0xff] }
 0x747   :  { %v2933_v60 = vpop.f32.mrf.mxu0  ;;  %2294 = vmatprep.subr.mxu1 %v2249_v57  ;;  %v2407_v57 = vld [vmem:[%s4427_s15 + $0x90] sm:$0xff] }
 0x748   :  { %v2176_v42 = vsel %vm2175_vm5, %v2932_v59, -inf  ;;  %2295 = vmatpush1.msra.mxu1 %v2248_v58  ;;  %v2391_v58 = vld [vmem:[%s4427_s15 + $0x10] sm:$0xff] }
 0x749   :  { %v2934_v39 = vpop.f32.mrf.mxu0  ;;  %2177 = vmax.xlane.f32.xlu0 %v2176_v42 }
 0x74a   :  { %v2935_v62 = vadd.f32 %v2934_v39, %v2933_v60 }
 0x74b   :  { %v2936_v45 = vpop.f32.mrf.mxu0 }
 0x74c   :  { %v2179_v43 = vsel %vm2175_vm5, %v2935_v62, -inf }
 0x74d   :  { %v2937_v2 = vpop.f32.mrf.mxu0  ;;  %2180 = vmax.xlane.f32.xlu0 %v2179_v43 }
 0x74e   :  { %v2938_v3 = vadd.f32 %v2937_v2, %v2936_v45 }
 0x74f   :  { %v2939_v63 = vpop.f32.mrf.mxu0 }
 0x750   :  { %v2182_v4 = vsel %vm2175_vm5, %v2938_v3, -inf }
 0x751   :  { %2183 = vmax.xlane.f32.xlu1 %v2182_v4  ;;  %v2940_v7 = vpop.f32.mrf.mxu0 }
 0x752   :  { %v2941_v8 = vadd.f32 %v2940_v7, %v2939_v63 }
 0x754   :  { %v2185_v10 = vsel %vm2175_vm5, %v2941_v8, -inf }
 0x755   :  { %2186 = vmax.xlane.f32.xlu1 %v2185_v10 }
 0x7d2   :  { %v2178_v15 = vpop.xlane.xlu0 %2177 }
 0x7d6   :  { %v2181_v16 = vpop.xlane.xlu0 %2180 }
 0x7d7   :  { %v2188_v17 = vmax.f32 %v2178_v15, %v2181_v16 }
 0x7d9   :  { %v2189_v18 = vrot.slane %v2188_v17, 4 }
 0x7da   :  { %v2184_v11 = vpop.xlane.xlu1 %2183 }
 0x7db   :  { %v2190_v19 = vmax.f32 %v2188_v17, %v2189_v18 }
 0x7dd   :  { %v2191_v20 = vrot.slane %v2190_v19, 2 }
 0x7de   :  { %v2187_v21 = vpop.xlane.xlu1 %2186 }
 0x7df   :  { %v2192_v22 = vmax.f32 %v2190_v19, %v2191_v20  ;;  %v2195_v23 = vmax.f32 %v2184_v11, %v2187_v21 }
 0x7e1   :  { %v2193_v26 = vrot.slane %v2192_v22, 1  ;;  %v2196_v24 = vrot.slane %v2195_v23, 4 }
 0x7e3   :  { %v2194_v25 = vmax.f32 %v2192_v22, %v2193_v26  ;;  %v2197_v27 = vmax.f32 %v2195_v23, %v2196_v24  ;;  %v2420_v26 = vld [vmem:[%s4427_s15 + $0xf8] sm:$0xff] }
 0x7e4   :  { %2942 = vmatprep.subr.mxu1 %v2420_v26  ;;  %v2404_v24 = vld [vmem:[%s4427_s15 + $0x78] sm:$0xff] }
 0x7e5   :  { %v2202_v29 = vsub.f32 %v2932_v59, %v2194_v25  ;;  %v2203_v30 = vsub.f32 %v2935_v62, %v2194_v25  ;;  %v2198_v5 = vrot.slane %v2197_v27, 2  ;;  %v2419_v25 = vld [vmem:[%s4427_s15 + $0xf0] sm:$0xff] }
 0x7e7   :  { %v2206_v61 = vmul.f32 1.442695, %v2202_v29  ;;  %v2208_v55 = vmul.f32 1.442695, %v2203_v30  ;;  %v2199_v33 = vmax.f32 %v2197_v27, %v2198_v5  ;;  %v2403_v27 = vld [vmem:[%s4427_s15 + $0x70] sm:$0xff]  ;;  %v2418_v29 = vld [vmem:[%s4427_s15 + $0xe8] sm:$0xff] }
 0x7e8   :  { %v2402_v30 = vld [vmem:[%s4427_s15 + $0x68] sm:$0xff]  ;;  %v2417_v5 = vld [vmem:[%s4427_s15 + $0xe0] sm:$0xff] }
 0x7e9   :  { %3122 = vpow2.f32 %v2206_v61  ;;  %v2200_v1 = vrot.slane %v2199_v33, 1  ;;  %v2401_v61 = vld [vmem:[%s4427_s15 + $0x60] sm:$0xff] }
 0x7ea   :  { %3124 = vpow2.f32 %v2208_v55  ;;  %v2416_v55 = vld [vmem:[%s4427_s15 + $0xd8] sm:$0xff] }
 0x7eb   :  { %v2201_v6 = vmax.f32 %v2199_v33, %v2200_v1  ;;  %v2400_v33 = vld [vmem:[%s4427_s15 + $0x58] sm:$0xff]  ;;  %v2415_v1 = vld [vmem:[%s4427_s15 + $0xd0] sm:$0xff] }
 0x7ed   :  { %v2204_v9 = vsub.f32 %v2938_v3, %v2201_v6  ;;  %v2205_v12 = vsub.f32 %v2941_v8, %v2201_v6  ;;  %v2399_v6 = vld [vmem:[%s4427_s15 + $0x50] sm:$0xff] }
 0x7ef   :  { %v2210_v14 = vmul.f32 1.442695, %v2204_v9  ;;  %v2212_v46 = vmul.f32 1.442695, %v2205_v12  ;;  %v2414_v9 = vld [vmem:[%s4427_s15 + $0xc8] sm:$0xff] }
 0x7f0   :  { %v2398_v12 = vld [vmem:[%s4427_s15 + $0x48] sm:$0xff] }
 0x7f1   :  { %3126 = vpow2.f32 %v2210_v14  ;;  %v2413_v14 = vld [vmem:[%s4427_s15 + $0xc0] sm:$0xff] }
 0x7f2   :  { %3128 = vpow2.f32 %v2212_v46  ;;  %v2397_v46 = vld [vmem:[%s4427_s15 + $0x40] sm:$0xff] }
 0x7f6   :  { %v3123_v40 = vpop.eup %3122 }
 0x7f7   :  { %v3125_v34 = vpop.eup %3124  ;;  %v2214_v47 = vsel %vm2175_vm5, %v3123_v40, 0.0 }
 0x7f8   :  { %2215 = vadd.xlane.f32.xlu0 %v2214_v47  ;;  %v2217_v36 = vsel %vm2175_vm5, %v3125_v34, 0.0  ;;  %v2411_v47 = vld [vmem:[%s4427_s15 + $0xb0] sm:$0xff] }
 0x7f9   :  { %2218 = vadd.xlane.f32.xlu1 %v2217_v36  ;;  %v2395_v36 = vld [vmem:[%s4427_s15 + $0x30] sm:$0xff] }
 0x7fe   :  { %v3127_v35 = vpop.eup %3126 }
 0x7ff   :  { %v3129_v38 = vpop.eup %3128  ;;  %v2220_v37 = vsel %vm2175_vm5, %v3127_v35, 0.0 }
 0x800   :  { %v2223_v49 = vsel %vm2175_vm5, %v3129_v38, 0.0  ;;  %2221 = vadd.xlane.f32.xlu0 %v2220_v37  ;;  %v2409_v37 = vld [vmem:[%s4427_s15 + $0xa0] sm:$0xff] }
 0x801   :  { %2224 = vadd.xlane.f32.xlu1 %v2223_v49  ;;  %v2393_v49 = vld [vmem:[%s4427_s15 + $0x20] sm:$0xff] }
 0x881   :  { %v2216_v59 = vpop.xlane.xlu0 %2215 }
 0x882   :  { %v2219_v60 = vpop.xlane.xlu1 %2218 }
 0x883   :  { %v2226_v42 = vadd.f32 %v2219_v60, %v2216_v59  ;;  %v2406_v59 = vld [vmem:[%s4427_s15 + $0x88] sm:$0xff] }
 0x884   :  { %v2390_v60 = vld [vmem:[%s4427_s15 + $0x8] sm:$0xff] }
 0x885   :  { %v2227_v39 = vrot.slane %v2226_v42, 4 }
 0x887   :  { %v2228_v62 = vadd.f32 %v2227_v39, %v2226_v42  ;;  %v2405_v42 = vld [vmem:[%s4427_s15 + $0x80] sm:$0xff] }
 0x888   :  { %v2389_v39 = vld [vmem:[%s4427_s15] sm:$0xff] }
 0x889   :  { %v2229_v45 = vrot.slane %v2228_v62, 2  ;;  %v2222_v43 = vpop.xlane.xlu0 %2221 }
 0x88a   :  { %v2225_v2 = vpop.xlane.xlu1 %2224 }
 0x88b   :  { %v2230_v3 = vadd.f32 %v2229_v45, %v2228_v62  ;;  %v2233_v63 = vadd.f32 %v2225_v2, %v2222_v43 }
 0x88d   :  { %v2231_v4 = vrot.slane %v2230_v3, 1  ;;  %v2234_v7 = vrot.slane %v2233_v63, 4 }
 0x88f   :  { %v2232_v8 = vadd.f32 %v2231_v4, %v2230_v3  ;;  %v2235_v10 = vadd.f32 %v2234_v7, %v2233_v63 }
 0x891   :  { %3130 = vrcp.f32 %v2232_v8  ;;  %v2236_v15 = vrot.slane %v2235_v10, 2 }
 0x893   :  { %v2237_v16 = vadd.f32 %v2236_v15, %v2235_v10 }
 0x895   :  { %v2238_v17 = vrot.slane %v2237_v16, 1 }
 0x897   :  { %v2239_v18 = vadd.f32 %v2238_v17, %v2237_v16 }
 0x899   :  { %3132 = vrcp.f32 %v2239_v18 }
 0x89e   :  { %v3131_v11 = vpop.eup %3130 }
 0x89f   :  { %v2244_v19 = vmul.f32 %v3131_v11, %v3123_v40  ;;  %v2245_v20 = vmul.f32 %v3131_v11, %v3125_v34  ;;  %v2412_v40 = vld [vmem:[%s4427_s15 + $0xb8] sm:$0xff] }
 0x8a0   :  { %v2396_v34 = vld [vmem:[%s4427_s15 + $0x38] sm:$0xff] }
 0x8a1   :  { %2858 = vmatmul.mubr.msk.f32.vlgmr.msra.gmra.mxu1 %vm2175_vm5, %v2244_v19 }
 0x8a2   :  { %2334 = vmatprep.mubr.f32.mxu1 %v3421_v0  ;;  %2943 = vmatpush3.msra.mxu1 %v2404_v24 }
 0x8a3   :  { %2944 = vmatprep.subr.mxu1 %v2419_v25 }
 0x8a4   :  { %2945 = vmatpush3.msra.mxu1 %v2403_v27 }
 0x8a5   :  { %2859 = vmatmul.mubr.msk.f32.gmra.mxu1 %vm2175_vm5, %v2245_v20  ;;  %2946 = vmatprep.subr.mxu1 %v2418_v29 }
 0x8a6   :  { %v3133_v21 = vpop.eup %3132  ;;  %2340 = vmatprep.mubr.f32.mxu1 %v3421_v0  ;;  %2947 = vmatpush3.msra.mxu1 %v2402_v30 }
 0x8a7   :  { %v2246_v22 = vmul.f32 %v3133_v21, %v3127_v35  ;;  %v2247_v23 = vmul.f32 %v3133_v21, %v3129_v38  ;;  %2948 = vmatprep.subr.mxu1 %v2417_v5  ;;  %v2410_v35 = vld [vmem:[%s4427_s15 + $0xa8] sm:$0xff] }
 0x8a8   :  { %2949 = vmatpush3.msra.mxu1 %v2401_v61  ;;  %v2394_v38 = vld [vmem:[%s4427_s15 + $0x28] sm:$0xff] }
 0x8a9   :  { %2860 = vmatmul.mubr.msk.f32.gmra.mxu1 %vm2175_vm5, %v2246_v22  ;;  %2950 = vmatprep.subr.mxu1 %v2416_v55 }
 0x8aa   :  { %2346 = vmatprep.mubr.f32.mxu1 %v3421_v0  ;;  %2951 = vmatpush3.msra.mxu1 %v2400_v33 }
 0x8ab   :  { %2952 = vmatprep.subr.mxu1 %v2415_v1 }
 0x8ac   :  { %2953 = vmatpush3.msra.mxu1 %v2399_v6 }
 0x8ad   :  { %2861 = vmatmul.mubr.msk.f32.gmra.mxu1 %vm2175_vm5, %v2247_v23  ;;  %2954 = vmatprep.subr.mxu1 %v2414_v9 }
 0x8ae   :  { %2955 = vmatpush3.msra.mxu1 %v2398_v12 }
 0x8af   :  { %2956 = vmatprep.subr.mxu1 %v2413_v14 }
 0x8b0   :  { %2957 = vmatpush3.msra.mxu1 %v2397_v46 }
 0x8b1   :  { %2958 = vmatprep.subr.mxu1 %v2412_v40 }
 0x8b2   :  { %2959 = vmatpush3.msra.mxu1 %v2396_v34 }
 0x8b3   :  { %2960 = vmatprep.subr.mxu1 %v2411_v47 }
 0x8b4   :  { %2961 = vmatpush3.msra.mxu1 %v2395_v36 }
 0x8b5   :  { %2962 = vmatprep.subr.mxu1 %v2410_v35 }
 0x8b6   :  { %2963 = vmatpush3.msra.mxu1 %v2394_v38 }
 0x8b7   :  { %2964 = vmatprep.subr.mxu1 %v2409_v37 }
 0x8b8   :  { %2965 = vmatpush3.msra.mxu1 %v2393_v49 }
 0x8b9   :  { %2966 = vmatprep.subr.mxu1 %v2408_v52 }
 0x8ba   :  { %2967 = vmatpush3.msra.mxu1 %v2392_v50 }
 0x8bb   :  { %2968 = vmatprep.subr.mxu1 %v2407_v57  ;;  %v2514_v57 = vld [vmem:[#allocation17 + $0x8] sm:$0xff] }
 0x8bc   :  { %2969 = vmatpush3.msra.mxu1 %v2391_v58  ;;  %v2513_v58 = vld [vmem:[#allocation17] sm:$0xff] }
 0x8bd   :  { %2970 = vmatprep.subr.mxu1 %v2406_v59  ;;  %v2645_v59 = vld [vmem:[#allocation19 + $0xf8] sm:$0xff] }
 0x8be   :  { %2971 = vmatpush3.msra.mxu1 %v2390_v60  ;;  %v2644_v60 = vld [vmem:[#allocation19 + $0xf0] sm:$0xff]  ;;  %2658 = vmatprep.subr.mxu0 %v2645_v59 }
 0x8bf   :  { %2972 = vmatprep.subr.mxu1 %v2405_v42  ;;  %v2643_v42 = vld [vmem:[#allocation19 + $0xe8] sm:$0xff]  ;;  %2659 = vmatpush1.msra.mxu0 %v2644_v60 }
 0x8c0   :  { %2973 = vmatpush3.msra.mxu1 %v2389_v39  ;;  %v2642_v39 = vld [vmem:[#allocation19 + $0xe0] sm:$0xff]  ;;  %2660 = vmatprep.subr.mxu0 %v2643_v42 }
 0x8c1   :  { %2561 = vmatprep.subr.mxu1 %v2514_v57  ;;  %2661 = vmatpush1.msra.mxu0 %v2642_v39 }
 0x961   :  { %v2330_v62 = vpop.f32.mrf.mxu1 }
 0x962   :  { %v2353_v2 = vmul.f32 %v2330_v62, %v4206_v54  ;;  %v2641_v62 = vld [vmem:[#allocation19 + $0xd8] sm:$0xff] }
 0x963   :  { %v2332_v45 = vpop.f32.mrf.mxu1  ;;  %2662 = vmatprep.subr.mxu0 %v2641_v62 }
 0x964   :  { %v2354_v4 = vmul.f32 %v2332_v45, %v4204_v31  ;;  %v2640_v45 = vld [vmem:[#allocation19 + $0xd0] sm:$0xff] }
 0x965   :  { %v2336_v43 = vpop.f32.mrf.mxu1  ;;  %2663 = vmatpush1.msra.mxu0 %v2640_v45 }
 0x966   :  { %v2355_v3 = vmul.f32 %v2336_v43, %v4212_v32  ;;  %v2639_v43 = vld [vmem:[#allocation19 + $0xc8] sm:$0xff] }
 0x967   :  { %v2338_v63 = vpop.f32.mrf.mxu1  ;;  %2664 = vmatprep.subr.mxu0 %v2639_v43 }
 0x968   :  { %v2361_v7 = vadd.f32 %v2355_v3, %v2353_v2  ;;  %v2356_v8 = vmul.f32 %v2338_v63, %v4210_v28  ;;  %v2638_v2 = vld [vmem:[#allocation19 + $0xc0] sm:$0xff]  ;;  %v2637_v3 = vld [vmem:[#allocation19 + $0xb8] sm:$0xff]  ;;  %v2636_v63 = vld [vmem:[#allocation19 + $0xb0] sm:$0xff] }
 0x969   :  { %v2342_v10 = vpop.f32.mrf.mxu1  ;;  %2665 = vmatpush1.msra.mxu0 %v2638_v2 }
 0x96a   :  { %v2368_v15 = vadd.f32 %v2356_v8, %v2354_v4  ;;  %v2362_v16 = vrot.slane %v2361_v7, 4  ;;  %v2357_v20 = vmul.f32 %v2342_v10, %v4218_v51  ;;  %v2635_v4 = vld [vmem:[#allocation19 + $0xa8] sm:$0xff]  ;;  %2666 = vmatprep.subr.mxu0 %v2637_v3  ;;  %v2633_v8 = vld [vmem:[#allocation19 + $0x98] sm:$0xff]  ;;  %v2632_v10 = vld [vmem:[#allocation19 + $0x90] sm:$0xff] }
 0x96b   :  { %v2344_v17 = vpop.f32.mrf.mxu1  ;;  %2667 = vmatpush1.msra.mxu0 %v2636_v63 }
 0x96c   :  { %v2369_v18 = vrot.slane %v2368_v15, 4  ;;  %v2363_v22 = vadd.f32 %v2362_v16, %v2361_v7  ;;  %v2358_v26 = vmul.f32 %v2344_v17, %v4216_v48  ;;  %v2634_v7 = vld [vmem:[#allocation19 + $0xa0] sm:$0xff]  ;;  %2668 = vmatprep.subr.mxu0 %v2635_v4  ;;  %v2629_v17 = vld [vmem:[#allocation19 + $0x78] sm:$0xff] }
 0x96d   :  { %v2348_v11 = vpop.f32.mrf.mxu1  ;;  %2669 = vmatpush1.msra.mxu0 %v2634_v7  ;;  %v2630_v16 = vld [vmem:[#allocation19 + $0x80] sm:$0xff] }
 0x96e   :  { %v2370_v19 = vadd.f32 %v2369_v18, %v2368_v15  ;;  %v2359_v21 = vmul.f32 %v2348_v11, %v4224_v53  ;;  %v2364_v5 = vrot.slane %v2363_v22, 2  ;;  %v2631_v15 = vld [vmem:[#allocation19 + $0x88] sm:$0xff]  ;;  %2670 = vmatprep.subr.mxu0 %v2633_v8  ;;  %v2628_v18 = vld [vmem:[#allocation19 + $0x70] sm:$0xff] }
 0x96f   :  { %v2350_v23 = vpop.f32.mrf.mxu1  ;;  %2671 = vmatpush1.msra.mxu0 %v2632_v10  ;;  %v2627_v11 = vld [vmem:[#allocation19 + $0x68] sm:$0xff] }
 0x970   :  { %v2375_v24 = vadd.f32 %v2359_v21, %v2357_v20  ;;  %v2360_v25 = vmul.f32 %v2350_v23, %v4222_v56  ;;  %v2371_v27 = vrot.slane %v2370_v19, 2  ;;  %v2365_v9 = vadd.f32 %v2364_v5, %v2363_v22  ;;  %2672 = vmatprep.subr.mxu0 %v2631_v15  ;;  %v2625_v20 = vld [vmem:[#allocation19 + $0x58] sm:$0xff]  ;;  %v2624_v21 = vld [vmem:[#allocation19 + $0x50] sm:$0xff]  ;;  %v2623_v22 = vld [vmem:[#allocation19 + $0x48] sm:$0xff] }
 0x971   :  { %2673 = vmatpush1.msra.mxu0 %v2630_v16  ;;  %v2622_v23 = vld [vmem:[#allocation19 + $0x40] sm:$0xff]  ;;  %v2615_v5 = vld [vmem:[#allocation19 + $0x8] sm:$0xff] }
 0x972   :  { %v2376_v29 = vrot.slane %v2375_v24, 4  ;;  %v2382_v30 = vadd.f32 %v2360_v25, %v2358_v26  ;;  %v2372_v33 = vadd.f32 %v2371_v27, %v2370_v19  ;;  %v2366_v47 = vrot.slane %v2365_v9, 1  ;;  %2674 = vmatprep.subr.mxu0 %v2629_v17  ;;  %v2626_v19 = vld [vmem:[#allocation19 + $0x60] sm:$0xff]  ;;  %v2621_v26 = vld [vmem:[#allocation19 + $0x38] sm:$0xff]  ;;  %v2619_v25 = vld [vmem:[#allocation19 + $0x28] sm:$0xff] }
 0x973   :  { %2675 = vmatpush1.msra.mxu0 %v2628_v18  ;;  %v2618_v27 = vld [vmem:[#allocation19 + $0x20] sm:$0xff] }
 0x974   :  { %v2377_v61 = vadd.f32 %v2376_v29, %v2375_v24  ;;  %v2383_v55 = vrot.slane %v2382_v30, 4  ;;  %v2373_v34 = vrot.slane %v2372_v33, 1  ;;  %v2367_v49 = vadd.f32 %v2366_v47, %v2365_v9  ;;  %2676 = vmatprep.subr.mxu0 %v2627_v11  ;;  %v2620_v24 = vld [vmem:[#allocation19 + $0x30] sm:$0xff]  ;;  %v2617_v29 = vld [vmem:[#allocation19 + $0x18] sm:$0xff]  ;;  %v2646_v16 = vld [vmem:[%s4432_s20] sm:$0x3] }
 0x975   :  { %2677 = vmatpush1.msra.mxu0 %v2626_v19  ;;  %v2651_v19 = vrot.slane %v2646_v16, %v3650_v44  ;;  %s3424_s20 = smov [#allocation20]  }
 0x976   :  { %v2378_v1 = vrot.slane %v2377_v61, 2  ;;  %v2384_v6 = vadd.f32 %v2383_v55, %v2382_v30  ;;  %v2374_v38 = vadd.f32 %v2373_v34, %v2372_v33  ;;  %2678 = vmatprep.subr.mxu0 %v2625_v20  ;;  %v2616_v30 = vld [vmem:[#allocation19 + $0x10] sm:$0xff]  ;;  %v3146_v55 = vld [vmem:[%s4446_s1] sm:$0xff]  ;;  %v3147_v33 = vld [vmem:[%s4446_s1 + $0x8] sm:$0xff]  ;;  %s2821_s2 = sshll.u32 %s3424_s20, 4  ;;  %s2822_s2 = int_to_ptr.vmem [resolvable:$true] %s2821_s2 }
 0x977   :  { %2679 = vmatpush1.msra.mxu0 %v2624_v21  ;;  %v2655_v21 = vrot.slane %v2646_v16, %v3928_v13  ;;  %s3370_s3 = scalar_lea.vmem %s2822_s2, 1024  ;;  %p3375_p0 = scmp.lt.s32.totalorder %s2822_s2, %s2822_s2 }
 0x978   :  { %v2379_v12 = vadd.f32 %v2378_v1, %v2377_v61  ;;  %v2385_v14 = vrot.slane %v2384_v6, 2  ;;  %2680 = vmatprep.subr.mxu0 %v2623_v22  ;;  %v2614_v61 = vld [vmem:[#allocation19] sm:$0xff]  ;;  %v3148_v1 = vld [vmem:[%s4446_s1 + $0x10] sm:$0xff]  ;;  %p3371_p13 = scmp.ne.s32.totalorder %s2822_s2, %s3370_s3  ;;  %p3376_p1 = scmp.lt.s32.totalorder %s3370_s3, %s3370_s3 }
 0x979   :  { %2681 = vmatpush1.msra.mxu0 %v2622_v23 }
 0x97a   :  { %v2380_v46 = vrot.slane %v2379_v12, 1  ;;  %v2386_v40 = vadd.f32 %v2385_v14, %v2384_v6  ;;  %2682 = vmatprep.subr.mxu0 %v2621_v26  ;;  %v3149_v6 = vld [vmem:[%s4446_s1 + $0x18] sm:$0xff]  ;;  %p3377_p2 = por %p3376_p1, %p3375_p0 }
 0x97b   :  { %2683 = vmatpush1.msra.mxu0 %v2620_v24 }
 0x97c   :  { %v2387_v36 = vrot.slane %v2386_v40, 1  ;;  %v2381_v35 = vadd.f32 %v2380_v46, %v2379_v12  ;;  %2684 = vmatprep.subr.mxu0 %v2619_v25  ;;  %v2862_v12 = vld [vmem:[%s4428_s16] ss:$0 sm:$0xff]  ;;  %p3378_p3 = pnand %p3377_p2, %p3371_p13 }
 0x97d   :  { %2685 = vmatpush1.msra.mxu0 %v2618_v27 }
 0x97e   :  { %v2388_v37 = vadd.f32 %v2387_v36, %v2386_v40  ;;  %v2432_v50 = vsel %vm244_vm1, %v2381_v35, %v2367_v49  ;;  %2686 = vmatprep.subr.mxu0 %v2617_v29 }
 0x97f   :  { %2687 = vmatpush1.msra.mxu0 %v2616_v30 }
 0x980   :  { %v2433_v52 = vsel %vm244_vm1, %v2388_v37, %v2374_v38  ;;  %2688 = vmatprep.subr.mxu0 %v2615_v5  ;;  %v2515_v37 = vld [vmem:[%s4430_s18] sm:$0x3] }
 0x981   :  { %2500 = vmatprep.mubr.f32.mxu1 %v2433_v52  ;;  %2689 = vmatpush1.msra.mxu0 %v2614_v61  ;;  %v2520_v49 = vrot.slane %v2515_v37, %v3650_v44  ;;  %v2524_v52 = vrot.slane %v2515_v37, %v3928_v13 }
 0x982   :  { %2501 = vmatmul.mubr.f32.vlgmr.msra.gmra.mxu1 %v2432_v50  ;;  %2723 = vmatmul.mubr.f32.vlgmr.msra.gmra.mxu0 %v3146_v55 }
 0x983   :  { %2595 = vmatprep.mubr.f32.mxu1 %v3421_v0  ;;  %2562 = vmatpush1.msra.mxu1 %v2513_v58 }
 0x984   :  { %2728 = vmatprep.mubr.f32.mxu0 %v3421_v0 }
 0x986   :  { %2729 = vmatmul.mubr.f32.gmra.mxu0 %v3147_v33 }
 0x987   :  { %2734 = vmatprep.mubr.f32.mxu0 %v3421_v0 }
 0x98a   :  { %2735 = vmatmul.mubr.f32.gmra.mxu0 %v3148_v1 }
 0x98b   :  { %2740 = vmatprep.mubr.f32.mxu0 %v3421_v0 }
 0x98e   :  { %2741 = vmatmul.mubr.f32.gmra.mxu0 %v3149_v6 }
 0xa42   :  { %v2974_v9 = vpop.f32.mrf.mxu1  ;;  %v2724_v45 = vpop.f32.mrf.mxu0 }
 0xa43   :  { %v2725_v24 = vadd.f32 %v2724_v45, %v2651_v19 }
 0xa44   :  { %v2975_v14 = vpop.f32.mrf.mxu1  ;;  %v2726_v3 = vpop.f32.mrf.mxu0 }
 0xa45   :  { %v2976_v46 = vadd.f32 %v2975_v14, %v2974_v9  ;;  %v2727_v27 = vadd.f32 %v2726_v3, %v2655_v21 }
 0xa46   :  { %v2730_v7 = vpop.f32.mrf.mxu0 }
 0xa47   :  { %v2503_v40 = vadd.f32 %v2976_v46, %v2862_v12  ;;  %v2731_v61 = vadd.f32 %v2730_v7, %v2651_v19 }
 0xa48   :  { %v2732_v8 = vpop.f32.mrf.mxu0 }
 0xa49   :  { %v2506_v34 = vsub.f32 0.0, %v2503_v40  ;;  %v2733_v55 = vadd.f32 %v2732_v8, %v2655_v21 }
 0xa4a   :  { %v2736_v10 = vpop.f32.mrf.mxu0 }
 0xa4b   :  { %v2507_v47 = vmul.f32 1.442695, %v2506_v34  ;;  %v2737_v33 = vadd.f32 %v2736_v10, %v2651_v19 }
 0xa4c   :  { %v2738_v17 = vpop.f32.mrf.mxu0 }
 0xa4d   :  { %3134 = vpow2.f32 %v2507_v47  ;;  %v2739_v1 = vadd.f32 %v2738_v17, %v2655_v21 }
 0xa4e   :  { %v2742_v22 = vpop.f32.mrf.mxu0 }
 0xa4f   :  { %v2743_v34 = vadd.f32 %v2742_v22, %v2651_v19 }
 0xa50   :  { %v2744_v5 = vpop.f32.mrf.mxu0 }
 0xa51   :  { %v2745_v47 = vadd.f32 %v2744_v5, %v2655_v21 }
 0xa5a   :  { %v3135_v36 = vpop.eup %3134 }
 0xa5b   :  { %v2509_v35 = vadd.f32 1.0, %v3135_v36 }
 0xa5d   :  { %3136 = vrcp.f32 %v2509_v35 }
 0xa6a   :  { %v3137_v0 = vpop.eup %3136 }
 0xa6b   :  { %v2512_v38 = vmul.f32 %v3137_v0, %v2503_v40 }
 0xa6d   :  { %2863 = vmatmul.mubr.msk.f32.vlgmr.msra.gmra.mxu1 %vm2527_vm6, %v2512_v38 }
 0xb2d   :  { %v2597_v50 = vpop.f32.mrf.mxu1 }
 0xb2e   :  { %v2598_v57 = vadd.f32 %v2597_v50, %v2520_v49 }
 0xb2f   :  { %v2599_v58 = vpop.f32.mrf.mxu1 }
 0xb30   :  { %v2602_v59 = vsub.f32 0.0, %v2598_v57  ;;  %v2600_v60 = vadd.f32 %v2599_v58, %v2524_v52 }
 0xb32   :  { %v2604_v42 = vmul.f32 1.442695, %v2602_v59  ;;  %v2603_v39 = vsub.f32 0.0, %v2600_v60 }
 0xb34   :  { %3138 = vpow2.f32 %v2604_v42  ;;  %v2606_v62 = vmul.f32 1.442695, %v2603_v39 }
 0xb36   :  { %3140 = vpow2.f32 %v2606_v62 }
 0xb41   :  { %v3139_v43 = vpop.eup %3138 }
 0xb42   :  { %v2608_v2 = vadd.f32 1.0, %v3139_v43 }
 0xb43   :  { %v3141_v63 = vpop.eup %3140 }
 0xb44   :  { %v2609_v4 = vadd.f32 1.0, %v3141_v63  ;;  %3142 = vrcp.f32 %v2608_v2 }
 0xb46   :  { %3144 = vrcp.f32 %v2609_v4 }
 0xb51   :  { %v3143_v15 = vpop.eup %3142 }
 0xb53   :  { %v3145_v18 = vpop.eup %3144 }
 0xb54   :  { %v2749_v11 = vcombine.low %v3143_v15, %v3145_v18 }
 0xb56   :  { %v2756_v20 = vrot.slane %v2749_v11, %v3646_v41 }
 0xb58   :  { %v2764_v23 = vrot.slane %v2756_v20, %v3646_v41  ;;  %v2757_v26 = vcombine.high %v2756_v20, %v2756_v20 }
 0xb5a   :  { %v2775_v25 = vrot.slane %v2764_v23, %v3650_v44  ;;  %v2779_v29 = vrot.slane %v2764_v23, %v3928_v13  ;;  %v2771_v30 = vrot.slane %v2757_v26, %v3646_v41 }
 0xb5c   :  { %v2792_v6 = vmul.f32 %v2775_v25, %v4206_v54  ;;  %v2793_v9 = vmul.f32 %v2779_v29, %v4204_v31  ;;  %v2794_v12 = vmul.f32 %v2775_v25, %v4212_v32  ;;  %v2795_v14 = vmul.f32 %v2779_v29, %v4210_v28 }
 0xb5d   :  { %v2783_v46 = vrot.slane %v2771_v30, %v3650_v44  ;;  %v2787_v40 = vrot.slane %v2771_v30, %v3928_v13 }
 0xb5e   :  { %v2800_v41 = vadd.f32 %v2792_v6, %v2725_v24  ;;  %v2801_v36 = vadd.f32 %v2793_v9, %v2727_v27  ;;  %v2802_v35 = vadd.f32 %v2794_v12, %v2731_v61  ;;  %v2803_v0 = vadd.f32 %v2795_v14, %v2733_v55 }
 0xb5f   :  { %v2796_v54 = vmul.f32 %v2783_v46, %v4218_v51  ;;  %v2797_v31 = vmul.f32 %v2787_v40, %v4216_v48  ;;  %v2798_v32 = vmul.f32 %v2783_v46, %v4224_v53  ;;  %v2799_v28 = vmul.f32 %v2787_v40, %v4222_v56 }
 0xb60   :  { %2808 = vst [vmem:[#allocation20] sm:$0xff] %v2800_v41  ;;  %2809 = vst [vmem:[#allocation20 + $0x8] sm:$0xff] %v2801_v36 }
 0xb61   :  { %2810 = vst [vmem:[#allocation20 + $0x10] sm:$0xff] %v2802_v35  ;;  %2811 = vst [vmem:[#allocation20 + $0x18] sm:$0xff] %v2803_v0  ;;  %v2804_v44 = vadd.f32 %v2796_v54, %v2737_v33  ;;  %v2805_v13 = vadd.f32 %v2797_v31, %v2739_v1  ;;  %v2806_v38 = vadd.f32 %v2798_v32, %v2743_v34 }
 0xb62   :  { %v2807_v37 = vadd.f32 %v2799_v28, %v2745_v47 }
 0xb63   :  { %2812 = vst [vmem:[#allocation20 + $0x20] sm:$0xff] %v2804_v44  ;;  %2813 = vst [vmem:[#allocation20 + $0x28] sm:$0xff] %v2805_v13 }
 0xb64   :  { %2814 = vst [vmem:[#allocation20 + $0x30] sm:$0xff] %v2806_v38  ;;  %2815 = vst [vmem:[#allocation20 + $0x38] sm:$0xff] %v2807_v37 }
 0xb65   :  { %3381 = shalt.err (!%p3378_p3)
}
 0xb66   :  { %2827 = dma.vmem_to_hbm [thread:$0]  %s2822_s2, 1024, %s4433_s21, [#allocation4], %s3409_s25, %s3409_s25, %s3410_s0  }
 0xb67   :  { %3402 = dma.done.wait [#allocation4], 1024  }
 0xb68   :  { %3403 = vsyncadd [#allocation4], 4294966272 }
 0xb69   :  { %2831 = vsyncpa [#allocation3], 1 }
 0xb6a   :  { %2832 = vsyncpa [#allocation6], 1 }
 0xb6b   :  { %2833 = vsyncpa [#allocation9], 1 }
 0xb6c   :  { %2834 = vsyncpa [#allocation12], 1 }
 0xb6d   :  { %2835 = vsyncpa [#allocation15], 1 }
 0xb6e   :  { %2836 = vsyncpa [#allocation18], 1 }
 0xb6f   :  { %2837 = vsyncpa [#allocation4], 1 }

</bundles_post_ra>
